<compile_context>
chip_gen: v6e
topology: v6e:2x2x1
jax: 0.10.0
libtpu: 0.0.40
codegen_flags: <defaults>
</compile_context>

<pallas_src>
import jax
import jax.numpy as jnp
from jax.experimental import pallas as pl
from jax.experimental.pallas import tpu as pltpu

GATE_LANES = 128  # each LSTM gate is padded to one full lane tile


# ---------------------------------------------------------------------------
# Kernel
# ---------------------------------------------------------------------------
def encoder_kernel(x_ref, w1_ref, u1_ref, b1_ref, w2_ref, b2_ref, out_ref):
    GL = GATE_LANES
    TB, _ = x_ref.shape          # (T*Bp, F), time-major rows
    Bp, _ = out_ref.shape        # (Bp, 128)
    T = TB // Bp

    # --- hoisted layer-1 input projection (+ bias) for ALL timesteps -------
    #   one (T*Bp, F) @ (F, 4*GL) matmul instead of T separate dots
    xp = jnp.dot(x_ref[...], w1_ref[...],
                 preferred_element_type=jnp.float32) + b1_ref[...]

    u1 = u1_ref[...]             # (GL, 4*GL)   layer-1 recurrent weights
    w2 = w2_ref[...]             # (2*GL, 4*GL) layer-2 fused [ih ; hh]
    # hoist the layer-2 bias broadcast out of the unrolled loop
    b2b = jnp.broadcast_to(b2_ref[...], (Bp, 4 * GL))

    h1 = jnp.zeros((Bp, GL), jnp.float32)
    c1 = jnp.zeros((Bp, GL), jnp.float32)
    h2 = jnp.zeros((Bp, GL), jnp.float32)
    c2 = jnp.zeros((Bp, GL), jnp.float32)

    def split_gates(g):
        # every slice is a whole 128-lane tile -> no relayout
        i = jax.nn.sigmoid(g[:, 0 * GL:1 * GL])
        f = jax.nn.sigmoid(g[:, 1 * GL:2 * GL])
        gg = jnp.tanh(g[:, 2 * GL:3 * GL])
        o = jax.nn.sigmoid(g[:, 3 * GL:4 * GL])
        return i, f, gg, o

    # static unroll over the (small) sequence length
    for t in range(T):
        # ---- layer 1: recurrent matmul only (input part precomputed) ----
        g1 = xp[t * Bp:(t + 1) * Bp, :] + jnp.dot(
            h1, u1, preferred_element_type=jnp.float32)
        i1, f1, gg1, o1 = split_gates(g1)
        c1 = f1 * c1 + i1 * gg1
        h1 = o1 * jnp.tanh(c1)

        # ---- layer 2: single fused matmul over [h1 | h2] -----------------
        hcat = jnp.concatenate([h1, h2], axis=1)          # (Bp, 2*GL)
        g2 = jnp.dot(hcat, w2, preferred_element_type=jnp.float32) + b2b
        i2, f2, gg2, o2 = split_gates(g2)
        c2 = f2 * c2 + i2 * gg2
        h2 = o2 * jnp.tanh(c2)

    # lane-dense store; wrapper slices the first 8 lanes
    out_ref[...] = h2


# ---------------------------------------------------------------------------
# Wrapper
# ---------------------------------------------------------------------------
def encoder_forward(x, packed, h2_size=8):
    """x: (B, T, F) float32, batch_first. Returns (B, 1, h2_size) float32."""
    B, T, F = x.shape
    Bp = ((B + 7) // 8) * 8                  # sublane-align the batch
    if Bp != B:
        x = jnp.pad(x, ((0, Bp - B), (0, 0), (0, 0)))

    # time-major + flattened: row index = t*Bp + b, so per-step slices inside
    # the kernel are static, sublane-aligned row blocks.
    x2d = jnp.transpose(x, (1, 0, 2)).reshape(T * Bp, F)

    vmem = pl.BlockSpec(memory_space=pltpu.MemorySpace.VMEM)
    h_final = pl.pallas_call(
        encoder_kernel,
        out_shape=jax.ShapeDtypeStruct((Bp, GATE_LANES), jnp.float32),
        in_specs=[vmem] * 6,
        out_specs=vmem,
    )(x2d, packed["w1"], packed["u1"], packed["b1"],
      packed["w2"], packed["b2"])

    return h_final[:B, :h2_size].reshape(-1, 1, h2_size)


# ---------------------------------------------------------------------------
# Parameters: unpadded (PyTorch-like) init + packing into the kernel layout
# ---------------------------------------------------------------------------
def init_params(key, num_features=26, h1=24, h2=8):
    """PyTorch-style uniform init. Weights stored transposed (in, 4H), gate
    order [i, f, g, o]; b_ih + b_hh folded into one (4H,) bias per layer."""
    ks = jax.random.split(key, 8)

    def u(k, shape, fan):
        bound = 1.0 / jnp.sqrt(jnp.float32(fan))
        return jax.random.uniform(k, shape, jnp.float32, -bound, bound)

    wih1 = u(ks[0], (num_features, 4 * h1), h1)
    whh1 = u(ks[1], (h1, 4 * h1), h1)
    b1 = u(ks[2], (4 * h1,), h1) + u(ks[3], (4 * h1,), h1)

    wih2 = u(ks[4], (h1, 4 * h2), h2)
    whh2 = u(ks[5], (h2, 4 * h2), h2)
    b2 = u(ks[6], (4 * h2,), h2) + u(ks[7], (4 * h2,), h2)

    return dict(wih1=wih1, whh1=whh1, b1=b1, wih2=wih2, whh2=whh2, b2=b2)


def _pad_gate_cols(w, h, lanes=GATE_LANES):
    """(in_dim, 4*h) -> (in_dim, 4*lanes): each gate block zero-padded to a
    full lane tile so in-kernel gate slices are lane-aligned."""
    in_dim = w.shape[0]
    w4 = w.reshape(in_dim, 4, h)
    out = jnp.zeros((in_dim, 4, lanes), w.dtype).at[:, :, :h].set(w4)
    return out.reshape(in_dim, 4 * lanes)


def pack_params(p, h1=24, h2=8):
    GL = GATE_LANES
    # layer 1: input weights (F, 4*GL); recurrent weights padded to GL rows
    w1 = _pad_gate_cols(p["wih1"], h1)
    u1 = jnp.zeros((GL, 4 * GL), jnp.float32).at[:h1, :].set(
        _pad_gate_cols(p["whh1"], h1))
    b1 = _pad_gate_cols(p["b1"].reshape(1, 4 * h1), h1)
    # layer 2: fused [w_ih ; w_hh] over the concatenated [h1 | h2] input
    w2 = jnp.zeros((2 * GL, 4 * GL), jnp.float32)
    w2 = w2.at[:h1, :].set(_pad_gate_cols(p["wih2"], h2))
    w2 = w2.at[GL:GL + h2, :].set(_pad_gate_cols(p["whh2"], h2))
    b2 = _pad_gate_cols(p["b2"].reshape(1, 4 * h2), h2)
    return dict(w1=w1, u1=u1, b1=b1, w2=w2, b2=b2)


# ---------------------------------------------------------------------------
# Pure-JAX reference (PyTorch LSTM semantics) for a correctness check
# ---------------------------------------------------------------------------
def _lstm_ref(xs, w_ih, w_hh, b, hsz):
    B, T, _ = xs.shape
    h = jnp.zeros((B, hsz), jnp.float32)
    c = jnp.zeros((B, hsz), jnp.float32)
    outs = []
    hp = jax.lax.Precision.HIGHEST
    for t in range(T):
        g = (jnp.dot(xs[:, t, :], w_ih, precision=hp)
             + jnp.dot(h, w_hh, precision=hp) + b)
        i = jax.nn.sigmoid(g[:, 0 * hsz:1 * hsz])
        f = jax.nn.sigmoid(g[:, 1 * hsz:2 * hsz])
        gg = jnp.tanh(g[:, 2 * hsz:3 * hsz])
        o = jax.nn.sigmoid(g[:, 3 * hsz:4 * hsz])
        c = f * c + i * gg
        h = o * jnp.tanh(c)
        outs.append(h)
    return jnp.stack(outs, axis=1), h


def encoder_reference(x, p, h1=24, h2=8):
    y1, _ = _lstm_ref(x, p["wih1"], p["whh1"], p["b1"], h1)
    _, h_fin = _lstm_ref(y1, p["wih2"], p["whh2"], p["b2"], h2)
    return h_fin.reshape(-1, 1, h2)


# ---------------------------------------------------------------------------
if __name__ == "__main__":
    SEQ_LEN = 5
    NUM_FEATURES = 26
    BATCH = 4
    H1, H2 = 24, 8

    key = jax.random.PRNGKey(0)
    k_x, k_p = jax.random.split(key)

    x = jax.random.normal(k_x, (BATCH, SEQ_LEN, NUM_FEATURES), jnp.float32)
    params = init_params(k_p, num_features=NUM_FEATURES, h1=H1, h2=H2)
    packed = pack_params(params, h1=H1, h2=H2)

    out = encoder_forward(x, packed, h2_size=H2)
    out = jax.block_until_ready(out)

    assert out.shape == (BATCH, 1, H2), out.shape
    assert out.dtype == jnp.float32

    ref = encoder_reference(x, params, h1=H1, h2=H2)
    err = float(jnp.max(jnp.abs(out - ref)))
    assert err < 1e-2, f"max abs err vs reference: {err}"

    print("KERNEL_OK")
</pallas_src>

<mosaic_0001>
module attributes {stable_mosaic.version = 11 : i64} {
  func.func @encoder_kernel(%arg0: memref<40x26xf32, #tpu.memory_space<vmem>>, %arg1: memref<26x512xf32, #tpu.memory_space<vmem>>, %arg2: memref<128x512xf32, #tpu.memory_space<vmem>>, %arg3: memref<1x512xf32, #tpu.memory_space<vmem>>, %arg4: memref<256x512xf32, #tpu.memory_space<vmem>>, %arg5: memref<1x512xf32, #tpu.memory_space<vmem>>, %arg6: memref<8x128xf32, #tpu.memory_space<vmem>>) attributes {dimension_semantics = [], scalar_prefetch = 0 : i64, scratch_operands = 0 : i64, tpu.core_type = #tpu.core_type<tc>} {
    %c0 = arith.constant 0 : index
    %c0_0 = arith.constant 0 : index
    %0 = vector.load %arg0[%c0, %c0_0] : memref<40x26xf32, #tpu.memory_space<vmem>>, vector<40x26xf32>
    %c0_1 = arith.constant 0 : index
    %c0_2 = arith.constant 0 : index
    %1 = vector.load %arg1[%c0_1, %c0_2] : memref<26x512xf32, #tpu.memory_space<vmem>>, vector<26x512xf32>
    %cst = arith.constant dense<0.000000e+00> : vector<40x512xf32>
    %2 = tpu.matmul %0, %1, %cst {dimension_numbers = #tpu.dot_dimension_numbers<[1], [0], [0], [1], [0, 0, 1, 1], [], []>} : vector<40x26xf32>, vector<26x512xf32>, vector<40x512xf32> -> vector<40x512xf32>
    %c0_3 = arith.constant 0 : index
    %c0_4 = arith.constant 0 : index
    %3 = vector.load %arg3[%c0_3, %c0_4] : memref<1x512xf32, #tpu.memory_space<vmem>>, vector<1x512xf32>
    %4 = vector.broadcast %3 : vector<1x512xf32> to vector<40x512xf32>
    %5 = arith.addf %2, %4 : vector<40x512xf32>
    %c0_5 = arith.constant 0 : index
    %c0_6 = arith.constant 0 : index
    %6 = vector.load %arg2[%c0_5, %c0_6] : memref<128x512xf32, #tpu.memory_space<vmem>>, vector<128x512xf32>
    %c0_7 = arith.constant 0 : index
    %c0_8 = arith.constant 0 : index
    %7 = vector.load %arg4[%c0_7, %c0_8] : memref<256x512xf32, #tpu.memory_space<vmem>>, vector<256x512xf32>
    %c0_9 = arith.constant 0 : index
    %c0_10 = arith.constant 0 : index
    %8 = vector.load %arg5[%c0_9, %c0_10] : memref<1x512xf32, #tpu.memory_space<vmem>>, vector<1x512xf32>
    %9 = vector.shape_cast %8 : vector<1x512xf32> to vector<1x512xf32>
    %10 = vector.broadcast %9 : vector<1x512xf32> to vector<8x512xf32>
    %cst_11 = arith.constant 0.000000e+00 : f32
    %11 = vector.broadcast %cst_11 : f32 to vector<8x128xf32>
    %cst_12 = arith.constant 0.000000e+00 : f32
    %12 = vector.broadcast %cst_12 : f32 to vector<8x128xf32>
    %cst_13 = arith.constant 0.000000e+00 : f32
    %13 = vector.broadcast %cst_13 : f32 to vector<8x128xf32>
    %cst_14 = arith.constant 0.000000e+00 : f32
    %14 = vector.broadcast %cst_14 : f32 to vector<8x128xf32>
    %15 = vector.extract_strided_slice %5 {offsets = [0, 0], sizes = [8, 512], strides = [1, 1]} : vector<40x512xf32> to vector<8x512xf32>
    %cst_15 = arith.constant dense<0.000000e+00> : vector<8x512xf32>
    %16 = tpu.matmul %11, %6, %cst_15 {dimension_numbers = #tpu.dot_dimension_numbers<[1], [0], [0], [1], [0, 0, 1, 1], [], []>} : vector<8x128xf32>, vector<128x512xf32>, vector<8x512xf32> -> vector<8x512xf32>
    %17 = arith.addf %15, %16 : vector<8x512xf32>
    %18 = vector.extract_strided_slice %17 {offsets = [0, 0], sizes = [8, 128], strides = [1, 1]} : vector<8x512xf32> to vector<8x128xf32>
    %19 = arith.negf %18 : vector<8x128xf32>
    %20 = math.exp %19 : vector<8x128xf32>
    %cst_16 = arith.constant 1.000000e+00 : f32
    %21 = vector.broadcast %cst_16 : f32 to vector<8x128xf32>
    %22 = arith.addf %21, %20 : vector<8x128xf32>
    %23 = arith.divf %21, %22 : vector<8x128xf32>
    %24 = vector.extract_strided_slice %17 {offsets = [0, 128], sizes = [8, 128], strides = [1, 1]} : vector<8x512xf32> to vector<8x128xf32>
    %25 = arith.negf %24 : vector<8x128xf32>
    %26 = math.exp %25 : vector<8x128xf32>
    %cst_17 = arith.constant 1.000000e+00 : f32
    %27 = vector.broadcast %cst_17 : f32 to vector<8x128xf32>
    %28 = arith.addf %27, %26 : vector<8x128xf32>
    %29 = arith.divf %27, %28 : vector<8x128xf32>
    %30 = vector.extract_strided_slice %17 {offsets = [0, 256], sizes = [8, 128], strides = [1, 1]} : vector<8x512xf32> to vector<8x128xf32>
    %31 = math.tanh %30 : vector<8x128xf32>
    %32 = vector.extract_strided_slice %17 {offsets = [0, 384], sizes = [8, 128], strides = [1, 1]} : vector<8x512xf32> to vector<8x128xf32>
    %33 = arith.negf %32 : vector<8x128xf32>
    %34 = math.exp %33 : vector<8x128xf32>
    %cst_18 = arith.constant 1.000000e+00 : f32
    %35 = vector.broadcast %cst_18 : f32 to vector<8x128xf32>
    %36 = arith.addf %35, %34 : vector<8x128xf32>
    %37 = arith.divf %35, %36 : vector<8x128xf32>
    %38 = arith.mulf %29, %12 : vector<8x128xf32>
    %39 = arith.mulf %23, %31 : vector<8x128xf32>
    %40 = arith.addf %38, %39 : vector<8x128xf32>
    %41 = math.tanh %40 : vector<8x128xf32>
    %42 = arith.mulf %37, %41 : vector<8x128xf32>
    %43 = tpu.concatenate %42, %13 in 1 : vector<8x128xf32>, vector<8x128xf32> -> vector<8x256xf32>
    %cst_19 = arith.constant dense<0.000000e+00> : vector<8x512xf32>
    %44 = tpu.matmul %43, %7, %cst_19 {dimension_numbers = #tpu.dot_dimension_numbers<[1], [0], [0], [1], [0, 0, 1, 1], [], []>} : vector<8x256xf32>, vector<256x512xf32>, vector<8x512xf32> -> vector<8x512xf32>
    %45 = arith.addf %44, %10 : vector<8x512xf32>
    %46 = vector.extract_strided_slice %45 {offsets = [0, 0], sizes = [8, 128], strides = [1, 1]} : vector<8x512xf32> to vector<8x128xf32>
    %47 = arith.negf %46 : vector<8x128xf32>
    %48 = math.exp %47 : vector<8x128xf32>
    %cst_20 = arith.constant 1.000000e+00 : f32
    %49 = vector.broadcast %cst_20 : f32 to vector<8x128xf32>
    %50 = arith.addf %49, %48 : vector<8x128xf32>
    %51 = arith.divf %49, %50 : vector<8x128xf32>
    %52 = vector.extract_strided_slice %45 {offsets = [0, 128], sizes = [8, 128], strides = [1, 1]} : vector<8x512xf32> to vector<8x128xf32>
    %53 = arith.negf %52 : vector<8x128xf32>
    %54 = math.exp %53 : vector<8x128xf32>
    %cst_21 = arith.constant 1.000000e+00 : f32
    %55 = vector.broadcast %cst_21 : f32 to vector<8x128xf32>
    %56 = arith.addf %55, %54 : vector<8x128xf32>
    %57 = arith.divf %55, %56 : vector<8x128xf32>
    %58 = vector.extract_strided_slice %45 {offsets = [0, 256], sizes = [8, 128], strides = [1, 1]} : vector<8x512xf32> to vector<8x128xf32>
    %59 = math.tanh %58 : vector<8x128xf32>
    %60 = vector.extract_strided_slice %45 {offsets = [0, 384], sizes = [8, 128], strides = [1, 1]} : vector<8x512xf32> to vector<8x128xf32>
    %61 = arith.negf %60 : vector<8x128xf32>
    %62 = math.exp %61 : vector<8x128xf32>
    %cst_22 = arith.constant 1.000000e+00 : f32
    %63 = vector.broadcast %cst_22 : f32 to vector<8x128xf32>
    %64 = arith.addf %63, %62 : vector<8x128xf32>
    %65 = arith.divf %63, %64 : vector<8x128xf32>
    %66 = arith.mulf %57, %14 : vector<8x128xf32>
    %67 = arith.mulf %51, %59 : vector<8x128xf32>
    %68 = arith.addf %66, %67 : vector<8x128xf32>
    %69 = math.tanh %68 : vector<8x128xf32>
    %70 = arith.mulf %65, %69 : vector<8x128xf32>
    %71 = vector.extract_strided_slice %5 {offsets = [8, 0], sizes = [8, 512], strides = [1, 1]} : vector<40x512xf32> to vector<8x512xf32>
    %cst_23 = arith.constant dense<0.000000e+00> : vector<8x512xf32>
    %72 = tpu.matmul %42, %6, %cst_23 {dimension_numbers = #tpu.dot_dimension_numbers<[1], [0], [0], [1], [0, 0, 1, 1], [], []>} : vector<8x128xf32>, vector<128x512xf32>, vector<8x512xf32> -> vector<8x512xf32>
    %73 = arith.addf %71, %72 : vector<8x512xf32>
    %74 = vector.extract_strided_slice %73 {offsets = [0, 0], sizes = [8, 128], strides = [1, 1]} : vector<8x512xf32> to vector<8x128xf32>
    %75 = arith.negf %74 : vector<8x128xf32>
    %76 = math.exp %75 : vector<8x128xf32>
    %cst_24 = arith.constant 1.000000e+00 : f32
    %77 = vector.broadcast %cst_24 : f32 to vector<8x128xf32>
    %78 = arith.addf %77, %76 : vector<8x128xf32>
    %79 = arith.divf %77, %78 : vector<8x128xf32>
    %80 = vector.extract_strided_slice %73 {offsets = [0, 128], sizes = [8, 128], strides = [1, 1]} : vector<8x512xf32> to vector<8x128xf32>
    %81 = arith.negf %80 : vector<8x128xf32>
    %82 = math.exp %81 : vector<8x128xf32>
    %cst_25 = arith.constant 1.000000e+00 : f32
    %83 = vector.broadcast %cst_25 : f32 to vector<8x128xf32>
    %84 = arith.addf %83, %82 : vector<8x128xf32>
    %85 = arith.divf %83, %84 : vector<8x128xf32>
    %86 = vector.extract_strided_slice %73 {offsets = [0, 256], sizes = [8, 128], strides = [1, 1]} : vector<8x512xf32> to vector<8x128xf32>
    %87 = math.tanh %86 : vector<8x128xf32>
    %88 = vector.extract_strided_slice %73 {offsets = [0, 384], sizes = [8, 128], strides = [1, 1]} : vector<8x512xf32> to vector<8x128xf32>
    %89 = arith.negf %88 : vector<8x128xf32>
    %90 = math.exp %89 : vector<8x128xf32>
    %cst_26 = arith.constant 1.000000e+00 : f32
    %91 = vector.broadcast %cst_26 : f32 to vector<8x128xf32>
    %92 = arith.addf %91, %90 : vector<8x128xf32>
    %93 = arith.divf %91, %92 : vector<8x128xf32>
    %94 = arith.mulf %85, %40 : vector<8x128xf32>
    %95 = arith.mulf %79, %87 : vector<8x128xf32>
    %96 = arith.addf %94, %95 : vector<8x128xf32>
    %97 = math.tanh %96 : vector<8x128xf32>
    %98 = arith.mulf %93, %97 : vector<8x128xf32>
    %99 = tpu.concatenate %98, %70 in 1 : vector<8x128xf32>, vector<8x128xf32> -> vector<8x256xf32>
    %cst_27 = arith.constant dense<0.000000e+00> : vector<8x512xf32>
    %100 = tpu.matmul %99, %7, %cst_27 {dimension_numbers = #tpu.dot_dimension_numbers<[1], [0], [0], [1], [0, 0, 1, 1], [], []>} : vector<8x256xf32>, vector<256x512xf32>, vector<8x512xf32> -> vector<8x512xf32>
    %101 = arith.addf %100, %10 : vector<8x512xf32>
    %102 = vector.extract_strided_slice %101 {offsets = [0, 0], sizes = [8, 128], strides = [1, 1]} : vector<8x512xf32> to vector<8x128xf32>
    %103 = arith.negf %102 : vector<8x128xf32>
    %104 = math.exp %103 : vector<8x128xf32>
    %cst_28 = arith.constant 1.000000e+00 : f32
    %105 = vector.broadcast %cst_28 : f32 to vector<8x128xf32>
    %106 = arith.addf %105, %104 : vector<8x128xf32>
    %107 = arith.divf %105, %106 : vector<8x128xf32>
    %108 = vector.extract_strided_slice %101 {offsets = [0, 128], sizes = [8, 128], strides = [1, 1]} : vector<8x512xf32> to vector<8x128xf32>
    %109 = arith.negf %108 : vector<8x128xf32>
    %110 = math.exp %109 : vector<8x128xf32>
    %cst_29 = arith.constant 1.000000e+00 : f32
    %111 = vector.broadcast %cst_29 : f32 to vector<8x128xf32>
    %112 = arith.addf %111, %110 : vector<8x128xf32>
    %113 = arith.divf %111, %112 : vector<8x128xf32>
    %114 = vector.extract_strided_slice %101 {offsets = [0, 256], sizes = [8, 128], strides = [1, 1]} : vector<8x512xf32> to vector<8x128xf32>
    %115 = math.tanh %114 : vector<8x128xf32>
    %116 = vector.extract_strided_slice %101 {offsets = [0, 384], sizes = [8, 128], strides = [1, 1]} : vector<8x512xf32> to vector<8x128xf32>
    %117 = arith.negf %116 : vector<8x128xf32>
    %118 = math.exp %117 : vector<8x128xf32>
    %cst_30 = arith.constant 1.000000e+00 : f32
    %119 = vector.broadcast %cst_30 : f32 to vector<8x128xf32>
    %120 = arith.addf %119, %118 : vector<8x128xf32>
    %121 = arith.divf %119, %120 : vector<8x128xf32>
    %122 = arith.mulf %113, %68 : vector<8x128xf32>
    %123 = arith.mulf %107, %115 : vector<8x128xf32>
    %124 = arith.addf %122, %123 : vector<8x128xf32>
    %125 = math.tanh %124 : vector<8x128xf32>
    %126 = arith.mulf %121, %125 : vector<8x128xf32>
    %127 = vector.extract_strided_slice %5 {offsets = [16, 0], sizes = [8, 512], strides = [1, 1]} : vector<40x512xf32> to vector<8x512xf32>
    %cst_31 = arith.constant dense<0.000000e+00> : vector<8x512xf32>
    %128 = tpu.matmul %98, %6, %cst_31 {dimension_numbers = #tpu.dot_dimension_numbers<[1], [0], [0], [1], [0, 0, 1, 1], [], []>} : vector<8x128xf32>, vector<128x512xf32>, vector<8x512xf32> -> vector<8x512xf32>
    %129 = arith.addf %127, %128 : vector<8x512xf32>
    %130 = vector.extract_strided_slice %129 {offsets = [0, 0], sizes = [8, 128], strides = [1, 1]} : vector<8x512xf32> to vector<8x128xf32>
    %131 = arith.negf %130 : vector<8x128xf32>
    %132 = math.exp %131 : vector<8x128xf32>
    %cst_32 = arith.constant 1.000000e+00 : f32
    %133 = vector.broadcast %cst_32 : f32 to vector<8x128xf32>
    %134 = arith.addf %133, %132 : vector<8x128xf32>
    %135 = arith.divf %133, %134 : vector<8x128xf32>
    %136 = vector.extract_strided_slice %129 {offsets = [0, 128], sizes = [8, 128], strides = [1, 1]} : vector<8x512xf32> to vector<8x128xf32>
    %137 = arith.negf %136 : vector<8x128xf32>
    %138 = math.exp %137 : vector<8x128xf32>
    %cst_33 = arith.constant 1.000000e+00 : f32
    %139 = vector.broadcast %cst_33 : f32 to vector<8x128xf32>
    %140 = arith.addf %139, %138 : vector<8x128xf32>
    %141 = arith.divf %139, %140 : vector<8x128xf32>
    %142 = vector.extract_strided_slice %129 {offsets = [0, 256], sizes = [8, 128], strides = [1, 1]} : vector<8x512xf32> to vector<8x128xf32>
    %143 = math.tanh %142 : vector<8x128xf32>
    %144 = vector.extract_strided_slice %129 {offsets = [0, 384], sizes = [8, 128], strides = [1, 1]} : vector<8x512xf32> to vector<8x128xf32>
    %145 = arith.negf %144 : vector<8x128xf32>
    %146 = math.exp %145 : vector<8x128xf32>
    %cst_34 = arith.constant 1.000000e+00 : f32
    %147 = vector.broadcast %cst_34 : f32 to vector<8x128xf32>
    %148 = arith.addf %147, %146 : vector<8x128xf32>
    %149 = arith.divf %147, %148 : vector<8x128xf32>
    %150 = arith.mulf %141, %96 : vector<8x128xf32>
    %151 = arith.mulf %135, %143 : vector<8x128xf32>
    %152 = arith.addf %150, %151 : vector<8x128xf32>
    %153 = math.tanh %152 : vector<8x128xf32>
    %154 = arith.mulf %149, %153 : vector<8x128xf32>
    %155 = tpu.concatenate %154, %126 in 1 : vector<8x128xf32>, vector<8x128xf32> -> vector<8x256xf32>
    %cst_35 = arith.constant dense<0.000000e+00> : vector<8x512xf32>
    %156 = tpu.matmul %155, %7, %cst_35 {dimension_numbers = #tpu.dot_dimension_numbers<[1], [0], [0], [1], [0, 0, 1, 1], [], []>} : vector<8x256xf32>, vector<256x512xf32>, vector<8x512xf32> -> vector<8x512xf32>
    %157 = arith.addf %156, %10 : vector<8x512xf32>
    %158 = vector.extract_strided_slice %157 {offsets = [0, 0], sizes = [8, 128], strides = [1, 1]} : vector<8x512xf32> to vector<8x128xf32>
    %159 = arith.negf %158 : vector<8x128xf32>
    %160 = math.exp %159 : vector<8x128xf32>
    %cst_36 = arith.constant 1.000000e+00 : f32
    %161 = vector.broadcast %cst_36 : f32 to vector<8x128xf32>
    %162 = arith.addf %161, %160 : vector<8x128xf32>
    %163 = arith.divf %161, %162 : vector<8x128xf32>
    %164 = vector.extract_strided_slice %157 {offsets = [0, 128], sizes = [8, 128], strides = [1, 1]} : vector<8x512xf32> to vector<8x128xf32>
    %165 = arith.negf %164 : vector<8x128xf32>
    %166 = math.exp %165 : vector<8x128xf32>
    %cst_37 = arith.constant 1.000000e+00 : f32
    %167 = vector.broadcast %cst_37 : f32 to vector<8x128xf32>
    %168 = arith.addf %167, %166 : vector<8x128xf32>
    %169 = arith.divf %167, %168 : vector<8x128xf32>
    %170 = vector.extract_strided_slice %157 {offsets = [0, 256], sizes = [8, 128], strides = [1, 1]} : vector<8x512xf32> to vector<8x128xf32>
    %171 = math.tanh %170 : vector<8x128xf32>
    %172 = vector.extract_strided_slice %157 {offsets = [0, 384], sizes = [8, 128], strides = [1, 1]} : vector<8x512xf32> to vector<8x128xf32>
    %173 = arith.negf %172 : vector<8x128xf32>
    %174 = math.exp %173 : vector<8x128xf32>
    %cst_38 = arith.constant 1.000000e+00 : f32
    %175 = vector.broadcast %cst_38 : f32 to vector<8x128xf32>
    %176 = arith.addf %175, %174 : vector<8x128xf32>
    %177 = arith.divf %175, %176 : vector<8x128xf32>
    %178 = arith.mulf %169, %124 : vector<8x128xf32>
    %179 = arith.mulf %163, %171 : vector<8x128xf32>
    %180 = arith.addf %178, %179 : vector<8x128xf32>
    %181 = math.tanh %180 : vector<8x128xf32>
    %182 = arith.mulf %177, %181 : vector<8x128xf32>
    %183 = vector.extract_strided_slice %5 {offsets = [24, 0], sizes = [8, 512], strides = [1, 1]} : vector<40x512xf32> to vector<8x512xf32>
    %cst_39 = arith.constant dense<0.000000e+00> : vector<8x512xf32>
    %184 = tpu.matmul %154, %6, %cst_39 {dimension_numbers = #tpu.dot_dimension_numbers<[1], [0], [0], [1], [0, 0, 1, 1], [], []>} : vector<8x128xf32>, vector<128x512xf32>, vector<8x512xf32> -> vector<8x512xf32>
    %185 = arith.addf %183, %184 : vector<8x512xf32>
    %186 = vector.extract_strided_slice %185 {offsets = [0, 0], sizes = [8, 128], strides = [1, 1]} : vector<8x512xf32> to vector<8x128xf32>
    %187 = arith.negf %186 : vector<8x128xf32>
    %188 = math.exp %187 : vector<8x128xf32>
    %cst_40 = arith.constant 1.000000e+00 : f32
    %189 = vector.broadcast %cst_40 : f32 to vector<8x128xf32>
    %190 = arith.addf %189, %188 : vector<8x128xf32>
    %191 = arith.divf %189, %190 : vector<8x128xf32>
    %192 = vector.extract_strided_slice %185 {offsets = [0, 128], sizes = [8, 128], strides = [1, 1]} : vector<8x512xf32> to vector<8x128xf32>
    %193 = arith.negf %192 : vector<8x128xf32>
    %194 = math.exp %193 : vector<8x128xf32>
    %cst_41 = arith.constant 1.000000e+00 : f32
    %195 = vector.broadcast %cst_41 : f32 to vector<8x128xf32>
    %196 = arith.addf %195, %194 : vector<8x128xf32>
    %197 = arith.divf %195, %196 : vector<8x128xf32>
    %198 = vector.extract_strided_slice %185 {offsets = [0, 256], sizes = [8, 128], strides = [1, 1]} : vector<8x512xf32> to vector<8x128xf32>
    %199 = math.tanh %198 : vector<8x128xf32>
    %200 = vector.extract_strided_slice %185 {offsets = [0, 384], sizes = [8, 128], strides = [1, 1]} : vector<8x512xf32> to vector<8x128xf32>
    %201 = arith.negf %200 : vector<8x128xf32>
    %202 = math.exp %201 : vector<8x128xf32>
    %cst_42 = arith.constant 1.000000e+00 : f32
    %203 = vector.broadcast %cst_42 : f32 to vector<8x128xf32>
    %204 = arith.addf %203, %202 : vector<8x128xf32>
    %205 = arith.divf %203, %204 : vector<8x128xf32>
    %206 = arith.mulf %197, %152 : vector<8x128xf32>
    %207 = arith.mulf %191, %199 : vector<8x128xf32>
    %208 = arith.addf %206, %207 : vector<8x128xf32>
    %209 = math.tanh %208 : vector<8x128xf32>
    %210 = arith.mulf %205, %209 : vector<8x128xf32>
    %211 = tpu.concatenate %210, %182 in 1 : vector<8x128xf32>, vector<8x128xf32> -> vector<8x256xf32>
    %cst_43 = arith.constant dense<0.000000e+00> : vector<8x512xf32>
    %212 = tpu.matmul %211, %7, %cst_43 {dimension_numbers = #tpu.dot_dimension_numbers<[1], [0], [0], [1], [0, 0, 1, 1], [], []>} : vector<8x256xf32>, vector<256x512xf32>, vector<8x512xf32> -> vector<8x512xf32>
    %213 = arith.addf %212, %10 : vector<8x512xf32>
    %214 = vector.extract_strided_slice %213 {offsets = [0, 0], sizes = [8, 128], strides = [1, 1]} : vector<8x512xf32> to vector<8x128xf32>
    %215 = arith.negf %214 : vector<8x128xf32>
    %216 = math.exp %215 : vector<8x128xf32>
    %cst_44 = arith.constant 1.000000e+00 : f32
    %217 = vector.broadcast %cst_44 : f32 to vector<8x128xf32>
    %218 = arith.addf %217, %216 : vector<8x128xf32>
    %219 = arith.divf %217, %218 : vector<8x128xf32>
    %220 = vector.extract_strided_slice %213 {offsets = [0, 128], sizes = [8, 128], strides = [1, 1]} : vector<8x512xf32> to vector<8x128xf32>
    %221 = arith.negf %220 : vector<8x128xf32>
    %222 = math.exp %221 : vector<8x128xf32>
    %cst_45 = arith.constant 1.000000e+00 : f32
    %223 = vector.broadcast %cst_45 : f32 to vector<8x128xf32>
    %224 = arith.addf %223, %222 : vector<8x128xf32>
    %225 = arith.divf %223, %224 : vector<8x128xf32>
    %226 = vector.extract_strided_slice %213 {offsets = [0, 256], sizes = [8, 128], strides = [1, 1]} : vector<8x512xf32> to vector<8x128xf32>
    %227 = math.tanh %226 : vector<8x128xf32>
    %228 = vector.extract_strided_slice %213 {offsets = [0, 384], sizes = [8, 128], strides = [1, 1]} : vector<8x512xf32> to vector<8x128xf32>
    %229 = arith.negf %228 : vector<8x128xf32>
    %230 = math.exp %229 : vector<8x128xf32>
    %cst_46 = arith.constant 1.000000e+00 : f32
    %231 = vector.broadcast %cst_46 : f32 to vector<8x128xf32>
    %232 = arith.addf %231, %230 : vector<8x128xf32>
    %233 = arith.divf %231, %232 : vector<8x128xf32>
    %234 = arith.mulf %225, %180 : vector<8x128xf32>
    %235 = arith.mulf %219, %227 : vector<8x128xf32>
    %236 = arith.addf %234, %235 : vector<8x128xf32>
    %237 = math.tanh %236 : vector<8x128xf32>
    %238 = arith.mulf %233, %237 : vector<8x128xf32>
    %239 = vector.extract_strided_slice %5 {offsets = [32, 0], sizes = [8, 512], strides = [1, 1]} : vector<40x512xf32> to vector<8x512xf32>
    %cst_47 = arith.constant dense<0.000000e+00> : vector<8x512xf32>
    %240 = tpu.matmul %210, %6, %cst_47 {dimension_numbers = #tpu.dot_dimension_numbers<[1], [0], [0], [1], [0, 0, 1, 1], [], []>} : vector<8x128xf32>, vector<128x512xf32>, vector<8x512xf32> -> vector<8x512xf32>
    %241 = arith.addf %239, %240 : vector<8x512xf32>
    %242 = vector.extract_strided_slice %241 {offsets = [0, 0], sizes = [8, 128], strides = [1, 1]} : vector<8x512xf32> to vector<8x128xf32>
    %243 = arith.negf %242 : vector<8x128xf32>
    %244 = math.exp %243 : vector<8x128xf32>
    %cst_48 = arith.constant 1.000000e+00 : f32
    %245 = vector.broadcast %cst_48 : f32 to vector<8x128xf32>
    %246 = arith.addf %245, %244 : vector<8x128xf32>
    %247 = arith.divf %245, %246 : vector<8x128xf32>
    %248 = vector.extract_strided_slice %241 {offsets = [0, 128], sizes = [8, 128], strides = [1, 1]} : vector<8x512xf32> to vector<8x128xf32>
    %249 = arith.negf %248 : vector<8x128xf32>
    %250 = math.exp %249 : vector<8x128xf32>
    %cst_49 = arith.constant 1.000000e+00 : f32
    %251 = vector.broadcast %cst_49 : f32 to vector<8x128xf32>
    %252 = arith.addf %251, %250 : vector<8x128xf32>
    %253 = arith.divf %251, %252 : vector<8x128xf32>
    %254 = vector.extract_strided_slice %241 {offsets = [0, 256], sizes = [8, 128], strides = [1, 1]} : vector<8x512xf32> to vector<8x128xf32>
    %255 = math.tanh %254 : vector<8x128xf32>
    %256 = vector.extract_strided_slice %241 {offsets = [0, 384], sizes = [8, 128], strides = [1, 1]} : vector<8x512xf32> to vector<8x128xf32>
    %257 = arith.negf %256 : vector<8x128xf32>
    %258 = math.exp %257 : vector<8x128xf32>
    %cst_50 = arith.constant 1.000000e+00 : f32
    %259 = vector.broadcast %cst_50 : f32 to vector<8x128xf32>
    %260 = arith.addf %259, %258 : vector<8x128xf32>
    %261 = arith.divf %259, %260 : vector<8x128xf32>
    %262 = arith.mulf %253, %208 : vector<8x128xf32>
    %263 = arith.mulf %247, %255 : vector<8x128xf32>
    %264 = arith.addf %262, %263 : vector<8x128xf32>
    %265 = math.tanh %264 : vector<8x128xf32>
    %266 = arith.mulf %261, %265 : vector<8x128xf32>
    %267 = tpu.concatenate %266, %238 in 1 : vector<8x128xf32>, vector<8x128xf32> -> vector<8x256xf32>
    %cst_51 = arith.constant dense<0.000000e+00> : vector<8x512xf32>
    %268 = tpu.matmul %267, %7, %cst_51 {dimension_numbers = #tpu.dot_dimension_numbers<[1], [0], [0], [1], [0, 0, 1, 1], [], []>} : vector<8x256xf32>, vector<256x512xf32>, vector<8x512xf32> -> vector<8x512xf32>
    %269 = arith.addf %268, %10 : vector<8x512xf32>
    %270 = vector.extract_strided_slice %269 {offsets = [0, 0], sizes = [8, 128], strides = [1, 1]} : vector<8x512xf32> to vector<8x128xf32>
    %271 = arith.negf %270 : vector<8x128xf32>
    %272 = math.exp %271 : vector<8x128xf32>
    %cst_52 = arith.constant 1.000000e+00 : f32
    %273 = vector.broadcast %cst_52 : f32 to vector<8x128xf32>
    %274 = arith.addf %273, %272 : vector<8x128xf32>
    %275 = arith.divf %273, %274 : vector<8x128xf32>
    %276 = vector.extract_strided_slice %269 {offsets = [0, 128], sizes = [8, 128], strides = [1, 1]} : vector<8x512xf32> to vector<8x128xf32>
    %277 = arith.negf %276 : vector<8x128xf32>
    %278 = math.exp %277 : vector<8x128xf32>
    %cst_53 = arith.constant 1.000000e+00 : f32
    %279 = vector.broadcast %cst_53 : f32 to vector<8x128xf32>
    %280 = arith.addf %279, %278 : vector<8x128xf32>
    %281 = arith.divf %279, %280 : vector<8x128xf32>
    %282 = vector.extract_strided_slice %269 {offsets = [0, 256], sizes = [8, 128], strides = [1, 1]} : vector<8x512xf32> to vector<8x128xf32>
    %283 = math.tanh %282 : vector<8x128xf32>
    %284 = vector.extract_strided_slice %269 {offsets = [0, 384], sizes = [8, 128], strides = [1, 1]} : vector<8x512xf32> to vector<8x128xf32>
    %285 = arith.negf %284 : vector<8x128xf32>
    %286 = math.exp %285 : vector<8x128xf32>
    %cst_54 = arith.constant 1.000000e+00 : f32
    %287 = vector.broadcast %cst_54 : f32 to vector<8x128xf32>
    %288 = arith.addf %287, %286 : vector<8x128xf32>
    %289 = arith.divf %287, %288 : vector<8x128xf32>
    %290 = arith.mulf %281, %236 : vector<8x128xf32>
    %291 = arith.mulf %275, %283 : vector<8x128xf32>
    %292 = arith.addf %290, %291 : vector<8x128xf32>
    %293 = math.tanh %292 : vector<8x128xf32>
    %294 = arith.mulf %289, %293 : vector<8x128xf32>
    %c0_55 = arith.constant 0 : index
    %c0_56 = arith.constant 0 : index
    %295 = vector.load %arg6[%c0_55, %c0_56] : memref<8x128xf32, #tpu.memory_space<vmem>>, vector<8x128xf32>
    tpu.vector_store %arg6[%c0_55, %c0_56], %294 {strides = array<i32>} : memref<8x128xf32, #tpu.memory_space<vmem>>, vector<8x128xf32>,
    return
  }
}

</mosaic_0001>

<bundles_post_ra>
// kernel: tpu_custom_call.1
= control target key start
LH: loop header
LB: loop body
LE: loop exit
PB: predicated region body
PF: predicated region fallthrough
CT: control target
= control target key end

     0   :  { %11 = vsyncpa [#allocation3], 0  ;;  %s4718_s0 = inlined_call_operand.vmem [shape: f32[40,26], index: 0, kind: input, shape index: {}]   ;;  %s4719_s1 = inlined_call_operand.hbm [shape: f32[26,512], index: 1, kind: input, shape index: {}]   ;;  %s4720_s2 = inlined_call_operand.hbm [shape: f32[128,512], index: 2, kind: input, shape index: {}]   ;;  %s4721_s3 = inlined_call_operand.vmem [shape: f32[1,512], index: 3, kind: input, shape index: {}]   ;;  %s4722_s4 = inlined_call_operand.hbm [shape: f32[256,512], index: 4, kind: input, shape index: {}]   ;;  %s4723_s5 = inlined_call_operand.vmem [shape: f32[1,512], index: 5, kind: input, shape index: {}]   ;;  %s4724_s6 = inlined_call_operand.hbm [shape: f32[8,128], index: 6, kind: output, shape index: {}]  }
   0x1   :  { %12 = vsyncpa [#allocation6], 0 }
   0x2   :  { %13 = vsyncpa [#allocation4], 0  ;;  %s2919_s21 = smov [#allocation5]   ;;  %s2920_s23 = smov [#allocation2]  }
   0x3   :  { %s33_s22 = sshll.u32 %s2919_s21, 4  ;;  %s21_s24 = sshll.u32 %s2920_s23, 4  ;;  %s34_s22 = int_to_ptr.vmem [resolvable:$true] %s33_s22  ;;  %s22_s24 = int_to_ptr.vmem [resolvable:$true] %s21_s24 }
   0x4   :  { %s2841_s25 = scalar_lea.vmem %s34_s22, 8192  ;;  %p2846_p1 = scmp.lt.s32.totalorder %s34_s22, %s34_s22 }
   0x5   :  { %p2842_p0 = scmp.ne.s32.totalorder %s34_s22, %s2841_s25  ;;  %p2847_p2 = scmp.lt.s32.totalorder %s2841_s25, %s2841_s25 }
   0x7   :  { %p2848_p3 = por %p2847_p2, %p2846_p1 }
   0x9   :  { %p2849_p4 = pnand %p2848_p3, %p2842_p0 }
   0xb   :  { %2852 = shalt.err (!%p2849_p4)
}
   0xc   :  { %s2921_s26 = smov 512   ;;  %s2922_s27 = smov 32  }
   0xd   :  { %39 = dma.hbm_to_vmem [thread:$0]  %s4720_s2, 8192, %s34_s22, [#allocation6], %s2921_s26, %s2921_s26, %s2922_s27  }
   0xe   :  { %s2861_s30 = scalar_lea.vmem %s22_s24, 2048  ;;  %p2866_p6 = scmp.lt.s32.totalorder %s22_s24, %s22_s24 }
   0xf   :  { %p2862_p5 = scmp.ne.s32.totalorder %s22_s24, %s2861_s30  ;;  %p2867_p7 = scmp.lt.s32.totalorder %s2861_s30, %s2861_s30 }
  0x11   :  { %p2868_p8 = por %p2867_p7, %p2866_p6 }
  0x13   :  { %p2869_p9 = pnand %p2868_p8, %p2862_p5 }
  0x15   :  { %2872 = shalt.err (!%p2869_p9)
}
  0x16   :  { %27 = dma.hbm_to_vmem [thread:$0]  %s4719_s1, 2048, %s22_s24, [#allocation3], %s2921_s26, %s2921_s26, %s2922_s27  }
  0x17   :  { %s2923_s9 = smov [#allocation7]  }
  0x18   :  { %s47_s10 = sshll.u32 %s2923_s9, 4  ;;  %s48_s10 = int_to_ptr.vmem [resolvable:$true] %s47_s10 }
  0x19   :  { %s2881_s11 = scalar_lea.vmem %s48_s10, 16384  ;;  %p2886_p11 = scmp.lt.s32.totalorder %s48_s10, %s48_s10 }
  0x1a   :  { %p2882_p10 = scmp.ne.s32.totalorder %s48_s10, %s2881_s11  ;;  %p2887_p12 = scmp.lt.s32.totalorder %s2881_s11, %s2881_s11 }
  0x1c   :  { %p2888_p13 = por %p2887_p12, %p2886_p11 }
  0x1e   :  { %p2889_p0 = pnand %p2888_p13, %p2882_p10 }
  0x20   :  { %2892 = shalt.err (!%p2889_p0)
}
  0x21   :  { %53 = dma.hbm_to_vmem [thread:$0]  %s4722_s4, 16384, %s48_s10, [#allocation6], %s2921_s26, %s2921_s26, %s2922_s27  }
  0x22   :  { %2913 = dma.done.wait [#allocation3], 2048  }
  0x23   :  { %2914 = vsyncadd [#allocation3], 4294965248 }
  0x24   :  { %2915 = dma.done.wait [#allocation6], 24576  }
  0x25   :  { %2916 = vsyncadd [#allocation6], 4294942720  ;;  %v4726_v0 = vmov 0.0   ;;  %vm124_vm0 = vcmask 1041408   ;;  %v83_v1 = vld [vmem:[#allocation2 + $0x68] sm:$0x3] }
  0x26   :  { %201 = vmatprep.mubr.f32.mxu0 %v4726_v0  ;;  %296 = vmatprep.mubr.f32.mxu1 %v4726_v0  ;;  %v85_v2 = vld [vmem:[#allocation2 + $0x78] sm:$0x3]  ;;  %v82_v3 = vld [vmem:[#allocation2 + $0x60] sm:$0x3]  ;;  %v84_v4 = vld [vmem:[#allocation2 + $0x70] sm:$0x3] }
  0x27   :  { %2238 = vmatprep.subr.msk.mxu0 %vm124_vm0, %v83_v1  ;;  %2245 = vmatprep.subr.msk.mxu1 %vm124_vm0, %v85_v2  ;;  %v79_v5 = vld [vmem:[#allocation2 + $0x48] sm:$0xff]  ;;  %v81_v6 = vld [vmem:[#allocation2 + $0x58] sm:$0xff]  ;;  %v78_v7 = vld [vmem:[#allocation2 + $0x40] sm:$0xff]  ;;  %vm108_vm1 = vcmask 211968  }
  0x28   :  { %2239 = vmatpush1.msk.msra.mxu0 %vm124_vm0, %v82_v3  ;;  %2246 = vmatpush1.msk.msra.mxu1 %vm124_vm0, %v84_v4  ;;  %v80_v8 = vld [vmem:[#allocation2 + $0x50] sm:$0xff]  ;;  %v75_v9 = vld [vmem:[#allocation2 + $0x28] sm:$0xff]  ;;  %v77_v10 = vld [vmem:[#allocation2 + $0x38] sm:$0xff] }
  0x29   :  { %163 = vmatprep.subr.mxu0 %v79_v5  ;;  %258 = vmatprep.subr.mxu1 %v81_v6  ;;  %v74_v11 = vld [vmem:[#allocation2 + $0x20] sm:$0xff]  ;;  %v76_v12 = vld [vmem:[#allocation2 + $0x30] sm:$0xff]  ;;  %v71_v13 = vld [vmem:[#allocation2 + $0x8] sm:$0xff] }
  0x2a   :  { %164 = vmatpush1.msra.mxu0 %v78_v7  ;;  %259 = vmatpush1.msra.mxu1 %v80_v8  ;;  %v73_v14 = vld [vmem:[#allocation2 + $0x18] sm:$0xff]  ;;  %v70_v15 = vld [vmem:[#allocation2] sm:$0xff]  ;;  %v72_v16 = vld [vmem:[#allocation2 + $0x10] sm:$0xff] }
  0x2b   :  { %165 = vmatprep.subr.mxu0 %v75_v9  ;;  %260 = vmatprep.subr.mxu1 %v77_v10  ;;  %v65_v17 = vld [vmem:[%s4718_s0] sm:$0xff]  ;;  %v2975_v18 = vld [vmem:[#allocation5 + $0x1e8] sm:$0xff]  ;;  %v2977_v19 = vld [vmem:[#allocation5 + $0x1f8] sm:$0xff] }
  0x2c   :  { %166 = vmatpush1.msra.mxu0 %v74_v11  ;;  %261 = vmatpush1.msra.mxu1 %v76_v12  ;;  %v2979_v20 = vld [vmem:[#allocation5 + $0x1e0] sm:$0xff]  ;;  %v2981_v21 = vld [vmem:[#allocation5 + $0x1f0] sm:$0xff]  ;;  %v2985_v22 = vld [vmem:[#allocation5 + $0x1c8] sm:$0xff] }
  0x2d   :  { %167 = vmatprep.subr.mxu0 %v71_v13  ;;  %262 = vmatprep.subr.mxu1 %v73_v14  ;;  %v2987_v23 = vld [vmem:[#allocation5 + $0x1d8] sm:$0xff]  ;;  %v2991_v24 = vld [vmem:[#allocation5 + $0x1c0] sm:$0xff]  ;;  %v2993_v25 = vld [vmem:[#allocation5 + $0x1d0] sm:$0xff] }
  0x2e   :  { %168 = vmatpush1.msra.mxu0 %v70_v15  ;;  %263 = vmatpush1.msra.mxu1 %v72_v16  ;;  %v2997_v26 = vld [vmem:[#allocation5 + $0x1a8] sm:$0xff]  ;;  %v2999_v27 = vld [vmem:[#allocation5 + $0x1b8] sm:$0xff]  ;;  %v3003_v28 = vld [vmem:[#allocation5 + $0x1a0] sm:$0xff] }
  0x2f   :  { %2240 = vmatmul.mubr.msk.f32.vlgmr.msra.gmra.mxu0 %vm108_vm1, %v65_v17  ;;  %541 = vmatprep.subr.mxu0 %v2975_v18  ;;  %v3005_v29 = vld [vmem:[#allocation5 + $0x1b0] sm:$0xff]  ;;  %v3009_v30 = vld [vmem:[#allocation5 + $0x188] sm:$0xff]  ;;  %v3011_v31 = vld [vmem:[#allocation5 + $0x198] sm:$0xff] }
  0x30   :  { %612 = vmatprep.subr.mxu1 %v2977_v19  ;;  %2247 = vmatmul.mubr.msk.f32.vlgmr.msra.gmra.mxu1 %vm108_vm1, %v65_v17  ;;  %v3015_v32 = vld [vmem:[#allocation5 + $0x180] sm:$0xff]  ;;  %v3017_v33 = vld [vmem:[#allocation5 + $0x190] sm:$0xff]  ;;  %v3021_v34 = vld [vmem:[#allocation5 + $0x168] sm:$0xff] }
  0x31   :  { %542 = vmatpush1.msra.mxu0 %v2979_v20  ;;  %613 = vmatpush1.msra.mxu1 %v2981_v21  ;;  %v3023_v35 = vld [vmem:[#allocation5 + $0x178] sm:$0xff]  ;;  %v3027_v36 = vld [vmem:[#allocation5 + $0x160] sm:$0xff]  ;;  %v3029_v37 = vld [vmem:[#allocation5 + $0x170] sm:$0xff] }
  0x32   :  { %543 = vmatprep.subr.mxu0 %v2985_v22  ;;  %614 = vmatprep.subr.mxu1 %v2987_v23  ;;  %v3033_v38 = vld [vmem:[#allocation5 + $0x148] sm:$0xff]  ;;  %v3035_v39 = vld [vmem:[#allocation5 + $0x158] sm:$0xff]  ;;  %v3039_v40 = vld [vmem:[#allocation5 + $0x140] sm:$0xff] }
  0x33   :  { %544 = vmatpush1.msra.mxu0 %v2991_v24  ;;  %615 = vmatpush1.msra.mxu1 %v2993_v25  ;;  %v3041_v41 = vld [vmem:[#allocation5 + $0x150] sm:$0xff]  ;;  %v3045_v42 = vld [vmem:[#allocation5 + $0x128] sm:$0xff]  ;;  %v3047_v43 = vld [vmem:[#allocation5 + $0x138] sm:$0xff] }
  0x34   :  { %545 = vmatprep.subr.mxu0 %v2997_v26  ;;  %616 = vmatprep.subr.mxu1 %v2999_v27  ;;  %v3051_v44 = vld [vmem:[#allocation5 + $0x120] sm:$0xff]  ;;  %v3055_v45 = vld [vmem:[#allocation5 + $0x130] sm:$0xff]  ;;  %v66_v46 = vld [vmem:[%s4718_s0 + $0x8] sm:$0xff] }
  0x35   :  { %546 = vmatpush1.msra.mxu0 %v3003_v28  ;;  %617 = vmatpush1.msra.mxu1 %v3005_v29  ;;  %v3062_v47 = vld [vmem:[#allocation5 + $0x108] sm:$0xff]  ;;  %v3064_v48 = vld [vmem:[#allocation5 + $0x118] sm:$0xff]  ;;  %v3068_v49 = vld [vmem:[#allocation5 + $0x100] sm:$0xff] }
  0x36   :  { %547 = vmatprep.subr.mxu0 %v3009_v30  ;;  %618 = vmatprep.subr.mxu1 %v3011_v31  ;;  %v3072_v50 = vld [vmem:[#allocation5 + $0x110] sm:$0xff]  ;;  %v3074_v51 = vld [vmem:[#allocation5 + $0xe8] sm:$0xff]  ;;  %v3078_v52 = vld [vmem:[#allocation5 + $0xf8] sm:$0xff] }
  0x37   :  { %548 = vmatpush1.msra.mxu0 %v3015_v32  ;;  %619 = vmatpush1.msra.mxu1 %v3017_v33  ;;  %v3082_v53 = vld [vmem:[#allocation5 + $0xe0] sm:$0xff]  ;;  %v3086_v54 = vld [vmem:[#allocation5 + $0xf0] sm:$0xff]  ;;  %v3093_v56 = vld [vmem:[#allocation5 + $0xc8] sm:$0xff] }
  0x38   :  { %549 = vmatprep.subr.mxu0 %v3021_v34  ;;  %620 = vmatprep.subr.mxu1 %v3023_v35  ;;  %v67_v55 = vld [vmem:[%s4718_s0 + $0x10] sm:$0xff]  ;;  %v3095_v57 = vld [vmem:[#allocation5 + $0xd8] sm:$0xff]  ;;  %v3099_v58 = vld [vmem:[#allocation5 + $0xc0] sm:$0xff] }
  0x39   :  { %550 = vmatpush1.msra.mxu0 %v3027_v36  ;;  %621 = vmatpush1.msra.mxu1 %v3029_v37  ;;  %v3103_v59 = vld [vmem:[#allocation5 + $0xd0] sm:$0xff]  ;;  %v3105_v60 = vld [vmem:[#allocation5 + $0xa8] sm:$0xff]  ;;  %v3109_v61 = vld [vmem:[#allocation5 + $0xb8] sm:$0xff] }
  0x3a   :  { %551 = vmatprep.subr.mxu0 %v3033_v38  ;;  %622 = vmatprep.subr.mxu1 %v3035_v39  ;;  %5043 = vst [vmem:[#allocation12_spill] sm:$0xff] %v3105_v60  ;;  %5044 = vst [vmem:[#allocation13_spill] sm:$0xff] %v3109_v61  ;;  %v3113_v62 = vld [vmem:[#allocation5 + $0xa0] sm:$0xff]  ;;  %v3117_v63 = vld [vmem:[#allocation5 + $0xb0] sm:$0xff] }
  0x3b   :  { %552 = vmatpush1.msra.mxu0 %v3039_v40  ;;  %623 = vmatpush1.msra.mxu1 %v3041_v41  ;;  %5045 = vst [vmem:[#allocation14_spill] sm:$0xff] %v3113_v62  ;;  %5046 = vst [vmem:[#allocation15_spill] sm:$0xff] %v3117_v63  ;;  %v68_v1 = vld [vmem:[%s4718_s0 + $0x18] sm:$0xff]  ;;  %v3124_v2 = vld [vmem:[#allocation5 + $0x88] sm:$0xff] }
  0x3c   :  { %553 = vmatprep.subr.mxu0 %v3045_v42  ;;  %624 = vmatprep.subr.mxu1 %v3047_v43  ;;  %5047 = vst [vmem:[#allocation16_spill] sm:$0xff] %v3124_v2  ;;  %v3126_v3 = vld [vmem:[#allocation5 + $0x98] sm:$0xff]  ;;  %v3130_v4 = vld [vmem:[#allocation5 + $0x80] sm:$0xff]  ;;  %v3134_v5 = vld [vmem:[#allocation5 + $0x90] sm:$0xff] }
  0x3d   :  { %207 = vmatprep.mubr.f32.mxu0 %v4726_v0  ;;  %554 = vmatpush1.msra.mxu0 %v3051_v44  ;;  %5048 = vst [vmem:[#allocation17_spill] sm:$0xff] %v3126_v3  ;;  %5049 = vst [vmem:[#allocation18_spill] sm:$0xff] %v3130_v4  ;;  %v3136_v6 = vld [vmem:[#allocation5 + $0x68] sm:$0xff]  ;;  %v3140_v7 = vld [vmem:[#allocation5 + $0x78] sm:$0xff] }
  0x3e   :  { %625 = vmatpush1.msra.mxu1 %v3055_v45  ;;  %2241 = vmatmul.mubr.msk.f32.gmra.mxu0 %vm108_vm1, %v66_v46  ;;  %5050 = vst [vmem:[#allocation19_spill] sm:$0xff] %v3134_v5  ;;  %5051 = vst [vmem:[#allocation20_spill] sm:$0xff] %v3136_v6  ;;  %v3144_v8 = vld [vmem:[#allocation5 + $0x60] sm:$0xff]  ;;  %v3148_v9 = vld [vmem:[#allocation5 + $0x70] sm:$0xff] }
  0x3f   :  { %555 = vmatprep.subr.mxu0 %v3062_v47  ;;  %626 = vmatprep.subr.mxu1 %v3064_v48  ;;  %5052 = vst [vmem:[#allocation21_spill] sm:$0xff] %v3140_v7  ;;  %5053 = vst [vmem:[#allocation22_spill] sm:$0xff] %v3144_v8  ;;  %v69_v10 = vld [vmem:[%s4718_s0 + $0x20] sm:$0xff]  ;;  %v3155_v11 = vld [vmem:[#allocation5 + $0x48] sm:$0xff] }
  0x40   :  { %302 = vmatprep.mubr.f32.mxu1 %v4726_v0  ;;  %556 = vmatpush1.msra.mxu0 %v3068_v49  ;;  %5054 = vst [vmem:[#allocation23_spill] sm:$0xff] %v3148_v9  ;;  %5055 = vst [vmem:[#allocation24_spill] sm:$0xff] %v3155_v11  ;;  %v3157_v12 = vld [vmem:[#allocation5 + $0x58] sm:$0xff]  ;;  %v3161_v13 = vld [vmem:[#allocation5 + $0x40] sm:$0xff] }
  0x41   :  { %627 = vmatpush1.msra.mxu1 %v3072_v50  ;;  %557 = vmatprep.subr.mxu0 %v3074_v51  ;;  %5056 = vst [vmem:[#allocation25_spill] sm:$0xff] %v3157_v12  ;;  %5057 = vst [vmem:[#allocation26_spill] sm:$0xff] %v3161_v13  ;;  %v3165_v14 = vld [vmem:[#allocation5 + $0x50] sm:$0xff]  ;;  %v3167_v15 = vld [vmem:[#allocation5 + $0x28] sm:$0xff] }
  0x42   :  { %2248 = vmatmul.mubr.msk.f32.gmra.mxu1 %vm108_vm1, %v66_v46  ;;  %628 = vmatprep.subr.mxu1 %v3078_v52  ;;  %5058 = vst [vmem:[#allocation27_spill] sm:$0xff] %v3165_v14  ;;  %5059 = vst [vmem:[#allocation28_spill] sm:$0xff] %v3167_v15  ;;  %v3171_v16 = vld [vmem:[#allocation5 + $0x38] sm:$0xff]  ;;  %v3175_v17 = vld [vmem:[#allocation5 + $0x20] sm:$0xff] }
  0x43   :  { %213 = vmatprep.mubr.f32.mxu0 %v4726_v0  ;;  %558 = vmatpush1.msra.mxu0 %v3082_v53  ;;  %5060 = vst [vmem:[#allocation29_spill] sm:$0xff] %v3171_v16  ;;  %5061 = vst [vmem:[#allocation30_spill] sm:$0xff] %v3175_v17  ;;  %v3177_v46 = vld [vmem:[#allocation5 + $0x30] sm:$0xff] }
  0x44   :  { %629 = vmatpush1.msra.mxu1 %v3086_v54  ;;  %2242 = vmatmul.mubr.msk.f32.gmra.mxu0 %vm108_vm1, %v67_v55  ;;  %5062 = vst [vmem:[#allocation31_spill] sm:$0xff] %v3177_v46 }
  0x45   :  { %559 = vmatprep.subr.mxu0 %v3093_v56  ;;  %630 = vmatprep.subr.mxu1 %v3095_v57 }
  0x46   :  { %308 = vmatprep.mubr.f32.mxu1 %v4726_v0  ;;  %560 = vmatpush1.msra.mxu0 %v3099_v58 }
  0x47   :  { %631 = vmatpush1.msra.mxu1 %v3103_v59  ;;  %561 = vmatprep.subr.mxu0 %v3105_v60 }
  0x48   :  { %2249 = vmatmul.mubr.msk.f32.gmra.mxu1 %vm108_vm1, %v67_v55  ;;  %632 = vmatprep.subr.mxu1 %v3109_v61  ;;  %v3181_v55 = vld [vmem:[#allocation5 + $0x8] sm:$0xff] }
  0x49   :  { %219 = vmatprep.mubr.f32.mxu0 %v4726_v0  ;;  %562 = vmatpush1.msra.mxu0 %v3113_v62  ;;  %5063 = vst [vmem:[#allocation32_spill] sm:$0xff] %v3181_v55 }
  0x4a   :  { %633 = vmatpush1.msra.mxu1 %v3117_v63  ;;  %2243 = vmatmul.mubr.msk.f32.gmra.mxu0 %vm108_vm1, %v68_v1 }
  0x4b   :  { %563 = vmatprep.subr.mxu0 %v3124_v2  ;;  %634 = vmatprep.subr.mxu1 %v3126_v3 }
  0x4c   :  { %314 = vmatprep.mubr.f32.mxu1 %v4726_v0  ;;  %564 = vmatpush1.msra.mxu0 %v3130_v4 }
  0x4d   :  { %635 = vmatpush1.msra.mxu1 %v3134_v5  ;;  %565 = vmatprep.subr.mxu0 %v3136_v6 }
  0x4e   :  { %2250 = vmatmul.mubr.msk.f32.gmra.mxu1 %vm108_vm1, %v68_v1  ;;  %636 = vmatprep.subr.mxu1 %v3140_v7  ;;  %v3183_v1 = vld [vmem:[#allocation5 + $0x18] sm:$0xff] }
  0x4f   :  { %225 = vmatprep.mubr.f32.mxu0 %v4726_v0  ;;  %566 = vmatpush1.msra.mxu0 %v3144_v8  ;;  %5064 = vst [vmem:[#allocation33_spill] sm:$0xff] %v3183_v1 }
  0x50   :  { %637 = vmatpush1.msra.mxu1 %v3148_v9  ;;  %2244 = vmatmul.mubr.msk.f32.gmra.mxu0 %vm108_vm1, %v69_v10 }
  0x51   :  { %567 = vmatprep.subr.mxu0 %v3155_v11  ;;  %638 = vmatprep.subr.mxu1 %v3157_v12  ;;  %v3187_v12 = vld [vmem:[#allocation5] sm:$0xff] }
  0x52   :  { %320 = vmatprep.mubr.f32.mxu1 %v4726_v0  ;;  %568 = vmatpush1.msra.mxu0 %v3161_v13  ;;  %5065 = vst [vmem:[#allocation34_spill] sm:$0xff] %v3187_v12  ;;  %v3191_v0 = vld [vmem:[#allocation5 + $0x10] sm:$0xff]  ;;  %v3541_v13 = vld [vmem:[#allocation7 + $0x260] sm:$0xff] }
  0x53   :  { %639 = vmatpush1.msra.mxu1 %v3165_v14  ;;  %569 = vmatprep.subr.mxu0 %v3167_v15  ;;  %5066 = vst [vmem:[#allocation35_spill] sm:$0xff] %v3191_v0  ;;  %v5067_v15 = vmov 0.0   ;;  %v3525_v14 = vld [vmem:[#allocation7 + $0x298] sm:$0xff]  ;;  %5182 = vst [vmem:[#allocation150_spill] sm:$0xff] %v3541_v13 }
  0x54   :  { %2251 = vmatmul.mubr.msk.f32.gmra.mxu1 %vm108_vm1, %v69_v10  ;;  %640 = vmatprep.subr.mxu1 %v3171_v16  ;;  %v3203_v10 = vld [vmem:[#allocation7 + $0x1e8] sm:$0xff]  ;;  %v3517_v16 = vld [vmem:[#allocation7 + $0x2a0] sm:$0xff]  ;;  %5177 = vst [vmem:[#allocation145_spill] sm:$0xff] %v3525_v14 }
  0x55   :  { %570 = vmatpush1.msra.mxu0 %v3175_v17  ;;  %641 = vmatpush1.msra.mxu1 %v3177_v46  ;;  %5068 = vst [vmem:[#allocation36_spill] sm:$0xff] %v3203_v10  ;;  %v3217_v46 = vld [vmem:[#allocation7 + $0x1d8] sm:$0xff]  ;;  %v3223_v17 = vld [vmem:[#allocation7 + $0x1d0] sm:$0xff]  ;;  %5174 = vst [vmem:[#allocation142_spill] sm:$0xff] %v3517_v16 }
  0x56   :  { %571 = vmatprep.subr.mxu0 %v3181_v55  ;;  %642 = vmatprep.subr.mxu1 %v3183_v1  ;;  %v3205_v55 = vld [vmem:[#allocation7 + $0x1f8] sm:$0xff]  ;;  %v3207_v1 = vld [vmem:[#allocation7 + $0x1e0] sm:$0xff]  ;;  %5073 = vst [vmem:[#allocation41_spill] sm:$0xff] %v3217_v46  ;;  %5075 = vst [vmem:[#allocation43_spill] sm:$0xff] %v3223_v17 }
  0x57   :  { %572 = vmatpush1.msra.mxu0 %v3187_v12  ;;  %605 = vmatprep.mubr.f32.mxu0 %v5067_v15  ;;  %5069 = vst [vmem:[#allocation37_spill] sm:$0xff] %v3205_v55  ;;  %5070 = vst [vmem:[#allocation38_spill] sm:$0xff] %v3207_v1  ;;  %v3215_v12 = vld [vmem:[#allocation7 + $0x1c8] sm:$0xff] }
  0x58   :  { %643 = vmatpush1.msra.mxu1 %v3191_v0  ;;  %676 = vmatprep.mubr.f32.mxu1 %v5067_v15  ;;  %v3211_v0 = vld [vmem:[#allocation7 + $0x1f0] sm:$0xff]  ;;  %5072 = vst [vmem:[#allocation40_spill] sm:$0xff] %v3215_v12 }
  0x59   :  { %606 = vmatmul.mubr.f32.vlgmr.msra.gmra.mxu0 %v5067_v15  ;;  %677 = vmatmul.mubr.f32.vlgmr.msra.gmra.mxu1 %v5067_v15  ;;  %5071 = vst [vmem:[#allocation39_spill] sm:$0xff] %v3211_v0 }
  0x5a   :  { %775 = vmatprep.mubr.f32.mxu0 %v5067_v15  ;;  %846 = vmatprep.mubr.f32.mxu1 %v5067_v15  ;;  %v3219_v15 = vld [vmem:[#allocation7 + $0x1c0] sm:$0xff] }
  0x5b   :  { %711 = vmatprep.subr.mxu0 %v3203_v10  ;;  %782 = vmatprep.subr.mxu1 %v3205_v55  ;;  %5074 = vst [vmem:[#allocation42_spill] sm:$0xff] %v3219_v15  ;;  %v3227_v55 = vld [vmem:[#allocation7 + $0x1a8] sm:$0xff]  ;;  %v3235_v10 = vld [vmem:[#allocation7 + $0x1b0] sm:$0xff] }
  0x5c   :  { %712 = vmatpush1.msra.mxu0 %v3207_v1  ;;  %783 = vmatpush1.msra.mxu1 %v3211_v0  ;;  %5076 = vst [vmem:[#allocation44_spill] sm:$0xff] %v3227_v55  ;;  %v3229_v1 = vld [vmem:[#allocation7 + $0x1b8] sm:$0xff]  ;;  %v3233_v0 = vld [vmem:[#allocation7 + $0x1a0] sm:$0xff]  ;;  %5079 = vst [vmem:[#allocation47_spill] sm:$0xff] %v3235_v10 }
  0x5d   :  { %713 = vmatprep.subr.mxu0 %v3215_v12  ;;  %784 = vmatprep.subr.mxu1 %v3217_v46  ;;  %5077 = vst [vmem:[#allocation45_spill] sm:$0xff] %v3229_v1  ;;  %5078 = vst [vmem:[#allocation46_spill] sm:$0xff] %v3233_v0  ;;  %v3239_v46 = vld [vmem:[#allocation7 + $0x188] sm:$0xff]  ;;  %v3509_v12 = vld [vmem:[#allocation7 + $0x2d0] sm:$0xff] }
  0x5e   :  { %714 = vmatpush1.msra.mxu0 %v3219_v15  ;;  %785 = vmatpush1.msra.mxu1 %v3223_v17  ;;  %5080 = vst [vmem:[#allocation48_spill] sm:$0xff] %v3239_v46  ;;  %v3241_v15 = vld [vmem:[#allocation7 + $0x198] sm:$0xff]  ;;  %v3245_v17 = vld [vmem:[#allocation7 + $0x180] sm:$0xff]  ;;  %5171 = vst [vmem:[#allocation139_spill] sm:$0xff] %v3509_v12 }
  0x5f   :  { %715 = vmatprep.subr.mxu0 %v3227_v55  ;;  %786 = vmatprep.subr.mxu1 %v3229_v1  ;;  %5081 = vst [vmem:[#allocation49_spill] sm:$0xff] %v3241_v15  ;;  %5082 = vst [vmem:[#allocation50_spill] sm:$0xff] %v3245_v17  ;;  %v3247_v55 = vld [vmem:[#allocation7 + $0x190] sm:$0xff]  ;;  %v3251_v1 = vld [vmem:[#allocation7 + $0x168] sm:$0xff] }
  0x60   :  { %716 = vmatpush1.msra.mxu0 %v3233_v0  ;;  %787 = vmatpush1.msra.mxu1 %v3235_v10  ;;  %5083 = vst [vmem:[#allocation51_spill] sm:$0xff] %v3247_v55  ;;  %5084 = vst [vmem:[#allocation52_spill] sm:$0xff] %v3251_v1  ;;  %v3253_v0 = vld [vmem:[#allocation7 + $0x178] sm:$0xff]  ;;  %v3257_v10 = vld [vmem:[#allocation7 + $0x160] sm:$0xff] }
  0x61   :  { %717 = vmatprep.subr.mxu0 %v3239_v46  ;;  %788 = vmatprep.subr.mxu1 %v3241_v15  ;;  %5085 = vst [vmem:[#allocation53_spill] sm:$0xff] %v3253_v0  ;;  %5086 = vst [vmem:[#allocation54_spill] sm:$0xff] %v3257_v10  ;;  %v3259_v46 = vld [vmem:[#allocation7 + $0x170] sm:$0xff]  ;;  %v3263_v15 = vld [vmem:[#allocation7 + $0x148] sm:$0xff] }
  0x62   :  { %718 = vmatpush1.msra.mxu0 %v3245_v17  ;;  %789 = vmatpush1.msra.mxu1 %v3247_v55  ;;  %5087 = vst [vmem:[#allocation55_spill] sm:$0xff] %v3259_v46  ;;  %5088 = vst [vmem:[#allocation56_spill] sm:$0xff] %v3263_v15  ;;  %v3265_v17 = vld [vmem:[#allocation7 + $0x158] sm:$0xff]  ;;  %v3269_v55 = vld [vmem:[#allocation7 + $0x140] sm:$0xff] }
  0x63   :  { %719 = vmatprep.subr.mxu0 %v3251_v1  ;;  %790 = vmatprep.subr.mxu1 %v3253_v0  ;;  %5089 = vst [vmem:[#allocation57_spill] sm:$0xff] %v3265_v17  ;;  %5090 = vst [vmem:[#allocation58_spill] sm:$0xff] %v3269_v55  ;;  %v3271_v1 = vld [vmem:[#allocation7 + $0x150] sm:$0xff]  ;;  %v3275_v0 = vld [vmem:[#allocation7 + $0x128] sm:$0xff] }
  0x64   :  { %720 = vmatpush1.msra.mxu0 %v3257_v10  ;;  %791 = vmatpush1.msra.mxu1 %v3259_v46  ;;  %5091 = vst [vmem:[#allocation59_spill] sm:$0xff] %v3271_v1  ;;  %5092 = vst [vmem:[#allocation60_spill] sm:$0xff] %v3275_v0  ;;  %v3277_v10 = vld [vmem:[#allocation7 + $0x138] sm:$0xff]  ;;  %v3281_v46 = vld [vmem:[#allocation7 + $0x120] sm:$0xff] }
  0x65   :  { %721 = vmatprep.subr.mxu0 %v3263_v15  ;;  %792 = vmatprep.subr.mxu1 %v3265_v17  ;;  %5093 = vst [vmem:[#allocation61_spill] sm:$0xff] %v3277_v10  ;;  %5094 = vst [vmem:[#allocation62_spill] sm:$0xff] %v3281_v46  ;;  %v3283_v15 = vld [vmem:[#allocation7 + $0x130] sm:$0xff]  ;;  %v3287_v17 = vld [vmem:[#allocation7 + $0x108] sm:$0xff] }
  0x66   :  { %722 = vmatpush1.msra.mxu0 %v3269_v55  ;;  %793 = vmatpush1.msra.mxu1 %v3271_v1  ;;  %5095 = vst [vmem:[#allocation63_spill] sm:$0xff] %v3283_v15  ;;  %5096 = vst [vmem:[#allocation64_spill] sm:$0xff] %v3287_v17  ;;  %v3289_v55 = vld [vmem:[#allocation7 + $0x118] sm:$0xff]  ;;  %v3293_v1 = vld [vmem:[#allocation7 + $0x100] sm:$0xff] }
  0x67   :  { %723 = vmatprep.subr.mxu0 %v3275_v0  ;;  %794 = vmatprep.subr.mxu1 %v3277_v10  ;;  %5097 = vst [vmem:[#allocation65_spill] sm:$0xff] %v3289_v55  ;;  %5098 = vst [vmem:[#allocation66_spill] sm:$0xff] %v3293_v1  ;;  %v3295_v0 = vld [vmem:[#allocation7 + $0x110] sm:$0xff]  ;;  %v3299_v10 = vld [vmem:[#allocation7 + $0xe8] sm:$0xff] }
  0x68   :  { %724 = vmatpush1.msra.mxu0 %v3281_v46  ;;  %795 = vmatpush1.msra.mxu1 %v3283_v15  ;;  %5099 = vst [vmem:[#allocation67_spill] sm:$0xff] %v3295_v0  ;;  %5100 = vst [vmem:[#allocation68_spill] sm:$0xff] %v3299_v10  ;;  %v3301_v46 = vld [vmem:[#allocation7 + $0xf8] sm:$0xff]  ;;  %v3305_v15 = vld [vmem:[#allocation7 + $0xe0] sm:$0xff] }
  0x69   :  { %725 = vmatprep.subr.mxu0 %v3287_v17  ;;  %796 = vmatprep.subr.mxu1 %v3289_v55  ;;  %5101 = vst [vmem:[#allocation69_spill] sm:$0xff] %v3301_v46  ;;  %5102 = vst [vmem:[#allocation70_spill] sm:$0xff] %v3305_v15  ;;  %v3307_v17 = vld [vmem:[#allocation7 + $0xf0] sm:$0xff]  ;;  %v3311_v55 = vld [vmem:[#allocation7 + $0xc8] sm:$0xff] }
  0x6a   :  { %726 = vmatpush1.msra.mxu0 %v3293_v1  ;;  %797 = vmatpush1.msra.mxu1 %v3295_v0  ;;  %5103 = vst [vmem:[#allocation71_spill] sm:$0xff] %v3307_v17  ;;  %5104 = vst [vmem:[#allocation72_spill] sm:$0xff] %v3311_v55  ;;  %v3313_v1 = vld [vmem:[#allocation7 + $0xd8] sm:$0xff]  ;;  %v3317_v0 = vld [vmem:[#allocation7 + $0xc0] sm:$0xff] }
  0x6b   :  { %727 = vmatprep.subr.mxu0 %v3299_v10  ;;  %798 = vmatprep.subr.mxu1 %v3301_v46  ;;  %5105 = vst [vmem:[#allocation73_spill] sm:$0xff] %v3313_v1  ;;  %5106 = vst [vmem:[#allocation74_spill] sm:$0xff] %v3317_v0  ;;  %v3319_v10 = vld [vmem:[#allocation7 + $0xd0] sm:$0xff]  ;;  %v3323_v46 = vld [vmem:[#allocation7 + $0xa8] sm:$0xff] }
  0x6c   :  { %728 = vmatpush1.msra.mxu0 %v3305_v15  ;;  %799 = vmatpush1.msra.mxu1 %v3307_v17  ;;  %5107 = vst [vmem:[#allocation75_spill] sm:$0xff] %v3319_v10  ;;  %5108 = vst [vmem:[#allocation76_spill] sm:$0xff] %v3323_v46  ;;  %v3325_v15 = vld [vmem:[#allocation7 + $0xb8] sm:$0xff]  ;;  %v3329_v17 = vld [vmem:[#allocation7 + $0xa0] sm:$0xff] }
  0x6d   :  { %729 = vmatprep.subr.mxu0 %v3311_v55  ;;  %800 = vmatprep.subr.mxu1 %v3313_v1  ;;  %5109 = vst [vmem:[#allocation77_spill] sm:$0xff] %v3325_v15  ;;  %5110 = vst [vmem:[#allocation78_spill] sm:$0xff] %v3329_v17  ;;  %v3331_v55 = vld [vmem:[#allocation7 + $0xb0] sm:$0xff]  ;;  %v3335_v1 = vld [vmem:[#allocation7 + $0x88] sm:$0xff] }
  0x6e   :  { %730 = vmatpush1.msra.mxu0 %v3317_v0  ;;  %801 = vmatpush1.msra.mxu1 %v3319_v10  ;;  %5111 = vst [vmem:[#allocation79_spill] sm:$0xff] %v3331_v55  ;;  %5112 = vst [vmem:[#allocation80_spill] sm:$0xff] %v3335_v1  ;;  %v3337_v0 = vld [vmem:[#allocation7 + $0x98] sm:$0xff]  ;;  %v3341_v10 = vld [vmem:[#allocation7 + $0x80] sm:$0xff] }
  0x6f   :  { %731 = vmatprep.subr.mxu0 %v3323_v46  ;;  %802 = vmatprep.subr.mxu1 %v3325_v15  ;;  %5113 = vst [vmem:[#allocation81_spill] sm:$0xff] %v3337_v0  ;;  %5114 = vst [vmem:[#allocation82_spill] sm:$0xff] %v3341_v10  ;;  %v3343_v46 = vld [vmem:[#allocation7 + $0x90] sm:$0xff]  ;;  %v3347_v15 = vld [vmem:[#allocation7 + $0x68] sm:$0xff] }
  0x70   :  { %732 = vmatpush1.msra.mxu0 %v3329_v17  ;;  %803 = vmatpush1.msra.mxu1 %v3331_v55  ;;  %5115 = vst [vmem:[#allocation83_spill] sm:$0xff] %v3343_v46  ;;  %5116 = vst [vmem:[#allocation84_spill] sm:$0xff] %v3347_v15  ;;  %v3349_v17 = vld [vmem:[#allocation7 + $0x78] sm:$0xff]  ;;  %v3353_v55 = vld [vmem:[#allocation7 + $0x60] sm:$0xff] }
  0x71   :  { %733 = vmatprep.subr.mxu0 %v3335_v1  ;;  %804 = vmatprep.subr.mxu1 %v3337_v0  ;;  %5117 = vst [vmem:[#allocation85_spill] sm:$0xff] %v3349_v17  ;;  %5118 = vst [vmem:[#allocation86_spill] sm:$0xff] %v3353_v55  ;;  %v3355_v1 = vld [vmem:[#allocation7 + $0x70] sm:$0xff]  ;;  %v3359_v0 = vld [vmem:[#allocation7 + $0x48] sm:$0xff] }
  0x72   :  { %734 = vmatpush1.msra.mxu0 %v3341_v10  ;;  %805 = vmatpush1.msra.mxu1 %v3343_v46  ;;  %5119 = vst [vmem:[#allocation87_spill] sm:$0xff] %v3355_v1  ;;  %5120 = vst [vmem:[#allocation88_spill] sm:$0xff] %v3359_v0  ;;  %v3361_v10 = vld [vmem:[#allocation7 + $0x58] sm:$0xff]  ;;  %v3365_v46 = vld [vmem:[#allocation7 + $0x40] sm:$0xff] }
  0x73   :  { %735 = vmatprep.subr.mxu0 %v3347_v15  ;;  %806 = vmatprep.subr.mxu1 %v3349_v17  ;;  %5121 = vst [vmem:[#allocation89_spill] sm:$0xff] %v3361_v10  ;;  %5122 = vst [vmem:[#allocation90_spill] sm:$0xff] %v3365_v46  ;;  %v3367_v15 = vld [vmem:[#allocation7 + $0x50] sm:$0xff]  ;;  %v3371_v17 = vld [vmem:[#allocation7 + $0x28] sm:$0xff] }
  0x74   :  { %736 = vmatpush1.msra.mxu0 %v3353_v55  ;;  %807 = vmatpush1.msra.mxu1 %v3355_v1  ;;  %5123 = vst [vmem:[#allocation91_spill] sm:$0xff] %v3367_v15  ;;  %5124 = vst [vmem:[#allocation92_spill] sm:$0xff] %v3371_v17  ;;  %v3373_v55 = vld [vmem:[#allocation7 + $0x38] sm:$0xff]  ;;  %v3377_v1 = vld [vmem:[#allocation7 + $0x20] sm:$0xff] }
  0x75   :  { %737 = vmatprep.subr.mxu0 %v3359_v0  ;;  %808 = vmatprep.subr.mxu1 %v3361_v10  ;;  %5125 = vst [vmem:[#allocation93_spill] sm:$0xff] %v3373_v55  ;;  %5126 = vst [vmem:[#allocation94_spill] sm:$0xff] %v3377_v1  ;;  %v3379_v0 = vld [vmem:[#allocation7 + $0x30] sm:$0xff]  ;;  %v3383_v10 = vld [vmem:[#allocation7 + $0x8] sm:$0xff] }
  0x76   :  { %738 = vmatpush1.msra.mxu0 %v3365_v46  ;;  %809 = vmatpush1.msra.mxu1 %v3367_v15  ;;  %5127 = vst [vmem:[#allocation95_spill] sm:$0xff] %v3379_v0  ;;  %5128 = vst [vmem:[#allocation96_spill] sm:$0xff] %v3383_v10  ;;  %v3385_v46 = vld [vmem:[#allocation7 + $0x18] sm:$0xff]  ;;  %v3389_v15 = vld [vmem:[#allocation7] sm:$0xff] }
  0x77   :  { %739 = vmatprep.subr.mxu0 %v3371_v17  ;;  %810 = vmatprep.subr.mxu1 %v3373_v55  ;;  %5129 = vst [vmem:[#allocation97_spill] sm:$0xff] %v3385_v46  ;;  %5130 = vst [vmem:[#allocation98_spill] sm:$0xff] %v3389_v15  ;;  %v3391_v17 = vld [vmem:[#allocation7 + $0x10] sm:$0xff]  ;;  %v3395_v55 = vld [vmem:[#allocation7 + $0x3e8] sm:$0xff] }
  0x78   :  { %740 = vmatpush1.msra.mxu0 %v3377_v1  ;;  %811 = vmatpush1.msra.mxu1 %v3379_v0  ;;  %5131 = vst [vmem:[#allocation99_spill] sm:$0xff] %v3391_v17  ;;  %5132 = vst [vmem:[#allocation100_spill] sm:$0xff] %v3395_v55  ;;  %v3397_v1 = vld [vmem:[#allocation7 + $0x3f8] sm:$0xff]  ;;  %v3401_v0 = vld [vmem:[#allocation7 + $0x3e0] sm:$0xff] }
  0x79   :  { %741 = vmatprep.subr.mxu0 %v3383_v10  ;;  %812 = vmatprep.subr.mxu1 %v3385_v46  ;;  %5133 = vst [vmem:[#allocation101_spill] sm:$0xff] %v3397_v1  ;;  %5134 = vst [vmem:[#allocation102_spill] sm:$0xff] %v3401_v0  ;;  %v3403_v10 = vld [vmem:[#allocation7 + $0x3f0] sm:$0xff]  ;;  %v3407_v46 = vld [vmem:[#allocation7 + $0x3c8] sm:$0xff] }
  0x7a   :  { %742 = vmatpush1.msra.mxu0 %v3389_v15  ;;  %813 = vmatpush1.msra.mxu1 %v3391_v17  ;;  %5135 = vst [vmem:[#allocation103_spill] sm:$0xff] %v3403_v10  ;;  %5136 = vst [vmem:[#allocation104_spill] sm:$0xff] %v3407_v46  ;;  %v3409_v15 = vld [vmem:[#allocation7 + $0x3d8] sm:$0xff]  ;;  %v3413_v17 = vld [vmem:[#allocation7 + $0x3c0] sm:$0xff] }
  0x7b   :  { %743 = vmatprep.subr.mxu0 %v3395_v55  ;;  %814 = vmatprep.subr.mxu1 %v3397_v1  ;;  %5137 = vst [vmem:[#allocation105_spill] sm:$0xff] %v3409_v15  ;;  %5138 = vst [vmem:[#allocation106_spill] sm:$0xff] %v3413_v17  ;;  %v3415_v55 = vld [vmem:[#allocation7 + $0x3d0] sm:$0xff]  ;;  %v3419_v1 = vld [vmem:[#allocation7 + $0x3a8] sm:$0xff] }
  0x7c   :  { %744 = vmatpush2.msra.mxu0 %v3401_v0  ;;  %815 = vmatpush2.msra.mxu1 %v3403_v10  ;;  %5139 = vst [vmem:[#allocation107_spill] sm:$0xff] %v3415_v55  ;;  %5140 = vst [vmem:[#allocation108_spill] sm:$0xff] %v3419_v1  ;;  %v3421_v0 = vld [vmem:[#allocation7 + $0x3b8] sm:$0xff]  ;;  %v3425_v10 = vld [vmem:[#allocation7 + $0x3a0] sm:$0xff] }
  0x7d   :  { %745 = vmatprep.subr.mxu0 %v3407_v46  ;;  %816 = vmatprep.subr.mxu1 %v3409_v15  ;;  %5141 = vst [vmem:[#allocation109_spill] sm:$0xff] %v3421_v0  ;;  %5142 = vst [vmem:[#allocation110_spill] sm:$0xff] %v3425_v10  ;;  %v3427_v46 = vld [vmem:[#allocation7 + $0x3b0] sm:$0xff]  ;;  %v3431_v15 = vld [vmem:[#allocation7 + $0x388] sm:$0xff] }
  0x7e   :  { %746 = vmatpush2.msra.mxu0 %v3413_v17  ;;  %817 = vmatpush2.msra.mxu1 %v3415_v55  ;;  %5143 = vst [vmem:[#allocation111_spill] sm:$0xff] %v3427_v46  ;;  %5144 = vst [vmem:[#allocation112_spill] sm:$0xff] %v3431_v15  ;;  %v3433_v17 = vld [vmem:[#allocation7 + $0x398] sm:$0xff]  ;;  %v3437_v55 = vld [vmem:[#allocation7 + $0x380] sm:$0xff] }
  0x7f   :  { %747 = vmatprep.subr.mxu0 %v3419_v1  ;;  %818 = vmatprep.subr.mxu1 %v3421_v0  ;;  %5145 = vst [vmem:[#allocation113_spill] sm:$0xff] %v3433_v17  ;;  %5146 = vst [vmem:[#allocation114_spill] sm:$0xff] %v3437_v55  ;;  %v3439_v1 = vld [vmem:[#allocation7 + $0x390] sm:$0xff]  ;;  %v3443_v0 = vld [vmem:[#allocation7 + $0x368] sm:$0xff] }
  0x80   :  { %748 = vmatpush2.msra.mxu0 %v3425_v10  ;;  %819 = vmatpush2.msra.mxu1 %v3427_v46  ;;  %5147 = vst [vmem:[#allocation115_spill] sm:$0xff] %v3439_v1  ;;  %5148 = vst [vmem:[#allocation116_spill] sm:$0xff] %v3443_v0  ;;  %v3445_v10 = vld [vmem:[#allocation7 + $0x378] sm:$0xff]  ;;  %v3449_v46 = vld [vmem:[#allocation7 + $0x360] sm:$0xff] }
  0x81   :  { %749 = vmatprep.subr.mxu0 %v3431_v15  ;;  %820 = vmatprep.subr.mxu1 %v3433_v17  ;;  %5149 = vst [vmem:[#allocation117_spill] sm:$0xff] %v3445_v10  ;;  %5150 = vst [vmem:[#allocation118_spill] sm:$0xff] %v3449_v46  ;;  %v3451_v15 = vld [vmem:[#allocation7 + $0x370] sm:$0xff]  ;;  %v3455_v17 = vld [vmem:[#allocation7 + $0x348] sm:$0xff] }
  0x82   :  { %750 = vmatpush2.msra.mxu0 %v3437_v55  ;;  %821 = vmatpush2.msra.mxu1 %v3439_v1  ;;  %5151 = vst [vmem:[#allocation119_spill] sm:$0xff] %v3451_v15  ;;  %5152 = vst [vmem:[#allocation120_spill] sm:$0xff] %v3455_v17  ;;  %v3457_v55 = vld [vmem:[#allocation7 + $0x358] sm:$0xff]  ;;  %v3461_v1 = vld [vmem:[#allocation7 + $0x340] sm:$0xff] }
  0x83   :  { %751 = vmatprep.subr.mxu0 %v3443_v0  ;;  %822 = vmatprep.subr.mxu1 %v3445_v10  ;;  %5153 = vst [vmem:[#allocation121_spill] sm:$0xff] %v3457_v55  ;;  %5154 = vst [vmem:[#allocation122_spill] sm:$0xff] %v3461_v1  ;;  %v3463_v0 = vld [vmem:[#allocation7 + $0x350] sm:$0xff]  ;;  %v3467_v10 = vld [vmem:[#allocation7 + $0x328] sm:$0xff] }
  0x84   :  { %752 = vmatpush2.msra.mxu0 %v3449_v46  ;;  %823 = vmatpush2.msra.mxu1 %v3451_v15  ;;  %5155 = vst [vmem:[#allocation123_spill] sm:$0xff] %v3463_v0  ;;  %5156 = vst [vmem:[#allocation124_spill] sm:$0xff] %v3467_v10  ;;  %v3469_v46 = vld [vmem:[#allocation7 + $0x338] sm:$0xff]  ;;  %v3473_v15 = vld [vmem:[#allocation7 + $0x320] sm:$0xff] }
  0x85   :  { %753 = vmatprep.subr.mxu0 %v3455_v17  ;;  %824 = vmatprep.subr.mxu1 %v3457_v55  ;;  %5157 = vst [vmem:[#allocation125_spill] sm:$0xff] %v3469_v46  ;;  %5158 = vst [vmem:[#allocation126_spill] sm:$0xff] %v3473_v15  ;;  %v3475_v17 = vld [vmem:[#allocation7 + $0x330] sm:$0xff]  ;;  %v3479_v55 = vld [vmem:[#allocation7 + $0x308] sm:$0xff] }
  0x86   :  { %754 = vmatpush2.msra.mxu0 %v3461_v1  ;;  %825 = vmatpush2.msra.mxu1 %v3463_v0  ;;  %5159 = vst [vmem:[#allocation127_spill] sm:$0xff] %v3475_v17  ;;  %5160 = vst [vmem:[#allocation128_spill] sm:$0xff] %v3479_v55  ;;  %v3481_v1 = vld [vmem:[#allocation7 + $0x318] sm:$0xff]  ;;  %v3485_v0 = vld [vmem:[#allocation7 + $0x300] sm:$0xff] }
  0x87   :  { %755 = vmatprep.subr.mxu0 %v3467_v10  ;;  %826 = vmatprep.subr.mxu1 %v3469_v46  ;;  %5161 = vst [vmem:[#allocation129_spill] sm:$0xff] %v3481_v1  ;;  %5162 = vst [vmem:[#allocation130_spill] sm:$0xff] %v3485_v0  ;;  %v3487_v10 = vld [vmem:[#allocation7 + $0x310] sm:$0xff]  ;;  %v3491_v46 = vld [vmem:[#allocation7 + $0x2e8] sm:$0xff] }
  0x88   :  { %756 = vmatpush2.msra.mxu0 %v3473_v15  ;;  %827 = vmatpush2.msra.mxu1 %v3475_v17  ;;  %5163 = vst [vmem:[#allocation131_spill] sm:$0xff] %v3487_v10  ;;  %5164 = vst [vmem:[#allocation132_spill] sm:$0xff] %v3491_v46  ;;  %v3493_v15 = vld [vmem:[#allocation7 + $0x2f8] sm:$0xff]  ;;  %v3497_v17 = vld [vmem:[#allocation7 + $0x2e0] sm:$0xff] }
  0x89   :  { %757 = vmatprep.subr.mxu0 %v3479_v55  ;;  %828 = vmatprep.subr.mxu1 %v3481_v1  ;;  %5165 = vst [vmem:[#allocation133_spill] sm:$0xff] %v3493_v15  ;;  %5166 = vst [vmem:[#allocation134_spill] sm:$0xff] %v3497_v17  ;;  %v3499_v55 = vld [vmem:[#allocation7 + $0x2f0] sm:$0xff]  ;;  %v3501_v1 = vld [vmem:[#allocation7 + $0x2c8] sm:$0xff] }
  0x8a   :  { %758 = vmatpush2.msra.mxu0 %v3485_v0  ;;  %829 = vmatpush2.msra.mxu1 %v3487_v10  ;;  %5167 = vst [vmem:[#allocation135_spill] sm:$0xff] %v3499_v55  ;;  %5168 = vst [vmem:[#allocation136_spill] sm:$0xff] %v3501_v1  ;;  %v3505_v0 = vld [vmem:[#allocation7 + $0x2d8] sm:$0xff]  ;;  %v3507_v10 = vld [vmem:[#allocation7 + $0x2c0] sm:$0xff] }
  0x8b   :  { %759 = vmatprep.subr.mxu0 %v3491_v46  ;;  %830 = vmatprep.subr.mxu1 %v3493_v15  ;;  %5169 = vst [vmem:[#allocation137_spill] sm:$0xff] %v3505_v0  ;;  %5170 = vst [vmem:[#allocation138_spill] sm:$0xff] %v3507_v10  ;;  %v3513_v15 = vld [vmem:[#allocation7 + $0x2a8] sm:$0xff]  ;;  %v3515_v46 = vld [vmem:[#allocation7 + $0x2b8] sm:$0xff] }
  0x8c   :  { %760 = vmatpush2.msra.mxu0 %v3497_v17  ;;  %831 = vmatpush2.msra.mxu1 %v3499_v55  ;;  %5172 = vst [vmem:[#allocation140_spill] sm:$0xff] %v3513_v15  ;;  %5173 = vst [vmem:[#allocation141_spill] sm:$0xff] %v3515_v46  ;;  %v3521_v55 = vld [vmem:[#allocation7 + $0x2b0] sm:$0xff]  ;;  %v3523_v17 = vld [vmem:[#allocation7 + $0x288] sm:$0xff] }
  0x8d   :  { %761 = vmatprep.subr.mxu0 %v3501_v1  ;;  %832 = vmatprep.subr.mxu1 %v3505_v0  ;;  %5175 = vst [vmem:[#allocation143_spill] sm:$0xff] %v3521_v55  ;;  %5176 = vst [vmem:[#allocation144_spill] sm:$0xff] %v3523_v17  ;;  %v3529_v0 = vld [vmem:[#allocation7 + $0x280] sm:$0xff]  ;;  %v3531_v1 = vld [vmem:[#allocation7 + $0x290] sm:$0xff] }
  0x8e   :  { %762 = vmatpush2.msra.mxu0 %v3507_v10  ;;  %833 = vmatpush2.msra.mxu1 %v3509_v12  ;;  %5178 = vst [vmem:[#allocation146_spill] sm:$0xff] %v3529_v0  ;;  %5179 = vst [vmem:[#allocation147_spill] sm:$0xff] %v3531_v1  ;;  %v3535_v10 = vld [vmem:[#allocation7 + $0x268] sm:$0xff]  ;;  %v3537_v12 = vld [vmem:[#allocation7 + $0x278] sm:$0xff] }
  0x8f   :  { %763 = vmatprep.subr.mxu0 %v3513_v15  ;;  %834 = vmatprep.subr.mxu1 %v3515_v46  ;;  %5180 = vst [vmem:[#allocation148_spill] sm:$0xff] %v3535_v10  ;;  %5181 = vst [vmem:[#allocation149_spill] sm:$0xff] %v3537_v12  ;;  %v3543_v15 = vld [vmem:[#allocation7 + $0x270] sm:$0xff]  ;;  %v3547_v46 = vld [vmem:[#allocation7 + $0x248] sm:$0xff] }
  0x90   :  { %764 = vmatpush2.msra.mxu0 %v3517_v16  ;;  %835 = vmatpush2.msra.mxu1 %v3521_v55  ;;  %5183 = vst [vmem:[#allocation151_spill] sm:$0xff] %v3543_v15  ;;  %5184 = vst [vmem:[#allocation152_spill] sm:$0xff] %v3547_v46  ;;  %v3549_v16 = vld [vmem:[#allocation7 + $0x258] sm:$0xff]  ;;  %v3553_v55 = vld [vmem:[#allocation7 + $0x240] sm:$0xff] }
  0x91   :  { %765 = vmatprep.subr.mxu0 %v3523_v17  ;;  %836 = vmatprep.subr.mxu1 %v3525_v14  ;;  %5185 = vst [vmem:[#allocation153_spill] sm:$0xff] %v3549_v16  ;;  %5186 = vst [vmem:[#allocation154_spill] sm:$0xff] %v3553_v55  ;;  %v3555_v17 = vld [vmem:[#allocation7 + $0x250] sm:$0xff]  ;;  %v3559_v14 = vld [vmem:[#allocation7 + $0x228] sm:$0xff] }
  0x92   :  { %766 = vmatpush2.msra.mxu0 %v3529_v0  ;;  %837 = vmatpush2.msra.mxu1 %v3531_v1  ;;  %5187 = vst [vmem:[#allocation155_spill] sm:$0xff] %v3555_v17  ;;  %5188 = vst [vmem:[#allocation156_spill] sm:$0xff] %v3559_v14  ;;  %v3561_v0 = vld [vmem:[#allocation7 + $0x238] sm:$0xff]  ;;  %v3565_v1 = vld [vmem:[#allocation7 + $0x220] sm:$0xff] }
  0x93   :  { %767 = vmatprep.subr.mxu0 %v3535_v10  ;;  %838 = vmatprep.subr.mxu1 %v3537_v12  ;;  %5189 = vst [vmem:[#allocation157_spill] sm:$0xff] %v3561_v0  ;;  %5190 = vst [vmem:[#allocation158_spill] sm:$0xff] %v3565_v1  ;;  %v3567_v10 = vld [vmem:[#allocation7 + $0x230] sm:$0xff]  ;;  %v3571_v12 = vld [vmem:[#allocation7 + $0x208] sm:$0xff] }
  0x94   :  { %768 = vmatpush2.msra.mxu0 %v3541_v13  ;;  %839 = vmatpush2.msra.mxu1 %v3543_v15  ;;  %5191 = vst [vmem:[#allocation159_spill] sm:$0xff] %v3567_v10  ;;  %5192 = vst [vmem:[#allocation160_spill] sm:$0xff] %v3571_v12  ;;  %v3573_v13 = vld [vmem:[#allocation7 + $0x218] sm:$0xff]  ;;  %v3577_v15 = vld [vmem:[#allocation7 + $0x200] sm:$0xff] }
  0x95   :  { %769 = vmatprep.subr.mxu0 %v3547_v46  ;;  %840 = vmatprep.subr.mxu1 %v3549_v16  ;;  %5193 = vst [vmem:[#allocation161_spill] sm:$0xff] %v3573_v13  ;;  %5194 = vst [vmem:[#allocation162_spill] sm:$0xff] %v3577_v15  ;;  %v3579_v46 = vld [vmem:[#allocation7 + $0x210] sm:$0xff] }
  0x96   :  { %770 = vmatpush2.msra.mxu0 %v3553_v55  ;;  %841 = vmatpush2.msra.mxu1 %v3555_v17  ;;  %5195 = vst [vmem:[#allocation163_spill] sm:$0xff] %v3579_v46 }
  0x97   :  { %771 = vmatprep.subr.mxu0 %v3559_v14  ;;  %842 = vmatprep.subr.mxu1 %v3561_v0  ;;  %v88_v0 = vlaneseq }
  0x98   :  { %772 = vmatpush2.msra.mxu0 %v3565_v1  ;;  %843 = vmatpush2.msra.mxu1 %v3567_v10 }
  0x99   :  { %773 = vmatprep.subr.mxu0 %v3571_v12  ;;  %844 = vmatprep.subr.mxu1 %v3573_v13  ;;  %v3589_v14 = vshrl.u32 %v88_v0, 7  ;;  %v86_v12 = vld [vmem:[%s4721_s3] sm:$0xf] }
  0x9a   :  { %774 = vmatpush2.msra.mxu0 %v3577_v15  ;;  %845 = vmatpush2.msra.mxu1 %v3579_v46 }
  0x9b   :  { %877 = vmatprep.subr.mxu0 %v2975_v18  ;;  %948 = vmatprep.subr.mxu1 %v2977_v19  ;;  %5196 = vst [vmem:[#allocation164_spill] sm:$0xff] %v3589_v14  ;;  %v4872_v1 = vsub.s32 0, %v3589_v14  ;;  %v4877_v13 = vsub.s32 1, %v3589_v14  ;;  %v4880_v18 = vsub.s32 2, %v3589_v14  ;;  %v4883_v11 = vsub.s32 3, %v3589_v14 }
  0x9d   :  { %v91_v46 = vrot.slane %v86_v12, %v4872_v1  ;;  %v95_v0 = vrot.slane %v86_v12, %v4877_v13  ;;  %v99_v8 = vrot.slane %v86_v12, %v4880_v18  ;;  %v103_v1 = vrot.slane %v86_v12, %v4883_v11 }
  0xef   :  { %v203_v17 = vpop.f32.mrf.mxu0 }
  0xf0   :  { %v298_v10 = vpop.f32.mrf.mxu1 }
  0xf1   :  { %v205_v15 = vpop.f32.mrf.mxu0 }
  0xf2   :  { %v300_v55 = vpop.f32.mrf.mxu1 }
  0xfe   :  { %v209_v19 = vpop.f32.mrf.mxu0 }
  0xff   :  { %v3601_v16 = vadd.f32 %v209_v19, %v91_v46 }
 0x100   :  { %v211_v9 = vpop.f32.mrf.mxu0 }
 0x101   :  { %5197 = vst [vmem:[#allocation165_spill] sm:$0xff] %v3601_v16  ;;  %v3606_v7 = vadd.f32 %v211_v9, %v95_v0 }
 0x102   :  { %v304_v6 = vpop.f32.mrf.mxu1 }
 0x103   :  { %5198 = vst [vmem:[#allocation166_spill] sm:$0xff] %v3606_v7  ;;  %v3610_v5 = vadd.f32 %v304_v6, %v99_v8 }
 0x104   :  { %v215_v4 = vpop.f32.mrf.mxu0  ;;  %v306_v3 = vpop.f32.mrf.mxu1 }
 0x105   :  { %5199 = vst [vmem:[#allocation167_spill] sm:$0xff] %v3610_v5  ;;  %v3612_v2 = vadd.f32 %v215_v4, %v91_v46  ;;  %v3614_v19 = vadd.f32 %v306_v3, %v103_v1 }
 0x106   :  { %v217_v13 = vpop.f32.mrf.mxu0 }
 0x107   :  { %5200 = vst [vmem:[#allocation168_spill] sm:$0xff] %v3612_v2  ;;  %5201 = vst [vmem:[#allocation169_spill] sm:$0xff] %v3614_v19  ;;  %v3616_v16 = vadd.f32 %v217_v13, %v95_v0 }
 0x108   :  { %v310_v63 = vpop.f32.mrf.mxu1 }
 0x109   :  { %5202 = vst [vmem:[#allocation170_spill] sm:$0xff] %v3616_v16  ;;  %v3618_v62 = vadd.f32 %v310_v63, %v99_v8 }
 0x10a   :  { %v221_v9 = vpop.f32.mrf.mxu0  ;;  %v312_v18 = vpop.f32.mrf.mxu1 }
 0x10b   :  { %5203 = vst [vmem:[#allocation171_spill] sm:$0xff] %v3618_v62  ;;  %v3620_v7 = vadd.f32 %v221_v9, %v91_v46  ;;  %v3622_v14 = vadd.f32 %v312_v18, %v103_v1 }
 0x10c   :  { %v223_v6 = vpop.f32.mrf.mxu0 }
 0x10d   :  { %5204 = vst [vmem:[#allocation172_spill] sm:$0xff] %v3620_v7  ;;  %5205 = vst [vmem:[#allocation173_spill] sm:$0xff] %v3622_v14  ;;  %v3624_v12 = vadd.f32 %v223_v6, %v95_v0  ;;  %v204_v6 = vadd.f32 %v203_v17, %v91_v46  ;;  %v206_v14 = vadd.f32 %v205_v15, %v95_v0 }
 0x10e   :  { %v316_v11 = vpop.f32.mrf.mxu1 }
 0x10f   :  { %5206 = vst [vmem:[#allocation174_spill] sm:$0xff] %v3624_v12  ;;  %v3626_v4 = vadd.f32 %v316_v11, %v99_v8 }
 0x110   :  { %v227_v3 = vpop.f32.mrf.mxu0  ;;  %v318_v2 = vpop.f32.mrf.mxu1 }
 0x111   :  { %5207 = vst [vmem:[#allocation175_spill] sm:$0xff] %v3626_v4  ;;  %v3628_v5 = vadd.f32 %v227_v3, %v91_v46  ;;  %v3630_v13 = vadd.f32 %v318_v2, %v103_v1 }
 0x112   :  { %v229_v63 = vpop.f32.mrf.mxu0 }
 0x113   :  { %5208 = vst [vmem:[#allocation176_spill] sm:$0xff] %v3628_v5  ;;  %5209 = vst [vmem:[#allocation177_spill] sm:$0xff] %v3630_v13  ;;  %v3632_v62 = vadd.f32 %v229_v63, %v95_v0  ;;  %v301_v63 = vadd.f32 %v300_v55, %v103_v1  ;;  %v299_v13 = vadd.f32 %v298_v10, %v99_v8  ;;  %v5254_v10 = vld [vmem:[#allocation52_spill] sm:$0xff] }
 0x114   :  { %v322_v16 = vpop.f32.mrf.mxu1 }
 0x115   :  { %5210 = vst [vmem:[#allocation178_spill] sm:$0xff] %v3632_v62  ;;  %v3634_v9 = vadd.f32 %v322_v16, %v99_v8 }
 0x116   :  { %v324_v18 = vpop.f32.mrf.mxu1 }
 0x117   :  { %5211 = vst [vmem:[#allocation179_spill] sm:$0xff] %v3634_v9  ;;  %v3636_v7 = vadd.f32 %v324_v18, %v103_v1  ;;  %v5253_v1 = vld [vmem:[#allocation51_spill] sm:$0xff] }
 0x119   :  { %5212 = vst [vmem:[#allocation180_spill] sm:$0xff] %v3636_v7  ;;  %v607_v12 = vpop.f32.mrf.mxu0  ;;  %v678_v3 = vpop.f32.mrf.mxu1 }
 0x11a   :  { %v683_v11 = vadd.f32 %v607_v12, %v204_v6  ;;  %v685_v60 = vadd.f32 %v678_v3, %v299_v13  ;;  %v5256_v13 = vld [vmem:[#allocation54_spill] sm:$0xff]  ;;  %v5258_v6 = vld [vmem:[#allocation56_spill] sm:$0xff] }
 0x11b   :  { %v609_v4 = vpop.f32.mrf.mxu0  ;;  %v680_v5 = vpop.f32.mrf.mxu1  ;;  %v5260_v3 = vld [vmem:[#allocation58_spill] sm:$0xff] }
 0x11c   :  { %v2252_v19 = vmul.f32 -1.442695, %v683_v11  ;;  %v684_v61 = vadd.f32 %v609_v4, %v206_v14  ;;  %v686_v62 = vadd.f32 %v680_v5, %v301_v63  ;;  %v5255_v4 = vld [vmem:[#allocation53_spill] sm:$0xff]  ;;  %v5262_v63 = vld [vmem:[#allocation60_spill] sm:$0xff] }
 0x11d   :  { %v5259_v11 = vld [vmem:[#allocation57_spill] sm:$0xff] }
 0x11e   :  { %2289 = vpow2.f32 %v2252_v19  ;;  %v2253_v2 = vmul.f32 -1.442695, %v684_v61  ;;  %v2254_v16 = vmul.f32 -1.442695, %v686_v62 }
 0x120   :  { %2291 = vpow2.f32 %v2253_v2  ;;  %v5261_v2 = vld [vmem:[#allocation59_spill] sm:$0xff] }
 0x121   :  { %2293 = vpow2.f32 %v2254_v16  ;;  %v5263_v16 = vld [vmem:[#allocation61_spill] sm:$0xff] }
 0x12b   :  { %v2290_v9 = vpop.eup %2289 }
 0x12c   :  { %v690_v18 = vadd.f32 1.0, %v2290_v9  ;;  %v5257_v9 = vld [vmem:[#allocation55_spill] sm:$0xff] }
 0x12d   :  { %v2292_v7 = vpop.eup %2291 }
 0x12e   :  { %2295 = vrcp.f32 %v690_v18  ;;  %v696_v15 = vadd.f32 1.0, %v2292_v7  ;;  %v2294_v17 = vpop.eup %2293  ;;  %v5252_v7 = vld [vmem:[#allocation50_spill] sm:$0xff] }
 0x12f   :  { %2297 = vtanh.f32 %v685_v60  ;;  %v703_v61 = vadd.f32 1.0, %v2294_v17  ;;  %v5251_v60 = vld [vmem:[#allocation49_spill] sm:$0xff]  ;;  %v5264_v18 = vld [vmem:[#allocation62_spill] sm:$0xff]  ;;  %v5266_v17 = vld [vmem:[#allocation64_spill] sm:$0xff] }
 0x130   :  { %2299 = vrcp.f32 %v696_v15  ;;  %v5265_v15 = vld [vmem:[#allocation63_spill] sm:$0xff] }
 0x131   :  { %2301 = vrcp.f32 %v703_v61  ;;  %v5270_v61 = vld [vmem:[#allocation68_spill] sm:$0xff] }
 0x13b   :  { %v2296_v14 = vpop.eup %2295 }
 0x13c   :  { %v2298_v46 = vpop.eup %2297 }
 0x13d   :  { %v2300_v0 = vpop.eup %2299  ;;  %v707_v12 = vmul.f32 %v2298_v46, %v2296_v14  ;;  %v5267_v14 = vld [vmem:[#allocation65_spill] sm:$0xff]  ;;  %v5268_v46 = vld [vmem:[#allocation66_spill] sm:$0xff] }
 0x13e   :  { %v706_v19 = vmul.f32 0.0, %v2300_v0  ;;  %v2302_v62 = vpop.eup %2301  ;;  %v5269_v0 = vld [vmem:[#allocation67_spill] sm:$0xff] }
 0x140   :  { %v3638_v55 = vadd.f32 %v707_v12, %v706_v19  ;;  %v5271_v19 = vld [vmem:[#allocation69_spill] sm:$0xff]  ;;  %v5272_v12 = vld [vmem:[#allocation70_spill] sm:$0xff] }
 0x142   :  { %2303 = vtanh.f32 %v3638_v55 }
 0x14f   :  { %v2304_v5 = vpop.eup %2303 }
 0x150   :  { %v3641_v8 = vmul.f32 %v2304_v5, %v2302_v62  ;;  %v5273_v62 = vld [vmem:[#allocation71_spill] sm:$0xff]  ;;  %v5274_v5 = vld [vmem:[#allocation72_spill] sm:$0xff] }
 0x152   :  { %776 = vmatmul.mubr.f32.vlgmr.msra.gmra.mxu0 %v3641_v8  ;;  %847 = vmatmul.mubr.f32.vlgmr.msra.gmra.mxu1 %v3641_v8 }
 0x153   :  { %878 = vmatpush1.msra.mxu0 %v2979_v20  ;;  %949 = vmatpush1.msra.mxu1 %v2981_v21  ;;  %v5213_v20 = vld [vmem:[#allocation12_spill] sm:$0xff]  ;;  %v5214_v21 = vld [vmem:[#allocation13_spill] sm:$0xff] }
 0x154   :  { %879 = vmatprep.subr.mxu0 %v2985_v22  ;;  %950 = vmatprep.subr.mxu1 %v2987_v23  ;;  %v5215_v22 = vld [vmem:[#allocation14_spill] sm:$0xff]  ;;  %v5216_v23 = vld [vmem:[#allocation15_spill] sm:$0xff] }
 0x155   :  { %880 = vmatpush1.msra.mxu0 %v2991_v24  ;;  %951 = vmatpush1.msra.mxu1 %v2993_v25  ;;  %v5217_v24 = vld [vmem:[#allocation16_spill] sm:$0xff]  ;;  %v5218_v25 = vld [vmem:[#allocation17_spill] sm:$0xff] }
 0x156   :  { %881 = vmatprep.subr.mxu0 %v2997_v26  ;;  %952 = vmatprep.subr.mxu1 %v2999_v27  ;;  %v5219_v26 = vld [vmem:[#allocation18_spill] sm:$0xff]  ;;  %v5220_v27 = vld [vmem:[#allocation19_spill] sm:$0xff] }
 0x157   :  { %882 = vmatpush1.msra.mxu0 %v3003_v28  ;;  %953 = vmatpush1.msra.mxu1 %v3005_v29  ;;  %v5221_v28 = vld [vmem:[#allocation20_spill] sm:$0xff]  ;;  %v5222_v29 = vld [vmem:[#allocation21_spill] sm:$0xff] }
 0x158   :  { %883 = vmatprep.subr.mxu0 %v3009_v30  ;;  %954 = vmatprep.subr.mxu1 %v3011_v31  ;;  %v5223_v30 = vld [vmem:[#allocation22_spill] sm:$0xff]  ;;  %v5224_v31 = vld [vmem:[#allocation23_spill] sm:$0xff] }
 0x159   :  { %884 = vmatpush1.msra.mxu0 %v3015_v32  ;;  %955 = vmatpush1.msra.mxu1 %v3017_v33  ;;  %v5225_v32 = vld [vmem:[#allocation24_spill] sm:$0xff]  ;;  %v5226_v33 = vld [vmem:[#allocation25_spill] sm:$0xff] }
 0x15a   :  { %885 = vmatprep.subr.mxu0 %v3021_v34  ;;  %956 = vmatprep.subr.mxu1 %v3023_v35  ;;  %v5227_v34 = vld [vmem:[#allocation26_spill] sm:$0xff]  ;;  %v5228_v35 = vld [vmem:[#allocation27_spill] sm:$0xff] }
 0x15b   :  { %886 = vmatpush1.msra.mxu0 %v3027_v36  ;;  %957 = vmatpush1.msra.mxu1 %v3029_v37  ;;  %v5229_v36 = vld [vmem:[#allocation28_spill] sm:$0xff]  ;;  %v5230_v37 = vld [vmem:[#allocation29_spill] sm:$0xff] }
 0x15c   :  { %887 = vmatprep.subr.mxu0 %v3033_v38  ;;  %958 = vmatprep.subr.mxu1 %v3035_v39  ;;  %v5231_v38 = vld [vmem:[#allocation30_spill] sm:$0xff]  ;;  %v5232_v39 = vld [vmem:[#allocation31_spill] sm:$0xff] }
 0x15d   :  { %888 = vmatpush1.msra.mxu0 %v3039_v40  ;;  %959 = vmatpush1.msra.mxu1 %v3041_v41  ;;  %v5233_v40 = vld [vmem:[#allocation32_spill] sm:$0xff]  ;;  %v5234_v41 = vld [vmem:[#allocation33_spill] sm:$0xff] }
 0x15e   :  { %889 = vmatprep.subr.mxu0 %v3045_v42  ;;  %960 = vmatprep.subr.mxu1 %v3047_v43  ;;  %v5235_v42 = vld [vmem:[#allocation34_spill] sm:$0xff]  ;;  %v5236_v43 = vmov 0.0  }
 0x15f   :  { %890 = vmatpush1.msra.mxu0 %v3051_v44  ;;  %961 = vmatpush1.msra.mxu1 %v3055_v45  ;;  %v5237_v44 = vld [vmem:[#allocation35_spill] sm:$0xff]  ;;  %v5238_v45 = vld [vmem:[#allocation36_spill] sm:$0xff] }
 0x160   :  { %891 = vmatprep.subr.mxu0 %v3062_v47  ;;  %962 = vmatprep.subr.mxu1 %v3064_v48  ;;  %v5239_v47 = vld [vmem:[#allocation37_spill] sm:$0xff]  ;;  %v5240_v48 = vld [vmem:[#allocation38_spill] sm:$0xff] }
 0x161   :  { %892 = vmatpush1.msra.mxu0 %v3068_v49  ;;  %963 = vmatpush1.msra.mxu1 %v3072_v50  ;;  %v5241_v49 = vld [vmem:[#allocation39_spill] sm:$0xff]  ;;  %v5242_v50 = vld [vmem:[#allocation40_spill] sm:$0xff] }
 0x162   :  { %893 = vmatprep.subr.mxu0 %v3074_v51  ;;  %964 = vmatprep.subr.mxu1 %v3078_v52  ;;  %v5243_v51 = vld [vmem:[#allocation41_spill] sm:$0xff]  ;;  %v5244_v52 = vld [vmem:[#allocation42_spill] sm:$0xff] }
 0x163   :  { %894 = vmatpush1.msra.mxu0 %v3082_v53  ;;  %965 = vmatpush1.msra.mxu1 %v3086_v54  ;;  %v5245_v53 = vld [vmem:[#allocation43_spill] sm:$0xff]  ;;  %v5246_v54 = vld [vmem:[#allocation44_spill] sm:$0xff] }
 0x164   :  { %895 = vmatprep.subr.mxu0 %v3093_v56  ;;  %966 = vmatprep.subr.mxu1 %v3095_v57  ;;  %v5247_v56 = vld [vmem:[#allocation45_spill] sm:$0xff]  ;;  %v5248_v57 = vld [vmem:[#allocation46_spill] sm:$0xff] }
 0x165   :  { %896 = vmatpush1.msra.mxu0 %v3099_v58  ;;  %967 = vmatpush1.msra.mxu1 %v3103_v59  ;;  %v5249_v58 = vld [vmem:[#allocation47_spill] sm:$0xff]  ;;  %v5250_v59 = vld [vmem:[#allocation48_spill] sm:$0xff] }
 0x166   :  { %897 = vmatprep.subr.mxu0 %v5213_v20  ;;  %968 = vmatprep.subr.mxu1 %v5214_v21  ;;  %v5276_v20 = vld [vmem:[#allocation74_spill] sm:$0xff]  ;;  %v5277_v21 = vld [vmem:[#allocation75_spill] sm:$0xff] }
 0x167   :  { %898 = vmatpush1.msra.mxu0 %v5215_v22  ;;  %969 = vmatpush1.msra.mxu1 %v5216_v23  ;;  %v5278_v22 = vld [vmem:[#allocation76_spill] sm:$0xff]  ;;  %v5279_v23 = vld [vmem:[#allocation77_spill] sm:$0xff] }
 0x168   :  { %899 = vmatprep.subr.mxu0 %v5217_v24  ;;  %970 = vmatprep.subr.mxu1 %v5218_v25  ;;  %v5280_v24 = vld [vmem:[#allocation78_spill] sm:$0xff]  ;;  %v5281_v25 = vld [vmem:[#allocation79_spill] sm:$0xff] }
 0x169   :  { %900 = vmatpush1.msra.mxu0 %v5219_v26  ;;  %971 = vmatpush1.msra.mxu1 %v5220_v27  ;;  %v5282_v26 = vld [vmem:[#allocation80_spill] sm:$0xff]  ;;  %v5283_v27 = vld [vmem:[#allocation81_spill] sm:$0xff] }
 0x16a   :  { %901 = vmatprep.subr.mxu0 %v5221_v28  ;;  %972 = vmatprep.subr.mxu1 %v5222_v29  ;;  %v5284_v28 = vld [vmem:[#allocation82_spill] sm:$0xff]  ;;  %v5285_v29 = vld [vmem:[#allocation83_spill] sm:$0xff] }
 0x16b   :  { %902 = vmatpush1.msra.mxu0 %v5223_v30  ;;  %973 = vmatpush1.msra.mxu1 %v5224_v31  ;;  %v5286_v30 = vld [vmem:[#allocation84_spill] sm:$0xff]  ;;  %v5287_v31 = vld [vmem:[#allocation85_spill] sm:$0xff] }
 0x16c   :  { %903 = vmatprep.subr.mxu0 %v5225_v32  ;;  %974 = vmatprep.subr.mxu1 %v5226_v33  ;;  %v5288_v32 = vld [vmem:[#allocation86_spill] sm:$0xff]  ;;  %v5289_v33 = vld [vmem:[#allocation87_spill] sm:$0xff] }
 0x16d   :  { %904 = vmatpush1.msra.mxu0 %v5227_v34  ;;  %975 = vmatpush1.msra.mxu1 %v5228_v35  ;;  %v5290_v34 = vld [vmem:[#allocation88_spill] sm:$0xff]  ;;  %v5291_v35 = vld [vmem:[#allocation89_spill] sm:$0xff] }
 0x16e   :  { %905 = vmatprep.subr.mxu0 %v5229_v36  ;;  %976 = vmatprep.subr.mxu1 %v5230_v37  ;;  %v5292_v36 = vld [vmem:[#allocation90_spill] sm:$0xff]  ;;  %v5293_v37 = vld [vmem:[#allocation91_spill] sm:$0xff] }
 0x16f   :  { %906 = vmatpush1.msra.mxu0 %v5231_v38  ;;  %977 = vmatpush1.msra.mxu1 %v5232_v39  ;;  %v5294_v38 = vld [vmem:[#allocation92_spill] sm:$0xff]  ;;  %v5295_v39 = vld [vmem:[#allocation93_spill] sm:$0xff] }
 0x170   :  { %907 = vmatprep.subr.mxu0 %v5233_v40  ;;  %978 = vmatprep.subr.mxu1 %v5234_v41  ;;  %v5296_v40 = vld [vmem:[#allocation94_spill] sm:$0xff]  ;;  %v5297_v41 = vld [vmem:[#allocation95_spill] sm:$0xff] }
 0x171   :  { %908 = vmatpush1.msra.mxu0 %v5235_v42  ;;  %941 = vmatprep.mubr.f32.mxu0 %v5236_v43  ;;  %v5298_v42 = vld [vmem:[#allocation96_spill] sm:$0xff] }
 0x172   :  { %979 = vmatpush1.msra.mxu1 %v5237_v44  ;;  %1012 = vmatprep.mubr.f32.mxu1 %v5236_v43  ;;  %v5299_v44 = vld [vmem:[#allocation97_spill] sm:$0xff] }
 0x173   :  { %942 = vmatmul.mubr.f32.vlgmr.msra.gmra.mxu0 %v3641_v8  ;;  %1013 = vmatmul.mubr.f32.vlgmr.msra.gmra.mxu1 %v3641_v8  ;;  %v5275_v8 = vld [vmem:[#allocation73_spill] sm:$0xff] }
 0x174   :  { %1047 = vmatprep.subr.mxu0 %v5238_v45  ;;  %1118 = vmatprep.subr.mxu1 %v5239_v47  ;;  %v5300_v45 = vld [vmem:[#allocation98_spill] sm:$0xff]  ;;  %v5301_v47 = vld [vmem:[#allocation99_spill] sm:$0xff] }
 0x175   :  { %1048 = vmatpush1.msra.mxu0 %v5240_v48  ;;  %1119 = vmatpush1.msra.mxu1 %v5241_v49  ;;  %v5302_v48 = vld [vmem:[#allocation100_spill] sm:$0xff]  ;;  %v5303_v49 = vld [vmem:[#allocation101_spill] sm:$0xff] }
 0x176   :  { %1049 = vmatprep.subr.mxu0 %v5242_v50  ;;  %1120 = vmatprep.subr.mxu1 %v5243_v51  ;;  %v5304_v50 = vld [vmem:[#allocation102_spill] sm:$0xff]  ;;  %v5305_v51 = vld [vmem:[#allocation103_spill] sm:$0xff] }
 0x177   :  { %1050 = vmatpush1.msra.mxu0 %v5244_v52  ;;  %1121 = vmatpush1.msra.mxu1 %v5245_v53  ;;  %v5306_v52 = vld [vmem:[#allocation104_spill] sm:$0xff]  ;;  %v5307_v53 = vld [vmem:[#allocation105_spill] sm:$0xff] }
 0x178   :  { %1051 = vmatprep.subr.mxu0 %v5246_v54  ;;  %1122 = vmatprep.subr.mxu1 %v5247_v56  ;;  %v5308_v54 = vld [vmem:[#allocation106_spill] sm:$0xff]  ;;  %v5309_v56 = vld [vmem:[#allocation107_spill] sm:$0xff] }
 0x179   :  { %1052 = vmatpush1.msra.mxu0 %v5248_v57  ;;  %1123 = vmatpush1.msra.mxu1 %v5249_v58  ;;  %v5310_v57 = vld [vmem:[#allocation108_spill] sm:$0xff]  ;;  %v5311_v58 = vld [vmem:[#allocation109_spill] sm:$0xff] }
 0x17a   :  { %1053 = vmatprep.subr.mxu0 %v5250_v59  ;;  %1124 = vmatprep.subr.mxu1 %v5251_v60  ;;  %v5312_v59 = vld [vmem:[#allocation110_spill] sm:$0xff]  ;;  %v5313_v60 = vld [vmem:[#allocation111_spill] sm:$0xff] }
 0x17b   :  { %1054 = vmatpush1.msra.mxu0 %v5252_v7  ;;  %1125 = vmatpush1.msra.mxu1 %v5253_v1  ;;  %v5314_v7 = vld [vmem:[#allocation112_spill] sm:$0xff]  ;;  %v5315_v1 = vld [vmem:[#allocation113_spill] sm:$0xff] }
 0x17c   :  { %1055 = vmatprep.subr.mxu0 %v5254_v10  ;;  %1126 = vmatprep.subr.mxu1 %v5255_v4  ;;  %v5316_v10 = vld [vmem:[#allocation114_spill] sm:$0xff]  ;;  %v5317_v4 = vld [vmem:[#allocation115_spill] sm:$0xff] }
 0x17d   :  { %1056 = vmatpush1.msra.mxu0 %v5256_v13  ;;  %1127 = vmatpush1.msra.mxu1 %v5257_v9  ;;  %v5318_v13 = vld [vmem:[#allocation116_spill] sm:$0xff]  ;;  %v5319_v9 = vld [vmem:[#allocation117_spill] sm:$0xff] }
 0x17e   :  { %1057 = vmatprep.subr.mxu0 %v5258_v6  ;;  %1128 = vmatprep.subr.mxu1 %v5259_v11  ;;  %v5320_v6 = vld [vmem:[#allocation118_spill] sm:$0xff]  ;;  %v5321_v11 = vld [vmem:[#allocation119_spill] sm:$0xff] }
 0x17f   :  { %1058 = vmatpush1.msra.mxu0 %v5260_v3  ;;  %1129 = vmatpush1.msra.mxu1 %v5261_v2  ;;  %v5322_v3 = vld [vmem:[#allocation120_spill] sm:$0xff]  ;;  %v5323_v2 = vld [vmem:[#allocation121_spill] sm:$0xff] }
 0x180   :  { %1059 = vmatprep.subr.mxu0 %v5262_v63  ;;  %1130 = vmatprep.subr.mxu1 %v5263_v16  ;;  %v5324_v63 = vld [vmem:[#allocation122_spill] sm:$0xff]  ;;  %v5325_v16 = vld [vmem:[#allocation123_spill] sm:$0xff] }
 0x181   :  { %1060 = vmatpush1.msra.mxu0 %v5264_v18  ;;  %1131 = vmatpush1.msra.mxu1 %v5265_v15  ;;  %v5326_v18 = vld [vmem:[#allocation124_spill] sm:$0xff]  ;;  %v5327_v15 = vld [vmem:[#allocation125_spill] sm:$0xff] }
 0x182   :  { %1061 = vmatprep.subr.mxu0 %v5266_v17  ;;  %1132 = vmatprep.subr.mxu1 %v5267_v14  ;;  %v5328_v17 = vld [vmem:[#allocation126_spill] sm:$0xff]  ;;  %v5329_v14 = vld [vmem:[#allocation127_spill] sm:$0xff] }
 0x183   :  { %1062 = vmatpush1.msra.mxu0 %v5268_v46  ;;  %1133 = vmatpush1.msra.mxu1 %v5269_v0  ;;  %v5330_v46 = vld [vmem:[#allocation128_spill] sm:$0xff]  ;;  %v5331_v0 = vld [vmem:[#allocation129_spill] sm:$0xff] }
 0x184   :  { %1063 = vmatprep.subr.mxu0 %v5270_v61  ;;  %1134 = vmatprep.subr.mxu1 %v5271_v19  ;;  %v5332_v61 = vld [vmem:[#allocation130_spill] sm:$0xff]  ;;  %v5333_v19 = vld [vmem:[#allocation131_spill] sm:$0xff] }
 0x185   :  { %1064 = vmatpush1.msra.mxu0 %v5272_v12  ;;  %1135 = vmatpush1.msra.mxu1 %v5273_v62  ;;  %v5334_v12 = vld [vmem:[#allocation132_spill] sm:$0xff]  ;;  %v5335_v62 = vld [vmem:[#allocation133_spill] sm:$0xff] }
 0x186   :  { %1065 = vmatprep.subr.mxu0 %v5274_v5  ;;  %1136 = vmatprep.subr.mxu1 %v5275_v8  ;;  %v5336_v5 = vld [vmem:[#allocation134_spill] sm:$0xff]  ;;  %v5337_v8 = vld [vmem:[#allocation135_spill] sm:$0xff] }
 0x187   :  { %1066 = vmatpush1.msra.mxu0 %v5276_v20  ;;  %1137 = vmatpush1.msra.mxu1 %v5277_v21  ;;  %v5338_v20 = vld [vmem:[#allocation136_spill] sm:$0xff]  ;;  %v5339_v21 = vld [vmem:[#allocation137_spill] sm:$0xff] }
 0x188   :  { %1067 = vmatprep.subr.mxu0 %v5278_v22  ;;  %1138 = vmatprep.subr.mxu1 %v5279_v23  ;;  %v5340_v22 = vld [vmem:[#allocation138_spill] sm:$0xff]  ;;  %v5341_v23 = vld [vmem:[#allocation139_spill] sm:$0xff] }
 0x189   :  { %1068 = vmatpush1.msra.mxu0 %v5280_v24  ;;  %1139 = vmatpush1.msra.mxu1 %v5281_v25  ;;  %v5342_v24 = vld [vmem:[#allocation140_spill] sm:$0xff]  ;;  %v5343_v25 = vld [vmem:[#allocation141_spill] sm:$0xff] }
 0x18a   :  { %1069 = vmatprep.subr.mxu0 %v5282_v26  ;;  %1140 = vmatprep.subr.mxu1 %v5283_v27  ;;  %v5344_v26 = vld [vmem:[#allocation142_spill] sm:$0xff]  ;;  %v5345_v27 = vld [vmem:[#allocation143_spill] sm:$0xff] }
 0x18b   :  { %1070 = vmatpush1.msra.mxu0 %v5284_v28  ;;  %1141 = vmatpush1.msra.mxu1 %v5285_v29  ;;  %v5346_v28 = vld [vmem:[#allocation144_spill] sm:$0xff]  ;;  %v5347_v29 = vld [vmem:[#allocation145_spill] sm:$0xff] }
 0x18c   :  { %1071 = vmatprep.subr.mxu0 %v5286_v30  ;;  %1142 = vmatprep.subr.mxu1 %v5287_v31  ;;  %v5348_v30 = vld [vmem:[#allocation146_spill] sm:$0xff]  ;;  %v5349_v31 = vld [vmem:[#allocation147_spill] sm:$0xff] }
 0x18d   :  { %1072 = vmatpush1.msra.mxu0 %v5288_v32  ;;  %1143 = vmatpush1.msra.mxu1 %v5289_v33  ;;  %v5350_v32 = vld [vmem:[#allocation148_spill] sm:$0xff]  ;;  %v5351_v33 = vld [vmem:[#allocation149_spill] sm:$0xff] }
 0x18e   :  { %1073 = vmatprep.subr.mxu0 %v5290_v34  ;;  %1144 = vmatprep.subr.mxu1 %v5291_v35  ;;  %v5352_v34 = vld [vmem:[#allocation150_spill] sm:$0xff]  ;;  %v5353_v35 = vld [vmem:[#allocation151_spill] sm:$0xff] }
 0x18f   :  { %1074 = vmatpush1.msra.mxu0 %v5292_v36  ;;  %1145 = vmatpush1.msra.mxu1 %v5293_v37  ;;  %v5354_v36 = vld [vmem:[#allocation152_spill] sm:$0xff]  ;;  %v5355_v37 = vld [vmem:[#allocation153_spill] sm:$0xff] }
 0x190   :  { %1075 = vmatprep.subr.mxu0 %v5294_v38  ;;  %1146 = vmatprep.subr.mxu1 %v5295_v39  ;;  %v5356_v38 = vld [vmem:[#allocation154_spill] sm:$0xff]  ;;  %v5357_v39 = vld [vmem:[#allocation155_spill] sm:$0xff] }
 0x191   :  { %1076 = vmatpush1.msra.mxu0 %v5296_v40  ;;  %1147 = vmatpush1.msra.mxu1 %v5297_v41  ;;  %v5358_v40 = vld [vmem:[#allocation156_spill] sm:$0xff]  ;;  %v5359_v41 = vld [vmem:[#allocation157_spill] sm:$0xff] }
 0x192   :  { %1077 = vmatprep.subr.mxu0 %v5298_v42  ;;  %1148 = vmatprep.subr.mxu1 %v5299_v44  ;;  %v5360_v42 = vld [vmem:[#allocation158_spill] sm:$0xff]  ;;  %v5361_v44 = vld [vmem:[#allocation159_spill] sm:$0xff] }
 0x193   :  { %1078 = vmatpush1.msra.mxu0 %v5300_v45  ;;  %1149 = vmatpush1.msra.mxu1 %v5301_v47  ;;  %v5362_v45 = vld [vmem:[#allocation160_spill] sm:$0xff]  ;;  %v5363_v47 = vld [vmem:[#allocation161_spill] sm:$0xff] }
 0x194   :  { %1079 = vmatprep.subr.mxu0 %v5302_v48  ;;  %1150 = vmatprep.subr.mxu1 %v5303_v49  ;;  %v5364_v48 = vld [vmem:[#allocation162_spill] sm:$0xff]  ;;  %v5365_v49 = vld [vmem:[#allocation163_spill] sm:$0xff] }
 0x195   :  { %1080 = vmatpush2.msra.mxu0 %v5304_v50  ;;  %1151 = vmatpush2.msra.mxu1 %v5305_v51  ;;  %v3839_v50 = vld [vmem:[#allocation5 + $0x1e8] sm:$0xff]  ;;  %v3842_v51 = vld [vmem:[#allocation5 + $0x1f8] sm:$0xff] }
 0x196   :  { %1081 = vmatprep.subr.mxu0 %v5306_v52  ;;  %1152 = vmatprep.subr.mxu1 %v5307_v53  ;;  %v519_v52 = vld [vmem:[%s4723_s5] sm:$0xf]  ;;  %v5366_v53 = vld [vmem:[#allocation164_spill] sm:$0xff]  ;;  %s2925_s5 = smov [#allocation8]  }
 0x197   :  { %1082 = vmatpush2.msra.mxu0 %v5308_v54  ;;  %1153 = vmatpush2.msra.mxu1 %v5309_v56  ;;  %v5367_v54 = vsub.s32 0, %v5366_v53  ;;  %s2228_s23 = sshll.u32 %s2925_s5, 4  ;;  %s2229_s23 = int_to_ptr.vmem [resolvable:$true] %s2228_s23 }
 0x198   :  { %1083 = vmatprep.subr.mxu0 %v5310_v57  ;;  %1154 = vmatprep.subr.mxu1 %v5311_v58  ;;  %v5369_v57 = vsub.s32 1, %v5366_v53  ;;  %s2893_s24 = scalar_lea.vmem %s2229_s23, 128  ;;  %p2898_p2 = scmp.lt.s32.totalorder %s2229_s23, %s2229_s23 }
 0x199   :  { %1084 = vmatpush2.msra.mxu0 %v5312_v59  ;;  %1155 = vmatpush2.msra.mxu1 %v5313_v60  ;;  %v3850_v56 = vrot.slane %v519_v52, %v5367_v54  ;;  %p2894_p1 = scmp.ne.s32.totalorder %s2229_s23, %s2893_s24  ;;  %p2899_p3 = scmp.lt.s32.totalorder %s2893_s24, %s2893_s24 }
 0x19a   :  { %1085 = vmatprep.subr.mxu0 %v5314_v7  ;;  %1156 = vmatprep.subr.mxu1 %v5315_v1  ;;  %v3854_v58 = vrot.slane %v519_v52, %v5369_v57 }
 0x19b   :  { %1086 = vmatpush2.msra.mxu0 %v5316_v10  ;;  %1157 = vmatpush2.msra.mxu1 %v5317_v4  ;;  %5368 = vst [vmem:[#allocation12_spill] sm:$0xff] %v3850_v56  ;;  %p2900_p4 = por %p2899_p3, %p2898_p2 }
 0x19c   :  { %1087 = vmatprep.subr.mxu0 %v5318_v13  ;;  %1158 = vmatprep.subr.mxu1 %v5319_v9  ;;  %5370 = vst [vmem:[#allocation13_spill] sm:$0xff] %v3854_v58  ;;  %v5371_v9 = vsub.s32 3, %v5366_v53 }
 0x19d   :  { %1088 = vmatpush2.msra.mxu0 %v5320_v6  ;;  %1159 = vmatpush2.msra.mxu1 %v5321_v11  ;;  %p2901_p5 = pnand %p2900_p4, %p2894_p1 }
 0x19e   :  { %1089 = vmatprep.subr.mxu0 %v5322_v3  ;;  %1160 = vmatprep.subr.mxu1 %v5323_v2  ;;  %v3860_v6 = vrot.slane %v519_v52, %v5371_v9  ;;  %v5373_v2 = vsub.s32 2, %v5366_v53  ;;  %v3901_v9 = vld [vmem:[#allocation5 + $0x1a8] sm:$0xff] }
 0x19f   :  { %1090 = vmatpush2.msra.mxu0 %v5324_v63  ;;  %1161 = vmatpush2.msra.mxu1 %v5325_v16 }
 0x1a0   :  { %1091 = vmatprep.subr.mxu0 %v5326_v18  ;;  %1162 = vmatprep.subr.mxu1 %v5327_v15  ;;  %5372 = vst [vmem:[#allocation14_spill] sm:$0xff] %v3860_v6  ;;  %v3865_v63 = vrot.slane %v519_v52, %v5373_v2  ;;  %v3910_v2 = vld [vmem:[#allocation5 + $0x1b0] sm:$0xff] }
 0x1a1   :  { %1092 = vmatpush2.msra.mxu0 %v5328_v17  ;;  %1163 = vmatpush2.msra.mxu1 %v5329_v14 }
 0x1a2   :  { %1093 = vmatprep.subr.mxu0 %v5330_v46  ;;  %1164 = vmatprep.subr.mxu1 %v5331_v0  ;;  %5374 = vst [vmem:[#allocation15_spill] sm:$0xff] %v3865_v63 }
 0x1a3   :  { %1094 = vmatpush2.msra.mxu0 %v5332_v61  ;;  %1165 = vmatpush2.msra.mxu1 %v5333_v19 }
 0x1a4   :  { %1095 = vmatprep.subr.mxu0 %v5334_v12  ;;  %1166 = vmatprep.subr.mxu1 %v5335_v62  ;;  %v5375_v12 = vld [vmem:[#allocation165_spill] sm:$0xff] }
 0x1a5   :  { %1096 = vmatpush2.msra.mxu0 %v5336_v5  ;;  %1167 = vmatpush2.msra.mxu1 %v5337_v8 }
 0x1a6   :  { %1097 = vmatprep.subr.mxu0 %v5338_v20  ;;  %1168 = vmatprep.subr.mxu1 %v5339_v21 }
 0x1a7   :  { %1098 = vmatpush2.msra.mxu0 %v5340_v22  ;;  %1169 = vmatpush2.msra.mxu1 %v5341_v23  ;;  %v5376_v23 = vld [vmem:[#allocation166_spill] sm:$0xff] }
 0x1a8   :  { %1099 = vmatprep.subr.mxu0 %v5342_v24  ;;  %1170 = vmatprep.subr.mxu1 %v5343_v25 }
 0x1a9   :  { %1100 = vmatpush2.msra.mxu0 %v5344_v26  ;;  %1171 = vmatpush2.msra.mxu1 %v5345_v27 }
 0x1aa   :  { %1101 = vmatprep.subr.mxu0 %v5346_v28  ;;  %1172 = vmatprep.subr.mxu1 %v5347_v29 }
 0x1ab   :  { %1102 = vmatpush2.msra.mxu0 %v5348_v30  ;;  %1173 = vmatpush2.msra.mxu1 %v5349_v31  ;;  %v5377_v31 = vld [vmem:[#allocation169_spill] sm:$0xff] }
 0x1ac   :  { %1103 = vmatprep.subr.mxu0 %v5350_v32  ;;  %1174 = vmatprep.subr.mxu1 %v5351_v33  ;;  %v5378_v33 = vld [vmem:[#allocation167_spill] sm:$0xff] }
 0x1ad   :  { %1104 = vmatpush2.msra.mxu0 %v5352_v34  ;;  %1175 = vmatpush2.msra.mxu1 %v5353_v35 }
 0x1ae   :  { %1105 = vmatprep.subr.mxu0 %v5354_v36  ;;  %1176 = vmatprep.subr.mxu1 %v5355_v37 }
 0x1af   :  { %1106 = vmatpush2.msra.mxu0 %v5356_v38  ;;  %1177 = vmatpush2.msra.mxu1 %v5357_v39 }
 0x1b0   :  { %1107 = vmatprep.subr.mxu0 %v5358_v40  ;;  %1178 = vmatprep.subr.mxu1 %v5359_v41 }
 0x1b1   :  { %1108 = vmatpush2.msra.mxu0 %v5360_v42  ;;  %1179 = vmatpush2.msra.mxu1 %v5361_v44 }
 0x1b2   :  { %1109 = vmatprep.subr.mxu0 %v5362_v45  ;;  %1180 = vmatprep.subr.mxu1 %v5363_v47 }
 0x1b3   :  { %1110 = vmatpush2.msra.mxu0 %v5364_v48  ;;  %1181 = vmatpush2.msra.mxu1 %v5365_v49 }
 0x1b4   :  { %1213 = vmatprep.subr.mxu0 %v3839_v50  ;;  %1284 = vmatprep.subr.mxu1 %v3842_v51 }
 0x212   :  { %v777_v59 = vpop.f32.mrf.mxu0  ;;  %v848_v4 = vpop.f32.mrf.mxu1 }
 0x213   :  { %v778_v60 = vadd.f32 %v777_v59, %v3850_v56  ;;  %v849_v15 = vadd.f32 %v848_v4, %v3865_v63  ;;  %v3895_v4 = vld [vmem:[#allocation5 + $0x1c0] sm:$0xff] }
 0x214   :  { %v779_v7 = vpop.f32.mrf.mxu0  ;;  %v850_v11 = vpop.f32.mrf.mxu1 }
 0x215   :  { %v2255_v1 = vmul.f32 -1.442695, %v778_v60  ;;  %v780_v10 = vadd.f32 %v779_v7, %v3854_v58  ;;  %v851_v3 = vadd.f32 %v850_v11, %v3860_v6  ;;  %v3883_v7 = vld [vmem:[#allocation5 + $0x1e0] sm:$0xff]  ;;  %v3904_v11 = vld [vmem:[#allocation5 + $0x1b8] sm:$0xff] }
 0x217   :  { %2305 = vpow2.f32 %v2255_v1  ;;  %v2256_v13 = vmul.f32 -1.442695, %v780_v10  ;;  %v2257_v16 = vmul.f32 -1.442695, %v851_v3  ;;  %v3886_v1 = vld [vmem:[#allocation5 + $0x1f0] sm:$0xff]  ;;  %v3892_v10 = vld [vmem:[#allocation5 + $0x1d8] sm:$0xff] }
 0x218   :  { %v3907_v3 = vld [vmem:[#allocation5 + $0x1a0] sm:$0xff] }
 0x219   :  { %2307 = vpow2.f32 %v2256_v13  ;;  %v3898_v13 = vld [vmem:[#allocation5 + $0x1d0] sm:$0xff] }
 0x21a   :  { %2309 = vpow2.f32 %v2257_v16  ;;  %v3913_v16 = vld [vmem:[#allocation5 + $0x188] sm:$0xff] }
 0x224   :  { %v2306_v18 = vpop.eup %2305 }
 0x225   :  { %v856_v17 = vadd.f32 1.0, %v2306_v18  ;;  %v3916_v18 = vld [vmem:[#allocation5 + $0x198] sm:$0xff] }
 0x226   :  { %v2308_v14 = vpop.eup %2307 }
 0x227   :  { %2311 = vrcp.f32 %v856_v17  ;;  %v862_v46 = vadd.f32 1.0, %v2308_v14  ;;  %v2310_v0 = vpop.eup %2309  ;;  %v3922_v17 = vld [vmem:[#allocation5 + $0x190] sm:$0xff]  ;;  %v3925_v14 = vld [vmem:[#allocation5 + $0x168] sm:$0xff] }
 0x228   :  { %2313 = vtanh.f32 %v849_v15  ;;  %v869_v8 = vadd.f32 1.0, %v2310_v0  ;;  %v3919_v15 = vld [vmem:[#allocation5 + $0x180] sm:$0xff] }
 0x229   :  { %2315 = vrcp.f32 %v862_v46  ;;  %v3928_v46 = vld [vmem:[#allocation5 + $0x178] sm:$0xff]  ;;  %v3931_v0 = vld [vmem:[#allocation5 + $0x160] sm:$0xff] }
 0x233   :  { %v943_v61 = vpop.f32.mrf.mxu0  ;;  %v1014_v27 = vpop.f32.mrf.mxu1 }
 0x234   :  { %v2312_v19 = vpop.eup %2311  ;;  %v1019_v62 = vadd.f32 %v943_v61, %v5375_v12  ;;  %v1021_v34 = vadd.f32 %v1014_v27, %v5378_v33  ;;  %v3934_v61 = vld [vmem:[#allocation5 + $0x170] sm:$0xff]  ;;  %v3940_v12 = vld [vmem:[#allocation5 + $0x158] sm:$0xff]  ;;  %v3973_v27 = vld [vmem:[#allocation5 + $0xe8] sm:$0xff] }
 0x235   :  { %v2314_v5 = vpop.eup %2313  ;;  %v945_v20 = vpop.f32.mrf.mxu0  ;;  %v3988_v33 = vld [vmem:[#allocation5 + $0xd8] sm:$0xff] }
 0x236   :  { %v2316_v21 = vpop.eup %2315  ;;  %v2258_v22 = vmul.f32 -1.442695, %v1019_v62  ;;  %v1020_v24 = vadd.f32 %v945_v20, %v5376_v23  ;;  %v873_v26 = vmul.f32 %v2314_v5, %v2312_v19  ;;  %v1016_v30 = vpop.f32.mrf.mxu1  ;;  %v3937_v19 = vld [vmem:[#allocation5 + $0x148] sm:$0xff]  ;;  %v3943_v62 = vld [vmem:[#allocation5 + $0x140] sm:$0xff]  ;;  %v3946_v5 = vld [vmem:[#allocation5 + $0x150] sm:$0xff] }
 0x237   :  { %v872_v25 = vmul.f32 0.0, %v2316_v21  ;;  %v1022_v32 = vadd.f32 %v1016_v30, %v5377_v31  ;;  %v3952_v20 = vld [vmem:[#allocation5 + $0x138] sm:$0xff]  ;;  %v3955_v21 = vld [vmem:[#allocation5 + $0x120] sm:$0xff]  ;;  %v3961_v23 = vld [vmem:[#allocation5 + $0x108] sm:$0xff] }
 0x238   :  { %2317 = vpow2.f32 %v2258_v22  ;;  %v2259_v28 = vmul.f32 -1.442695, %v1020_v24  ;;  %v3958_v22 = vld [vmem:[#allocation5 + $0x130] sm:$0xff]  ;;  %v3964_v24 = vld [vmem:[#allocation5 + $0x118] sm:$0xff]  ;;  %v3979_v30 = vld [vmem:[#allocation5 + $0xe0] sm:$0xff] }
 0x239   :  { %v3870_v29 = vadd.f32 %v873_v26, %v872_v25  ;;  %2319 = vrcp.f32 %v869_v8  ;;  %v2260_v35 = vmul.f32 -1.442695, %v1022_v32  ;;  %v3949_v8 = vld [vmem:[#allocation5 + $0x128] sm:$0xff]  ;;  %v3967_v25 = vld [vmem:[#allocation5 + $0x100] sm:$0xff]  ;;  %v3970_v26 = vld [vmem:[#allocation5 + $0x110] sm:$0xff] }
 0x23a   :  { %2321 = vpow2.f32 %v2259_v28  ;;  %v3976_v28 = vld [vmem:[#allocation5 + $0xf8] sm:$0xff]  ;;  %v3982_v31 = vld [vmem:[#allocation5 + $0xf0] sm:$0xff]  ;;  %v3985_v32 = vld [vmem:[#allocation5 + $0xc8] sm:$0xff] }
 0x23b   :  { %2323 = vtanh.f32 %v3870_v29 }
 0x23c   :  { %2325 = vtanh.f32 %v1021_v34  ;;  %v3991_v34 = vld [vmem:[#allocation5 + $0xc0] sm:$0xff] }
 0x23d   :  { %2327 = vpow2.f32 %v2260_v35  ;;  %v3994_v35 = vld [vmem:[#allocation5 + $0xd0] sm:$0xff] }
 0x245   :  { %v2318_v36 = vpop.eup %2317 }
 0x246   :  { %v2320_v37 = vpop.eup %2319  ;;  %v1026_v38 = vadd.f32 1.0, %v2318_v36  ;;  %v3997_v36 = vld [vmem:[#allocation5 + $0xa8] sm:$0xff] }
 0x247   :  { %v2322_v39 = vpop.eup %2321 }
 0x248   :  { %v2324_v40 = vpop.eup %2323  ;;  %2329 = vrcp.f32 %v1026_v38  ;;  %v1032_v41 = vadd.f32 1.0, %v2322_v39  ;;  %v4003_v38 = vld [vmem:[#allocation5 + $0xa0] sm:$0xff]  ;;  %v4006_v39 = vld [vmem:[#allocation5 + $0xb0] sm:$0xff] }
 0x249   :  { %v876_v42 = vmul.f32 %v2324_v40, %v2320_v37  ;;  %v2326_v44 = vpop.eup %2325  ;;  %v4000_v37 = vld [vmem:[#allocation5 + $0xb8] sm:$0xff]  ;;  %v4009_v40 = vld [vmem:[#allocation5 + $0x88] sm:$0xff] }
 0x24a   :  { %2331 = vrcp.f32 %v1032_v41  ;;  %v2328_v45 = vpop.eup %2327  ;;  %5379 = vst [vmem:[#allocation16_spill] sm:$0xff] %v4009_v40  ;;  %v4012_v41 = vld [vmem:[#allocation5 + $0x98] sm:$0xff] }
 0x24b   :  { %1111 = vmatprep.mubr.f32.mxu0 %v876_v42  ;;  %1182 = vmatprep.mubr.f32.mxu1 %v876_v42  ;;  %v1039_v52 = vadd.f32 1.0, %v2328_v45  ;;  %5380 = vst [vmem:[#allocation17_spill] sm:$0xff] %v4012_v41  ;;  %v4015_v42 = vld [vmem:[#allocation5 + $0x80] sm:$0xff]  ;;  %v4021_v45 = vld [vmem:[#allocation5 + $0x68] sm:$0xff] }
 0x24c   :  { %5381 = vst [vmem:[#allocation18_spill] sm:$0xff] %v4015_v42  ;;  %5383 = vst [vmem:[#allocation20_spill] sm:$0xff] %v4021_v45 }
 0x24d   :  { %2333 = vrcp.f32 %v1039_v52  ;;  %v4033_v52 = vld [vmem:[#allocation5 + $0x48] sm:$0xff] }
 0x24e   :  { %5387 = vst [vmem:[#allocation24_spill] sm:$0xff] %v4033_v52 }
 0x255   :  { %v2330_v47 = vpop.eup %2329 }
 0x256   :  { %v1043_v48 = vmul.f32 %v2330_v47, %v2326_v44  ;;  %v4018_v44 = vld [vmem:[#allocation5 + $0x90] sm:$0xff]  ;;  %v4024_v47 = vld [vmem:[#allocation5 + $0x78] sm:$0xff] }
 0x257   :  { %v2332_v49 = vpop.eup %2331  ;;  %5382 = vst [vmem:[#allocation19_spill] sm:$0xff] %v4018_v44  ;;  %5384 = vst [vmem:[#allocation21_spill] sm:$0xff] %v4024_v47 }
 0x258   :  { %v1042_v53 = vmul.f32 %v2332_v49, %v3638_v55  ;;  %v3889_v55 = vld [vmem:[#allocation5 + $0x1c8] sm:$0xff]  ;;  %v4030_v49 = vld [vmem:[#allocation5 + $0x70] sm:$0xff] }
 0x259   :  { %5386 = vst [vmem:[#allocation23_spill] sm:$0xff] %v4030_v49 }
 0x25a   :  { %v3876_v54 = vadd.f32 %v1043_v48, %v1042_v53  ;;  %v2334_v57 = vpop.eup %2333  ;;  %v4027_v48 = vld [vmem:[#allocation5 + $0x60] sm:$0xff]  ;;  %v4036_v53 = vld [vmem:[#allocation5 + $0x58] sm:$0xff] }
 0x25b   :  { %5385 = vst [vmem:[#allocation22_spill] sm:$0xff] %v4027_v48  ;;  %5388 = vst [vmem:[#allocation25_spill] sm:$0xff] %v4036_v53 }
 0x25c   :  { %2335 = vtanh.f32 %v3876_v54 }
 0x269   :  { %v2336_v59 = vpop.eup %2335 }
 0x26a   :  { %v3879_v60 = vmul.f32 %v2336_v59, %v2334_v57  ;;  %v4039_v57 = vld [vmem:[#allocation5 + $0x40] sm:$0xff]  ;;  %v4042_v59 = vld [vmem:[#allocation5 + $0x50] sm:$0xff] }
 0x26b   :  { %5389 = vst [vmem:[#allocation26_spill] sm:$0xff] %v4039_v57  ;;  %5390 = vst [vmem:[#allocation27_spill] sm:$0xff] %v4042_v59 }
 0x26c   :  { %1112 = vmatmul.mubr.f32.vlgmr.msra.gmra.mxu0 %v3879_v60  ;;  %1183 = vmatmul.mubr.f32.vlgmr.msra.gmra.mxu1 %v3879_v60 }
 0x26d   :  { %1214 = vmatpush1.msra.mxu0 %v3883_v7  ;;  %1285 = vmatpush1.msra.mxu1 %v3886_v1 }
 0x26e   :  { %1215 = vmatprep.subr.mxu0 %v3889_v55  ;;  %1286 = vmatprep.subr.mxu1 %v3892_v10 }
 0x26f   :  { %1216 = vmatpush1.msra.mxu0 %v3895_v4  ;;  %1287 = vmatpush1.msra.mxu1 %v3898_v13 }
 0x270   :  { %1217 = vmatprep.subr.mxu0 %v3901_v9  ;;  %1288 = vmatprep.subr.mxu1 %v3904_v11 }
 0x271   :  { %1218 = vmatpush1.msra.mxu0 %v3907_v3  ;;  %1289 = vmatpush1.msra.mxu1 %v3910_v2 }
 0x272   :  { %1219 = vmatprep.subr.mxu0 %v3913_v16  ;;  %1290 = vmatprep.subr.mxu1 %v3916_v18 }
 0x273   :  { %1220 = vmatpush1.msra.mxu0 %v3919_v15  ;;  %1291 = vmatpush1.msra.mxu1 %v3922_v17 }
 0x274   :  { %1221 = vmatprep.subr.mxu0 %v3925_v14  ;;  %1292 = vmatprep.subr.mxu1 %v3928_v46 }
 0x275   :  { %1222 = vmatpush1.msra.mxu0 %v3931_v0  ;;  %1293 = vmatpush1.msra.mxu1 %v3934_v61 }
 0x276   :  { %1223 = vmatprep.subr.mxu0 %v3937_v19  ;;  %1294 = vmatprep.subr.mxu1 %v3940_v12 }
 0x277   :  { %1224 = vmatpush1.msra.mxu0 %v3943_v62  ;;  %1295 = vmatpush1.msra.mxu1 %v3946_v5 }
 0x278   :  { %1225 = vmatprep.subr.mxu0 %v3949_v8  ;;  %1296 = vmatprep.subr.mxu1 %v3952_v20 }
 0x279   :  { %1226 = vmatpush1.msra.mxu0 %v3955_v21  ;;  %1297 = vmatpush1.msra.mxu1 %v3958_v22 }
 0x27a   :  { %1227 = vmatprep.subr.mxu0 %v3961_v23  ;;  %1298 = vmatprep.subr.mxu1 %v3964_v24 }
 0x27b   :  { %1228 = vmatpush1.msra.mxu0 %v3967_v25  ;;  %1299 = vmatpush1.msra.mxu1 %v3970_v26 }
 0x27c   :  { %1229 = vmatprep.subr.mxu0 %v3973_v27  ;;  %1300 = vmatprep.subr.mxu1 %v3976_v28 }
 0x27d   :  { %1230 = vmatpush1.msra.mxu0 %v3979_v30  ;;  %1301 = vmatpush1.msra.mxu1 %v3982_v31 }
 0x27e   :  { %1231 = vmatprep.subr.mxu0 %v3985_v32  ;;  %1302 = vmatprep.subr.mxu1 %v3988_v33 }
 0x27f   :  { %1232 = vmatpush1.msra.mxu0 %v3991_v34  ;;  %1303 = vmatpush1.msra.mxu1 %v3994_v35 }
 0x280   :  { %1233 = vmatprep.subr.mxu0 %v3997_v36  ;;  %1304 = vmatprep.subr.mxu1 %v4000_v37 }
 0x281   :  { %1234 = vmatpush1.msra.mxu0 %v4003_v38  ;;  %1305 = vmatpush1.msra.mxu1 %v4006_v39 }
 0x282   :  { %1235 = vmatprep.subr.mxu0 %v4009_v40  ;;  %1306 = vmatprep.subr.mxu1 %v4012_v41 }
 0x283   :  { %1236 = vmatpush1.msra.mxu0 %v4015_v42  ;;  %1307 = vmatpush1.msra.mxu1 %v4018_v44 }
 0x284   :  { %1237 = vmatprep.subr.mxu0 %v4021_v45  ;;  %1308 = vmatprep.subr.mxu1 %v4024_v47 }
 0x285   :  { %1238 = vmatpush1.msra.mxu0 %v4027_v48  ;;  %1309 = vmatpush1.msra.mxu1 %v4030_v49  ;;  %v4045_v48 = vld [vmem:[#allocation5 + $0x28] sm:$0xff]  ;;  %v4048_v49 = vld [vmem:[#allocation5 + $0x38] sm:$0xff] }
 0x286   :  { %1239 = vmatprep.subr.mxu0 %v4033_v52  ;;  %1310 = vmatprep.subr.mxu1 %v4036_v53  ;;  %5391 = vst [vmem:[#allocation28_spill] sm:$0xff] %v4045_v48  ;;  %5392 = vst [vmem:[#allocation29_spill] sm:$0xff] %v4048_v49  ;;  %v4051_v52 = vld [vmem:[#allocation5 + $0x20] sm:$0xff]  ;;  %v4054_v53 = vld [vmem:[#allocation5 + $0x30] sm:$0xff] }
 0x287   :  { %1240 = vmatpush1.msra.mxu0 %v4039_v57  ;;  %1311 = vmatpush1.msra.mxu1 %v4042_v59  ;;  %5393 = vst [vmem:[#allocation30_spill] sm:$0xff] %v4051_v52  ;;  %5394 = vst [vmem:[#allocation31_spill] sm:$0xff] %v4054_v53  ;;  %v4057_v57 = vld [vmem:[#allocation5 + $0x8] sm:$0xff]  ;;  %v4060_v59 = vld [vmem:[#allocation5 + $0x18] sm:$0xff] }
 0x288   :  { %1241 = vmatprep.subr.mxu0 %v4045_v48  ;;  %1312 = vmatprep.subr.mxu1 %v4048_v49  ;;  %5395 = vst [vmem:[#allocation32_spill] sm:$0xff] %v4057_v57  ;;  %5396 = vst [vmem:[#allocation33_spill] sm:$0xff] %v4060_v59  ;;  %v4063_v48 = vld [vmem:[#allocation5] sm:$0xff]  ;;  %v4067_v49 = vld [vmem:[#allocation5 + $0x10] sm:$0xff] }
 0x289   :  { %1242 = vmatpush1.msra.mxu0 %v4051_v52  ;;  %1313 = vmatpush1.msra.mxu1 %v4054_v53  ;;  %5397 = vst [vmem:[#allocation34_spill] sm:$0xff] %v4063_v48  ;;  %5398 = vst [vmem:[#allocation35_spill] sm:$0xff] %v4067_v49  ;;  %v4082_v53 = vld [vmem:[#allocation7 + $0x1f0] sm:$0xff] }
 0x28a   :  { %1243 = vmatprep.subr.mxu0 %v4057_v57  ;;  %1314 = vmatprep.subr.mxu1 %v4060_v59  ;;  %v4073_v57 = vld [vmem:[#allocation7 + $0x1e8] sm:$0xff]  ;;  %v4076_v59 = vld [vmem:[#allocation7 + $0x1f8] sm:$0xff]  ;;  %5402 = vst [vmem:[#allocation39_spill] sm:$0xff] %v4082_v53 }
 0x28b   :  { %1244 = vmatpush1.msra.mxu0 %v4063_v48  ;;  %1277 = vmatprep.mubr.f32.mxu0 %v5236_v43  ;;  %5399 = vst [vmem:[#allocation36_spill] sm:$0xff] %v4073_v57  ;;  %5400 = vst [vmem:[#allocation37_spill] sm:$0xff] %v4076_v59  ;;  %v4079_v48 = vld [vmem:[#allocation7 + $0x1e0] sm:$0xff] }
 0x28c   :  { %1315 = vmatpush1.msra.mxu1 %v4067_v49  ;;  %1348 = vmatprep.mubr.f32.mxu1 %v5236_v43  ;;  %5401 = vst [vmem:[#allocation38_spill] sm:$0xff] %v4079_v48  ;;  %v4085_v49 = vld [vmem:[#allocation7 + $0x1c8] sm:$0xff] }
 0x28d   :  { %1278 = vmatmul.mubr.f32.vlgmr.msra.gmra.mxu0 %v3879_v60  ;;  %1349 = vmatmul.mubr.f32.vlgmr.msra.gmra.mxu1 %v3879_v60  ;;  %5403 = vst [vmem:[#allocation40_spill] sm:$0xff] %v4085_v49  ;;  %v4088_v60 = vld [vmem:[#allocation7 + $0x1d8] sm:$0xff] }
 0x28e   :  { %1383 = vmatprep.subr.mxu0 %v4073_v57  ;;  %1454 = vmatprep.subr.mxu1 %v4076_v59  ;;  %5404 = vst [vmem:[#allocation41_spill] sm:$0xff] %v4088_v60  ;;  %v4091_v57 = vld [vmem:[#allocation7 + $0x1c0] sm:$0xff]  ;;  %v4094_v59 = vld [vmem:[#allocation7 + $0x1d0] sm:$0xff] }
 0x28f   :  { %1384 = vmatpush1.msra.mxu0 %v4079_v48  ;;  %1455 = vmatpush1.msra.mxu1 %v4082_v53  ;;  %5405 = vst [vmem:[#allocation42_spill] sm:$0xff] %v4091_v57  ;;  %5406 = vst [vmem:[#allocation43_spill] sm:$0xff] %v4094_v59  ;;  %v4097_v48 = vld [vmem:[#allocation7 + $0x1a8] sm:$0xff]  ;;  %v4100_v53 = vld [vmem:[#allocation7 + $0x1b8] sm:$0xff] }
 0x290   :  { %1385 = vmatprep.subr.mxu0 %v4085_v49  ;;  %1456 = vmatprep.subr.mxu1 %v4088_v60  ;;  %5407 = vst [vmem:[#allocation44_spill] sm:$0xff] %v4097_v48  ;;  %5408 = vst [vmem:[#allocation45_spill] sm:$0xff] %v4100_v53  ;;  %v4103_v49 = vld [vmem:[#allocation7 + $0x1a0] sm:$0xff]  ;;  %v4106_v60 = vld [vmem:[#allocation7 + $0x1b0] sm:$0xff] }
 0x291   :  { %1386 = vmatpush1.msra.mxu0 %v4091_v57  ;;  %1457 = vmatpush1.msra.mxu1 %v4094_v59  ;;  %5409 = vst [vmem:[#allocation46_spill] sm:$0xff] %v4103_v49  ;;  %5410 = vst [vmem:[#allocation47_spill] sm:$0xff] %v4106_v60  ;;  %v4109_v57 = vld [vmem:[#allocation7 + $0x188] sm:$0xff]  ;;  %v4112_v59 = vld [vmem:[#allocation7 + $0x198] sm:$0xff] }
 0x292   :  { %1387 = vmatprep.subr.mxu0 %v4097_v48  ;;  %1458 = vmatprep.subr.mxu1 %v4100_v53  ;;  %5411 = vst [vmem:[#allocation48_spill] sm:$0xff] %v4109_v57  ;;  %5412 = vst [vmem:[#allocation49_spill] sm:$0xff] %v4112_v59  ;;  %v4115_v48 = vld [vmem:[#allocation7 + $0x180] sm:$0xff]  ;;  %v4118_v53 = vld [vmem:[#allocation7 + $0x190] sm:$0xff] }
 0x293   :  { %1388 = vmatpush1.msra.mxu0 %v4103_v49  ;;  %1459 = vmatpush1.msra.mxu1 %v4106_v60  ;;  %5413 = vst [vmem:[#allocation50_spill] sm:$0xff] %v4115_v48  ;;  %5414 = vst [vmem:[#allocation51_spill] sm:$0xff] %v4118_v53  ;;  %v4121_v49 = vld [vmem:[#allocation7 + $0x168] sm:$0xff]  ;;  %v4124_v60 = vld [vmem:[#allocation7 + $0x178] sm:$0xff] }
 0x294   :  { %1389 = vmatprep.subr.mxu0 %v4109_v57  ;;  %1460 = vmatprep.subr.mxu1 %v4112_v59  ;;  %5415 = vst [vmem:[#allocation52_spill] sm:$0xff] %v4121_v49  ;;  %5416 = vst [vmem:[#allocation53_spill] sm:$0xff] %v4124_v60  ;;  %v4127_v57 = vld [vmem:[#allocation7 + $0x160] sm:$0xff]  ;;  %v4130_v59 = vld [vmem:[#allocation7 + $0x170] sm:$0xff] }
 0x295   :  { %1390 = vmatpush1.msra.mxu0 %v4115_v48  ;;  %1461 = vmatpush1.msra.mxu1 %v4118_v53  ;;  %5417 = vst [vmem:[#allocation54_spill] sm:$0xff] %v4127_v57  ;;  %5418 = vst [vmem:[#allocation55_spill] sm:$0xff] %v4130_v59  ;;  %v4133_v48 = vld [vmem:[#allocation7 + $0x148] sm:$0xff]  ;;  %v4136_v53 = vld [vmem:[#allocation7 + $0x158] sm:$0xff] }
 0x296   :  { %1391 = vmatprep.subr.mxu0 %v4121_v49  ;;  %1462 = vmatprep.subr.mxu1 %v4124_v60  ;;  %5419 = vst [vmem:[#allocation56_spill] sm:$0xff] %v4133_v48  ;;  %5420 = vst [vmem:[#allocation57_spill] sm:$0xff] %v4136_v53  ;;  %v4139_v49 = vld [vmem:[#allocation7 + $0x140] sm:$0xff]  ;;  %v4142_v60 = vld [vmem:[#allocation7 + $0x150] sm:$0xff] }
 0x297   :  { %1392 = vmatpush1.msra.mxu0 %v4127_v57  ;;  %1463 = vmatpush1.msra.mxu1 %v4130_v59  ;;  %5421 = vst [vmem:[#allocation58_spill] sm:$0xff] %v4139_v49  ;;  %5422 = vst [vmem:[#allocation59_spill] sm:$0xff] %v4142_v60  ;;  %v4145_v57 = vld [vmem:[#allocation7 + $0x128] sm:$0xff]  ;;  %v4148_v59 = vld [vmem:[#allocation7 + $0x138] sm:$0xff] }
 0x298   :  { %1393 = vmatprep.subr.mxu0 %v4133_v48  ;;  %1464 = vmatprep.subr.mxu1 %v4136_v53  ;;  %5423 = vst [vmem:[#allocation60_spill] sm:$0xff] %v4145_v57  ;;  %5424 = vst [vmem:[#allocation61_spill] sm:$0xff] %v4148_v59  ;;  %v4151_v48 = vld [vmem:[#allocation7 + $0x120] sm:$0xff]  ;;  %v4154_v53 = vld [vmem:[#allocation7 + $0x130] sm:$0xff] }
 0x299   :  { %1394 = vmatpush1.msra.mxu0 %v4139_v49  ;;  %1465 = vmatpush1.msra.mxu1 %v4142_v60  ;;  %5425 = vst [vmem:[#allocation62_spill] sm:$0xff] %v4151_v48  ;;  %5426 = vst [vmem:[#allocation63_spill] sm:$0xff] %v4154_v53  ;;  %v4157_v49 = vld [vmem:[#allocation7 + $0x108] sm:$0xff]  ;;  %v4160_v60 = vld [vmem:[#allocation7 + $0x118] sm:$0xff] }
 0x29a   :  { %1395 = vmatprep.subr.mxu0 %v4145_v57  ;;  %1466 = vmatprep.subr.mxu1 %v4148_v59  ;;  %5427 = vst [vmem:[#allocation64_spill] sm:$0xff] %v4157_v49  ;;  %5428 = vst [vmem:[#allocation65_spill] sm:$0xff] %v4160_v60  ;;  %v4163_v57 = vld [vmem:[#allocation7 + $0x100] sm:$0xff]  ;;  %v4166_v59 = vld [vmem:[#allocation7 + $0x110] sm:$0xff] }
 0x29b   :  { %1396 = vmatpush1.msra.mxu0 %v4151_v48  ;;  %1467 = vmatpush1.msra.mxu1 %v4154_v53  ;;  %5429 = vst [vmem:[#allocation66_spill] sm:$0xff] %v4163_v57  ;;  %5430 = vst [vmem:[#allocation67_spill] sm:$0xff] %v4166_v59  ;;  %v4169_v48 = vld [vmem:[#allocation7 + $0xe8] sm:$0xff]  ;;  %v4172_v53 = vld [vmem:[#allocation7 + $0xf8] sm:$0xff] }
 0x29c   :  { %1397 = vmatprep.subr.mxu0 %v4157_v49  ;;  %1468 = vmatprep.subr.mxu1 %v4160_v60  ;;  %5431 = vst [vmem:[#allocation68_spill] sm:$0xff] %v4169_v48  ;;  %5432 = vst [vmem:[#allocation69_spill] sm:$0xff] %v4172_v53  ;;  %v4175_v49 = vld [vmem:[#allocation7 + $0xe0] sm:$0xff]  ;;  %v4178_v60 = vld [vmem:[#allocation7 + $0xf0] sm:$0xff] }
 0x29d   :  { %1398 = vmatpush1.msra.mxu0 %v4163_v57  ;;  %1469 = vmatpush1.msra.mxu1 %v4166_v59  ;;  %5433 = vst [vmem:[#allocation70_spill] sm:$0xff] %v4175_v49  ;;  %5434 = vst [vmem:[#allocation71_spill] sm:$0xff] %v4178_v60  ;;  %v4181_v57 = vld [vmem:[#allocation7 + $0xc8] sm:$0xff]  ;;  %v4184_v59 = vld [vmem:[#allocation7 + $0xd8] sm:$0xff] }
 0x29e   :  { %1399 = vmatprep.subr.mxu0 %v4169_v48  ;;  %1470 = vmatprep.subr.mxu1 %v4172_v53  ;;  %5435 = vst [vmem:[#allocation72_spill] sm:$0xff] %v4181_v57  ;;  %5436 = vst [vmem:[#allocation73_spill] sm:$0xff] %v4184_v59  ;;  %v4187_v48 = vld [vmem:[#allocation7 + $0xc0] sm:$0xff]  ;;  %v4190_v53 = vld [vmem:[#allocation7 + $0xd0] sm:$0xff] }
 0x29f   :  { %1400 = vmatpush1.msra.mxu0 %v4175_v49  ;;  %1471 = vmatpush1.msra.mxu1 %v4178_v60  ;;  %5437 = vst [vmem:[#allocation74_spill] sm:$0xff] %v4187_v48  ;;  %5438 = vst [vmem:[#allocation75_spill] sm:$0xff] %v4190_v53  ;;  %v4193_v49 = vld [vmem:[#allocation7 + $0xa8] sm:$0xff]  ;;  %v4196_v60 = vld [vmem:[#allocation7 + $0xb8] sm:$0xff] }
 0x2a0   :  { %1401 = vmatprep.subr.mxu0 %v4181_v57  ;;  %1472 = vmatprep.subr.mxu1 %v4184_v59  ;;  %5439 = vst [vmem:[#allocation76_spill] sm:$0xff] %v4193_v49  ;;  %5440 = vst [vmem:[#allocation77_spill] sm:$0xff] %v4196_v60  ;;  %v4199_v57 = vld [vmem:[#allocation7 + $0xa0] sm:$0xff]  ;;  %v4202_v59 = vld [vmem:[#allocation7 + $0xb0] sm:$0xff] }
 0x2a1   :  { %1402 = vmatpush1.msra.mxu0 %v4187_v48  ;;  %1473 = vmatpush1.msra.mxu1 %v4190_v53  ;;  %5441 = vst [vmem:[#allocation78_spill] sm:$0xff] %v4199_v57  ;;  %5442 = vst [vmem:[#allocation79_spill] sm:$0xff] %v4202_v59  ;;  %v4205_v48 = vld [vmem:[#allocation7 + $0x88] sm:$0xff]  ;;  %v4208_v53 = vld [vmem:[#allocation7 + $0x98] sm:$0xff] }
 0x2a2   :  { %1403 = vmatprep.subr.mxu0 %v4193_v49  ;;  %1474 = vmatprep.subr.mxu1 %v4196_v60  ;;  %5443 = vst [vmem:[#allocation80_spill] sm:$0xff] %v4205_v48  ;;  %5444 = vst [vmem:[#allocation81_spill] sm:$0xff] %v4208_v53  ;;  %v4211_v49 = vld [vmem:[#allocation7 + $0x80] sm:$0xff]  ;;  %v4214_v60 = vld [vmem:[#allocation7 + $0x90] sm:$0xff] }
 0x2a3   :  { %1404 = vmatpush1.msra.mxu0 %v4199_v57  ;;  %1475 = vmatpush1.msra.mxu1 %v4202_v59  ;;  %5445 = vst [vmem:[#allocation82_spill] sm:$0xff] %v4211_v49  ;;  %5446 = vst [vmem:[#allocation83_spill] sm:$0xff] %v4214_v60  ;;  %v4217_v57 = vld [vmem:[#allocation7 + $0x68] sm:$0xff]  ;;  %v4220_v59 = vld [vmem:[#allocation7 + $0x78] sm:$0xff] }
 0x2a4   :  { %1405 = vmatprep.subr.mxu0 %v4205_v48  ;;  %1476 = vmatprep.subr.mxu1 %v4208_v53  ;;  %5447 = vst [vmem:[#allocation84_spill] sm:$0xff] %v4217_v57  ;;  %5448 = vst [vmem:[#allocation85_spill] sm:$0xff] %v4220_v59  ;;  %v4223_v48 = vld [vmem:[#allocation7 + $0x60] sm:$0xff]  ;;  %v4226_v53 = vld [vmem:[#allocation7 + $0x70] sm:$0xff] }
 0x2a5   :  { %1406 = vmatpush1.msra.mxu0 %v4211_v49  ;;  %1477 = vmatpush1.msra.mxu1 %v4214_v60  ;;  %5449 = vst [vmem:[#allocation86_spill] sm:$0xff] %v4223_v48  ;;  %5450 = vst [vmem:[#allocation87_spill] sm:$0xff] %v4226_v53  ;;  %v4229_v49 = vld [vmem:[#allocation7 + $0x48] sm:$0xff]  ;;  %v4232_v60 = vld [vmem:[#allocation7 + $0x58] sm:$0xff] }
 0x2a6   :  { %1407 = vmatprep.subr.mxu0 %v4217_v57  ;;  %1478 = vmatprep.subr.mxu1 %v4220_v59  ;;  %5451 = vst [vmem:[#allocation88_spill] sm:$0xff] %v4229_v49  ;;  %5452 = vst [vmem:[#allocation89_spill] sm:$0xff] %v4232_v60  ;;  %v4235_v57 = vld [vmem:[#allocation7 + $0x40] sm:$0xff]  ;;  %v4238_v59 = vld [vmem:[#allocation7 + $0x50] sm:$0xff] }
 0x2a7   :  { %1408 = vmatpush1.msra.mxu0 %v4223_v48  ;;  %1479 = vmatpush1.msra.mxu1 %v4226_v53  ;;  %5453 = vst [vmem:[#allocation90_spill] sm:$0xff] %v4235_v57  ;;  %5454 = vst [vmem:[#allocation91_spill] sm:$0xff] %v4238_v59  ;;  %v4241_v48 = vld [vmem:[#allocation7 + $0x28] sm:$0xff]  ;;  %v4244_v53 = vld [vmem:[#allocation7 + $0x38] sm:$0xff] }
 0x2a8   :  { %1409 = vmatprep.subr.mxu0 %v4229_v49  ;;  %1480 = vmatprep.subr.mxu1 %v4232_v60  ;;  %5455 = vst [vmem:[#allocation92_spill] sm:$0xff] %v4241_v48  ;;  %5456 = vst [vmem:[#allocation93_spill] sm:$0xff] %v4244_v53  ;;  %v4247_v49 = vld [vmem:[#allocation7 + $0x20] sm:$0xff]  ;;  %v4250_v60 = vld [vmem:[#allocation7 + $0x30] sm:$0xff] }
 0x2a9   :  { %1410 = vmatpush1.msra.mxu0 %v4235_v57  ;;  %1481 = vmatpush1.msra.mxu1 %v4238_v59  ;;  %5457 = vst [vmem:[#allocation94_spill] sm:$0xff] %v4247_v49  ;;  %5458 = vst [vmem:[#allocation95_spill] sm:$0xff] %v4250_v60  ;;  %v4253_v57 = vld [vmem:[#allocation7 + $0x8] sm:$0xff]  ;;  %v4256_v59 = vld [vmem:[#allocation7 + $0x18] sm:$0xff] }
 0x2aa   :  { %1411 = vmatprep.subr.mxu0 %v4241_v48  ;;  %1482 = vmatprep.subr.mxu1 %v4244_v53  ;;  %5459 = vst [vmem:[#allocation96_spill] sm:$0xff] %v4253_v57  ;;  %5460 = vst [vmem:[#allocation97_spill] sm:$0xff] %v4256_v59  ;;  %v4259_v48 = vld [vmem:[#allocation7] sm:$0xff]  ;;  %v4262_v53 = vld [vmem:[#allocation7 + $0x10] sm:$0xff] }
 0x2ab   :  { %1412 = vmatpush1.msra.mxu0 %v4247_v49  ;;  %1483 = vmatpush1.msra.mxu1 %v4250_v60  ;;  %5461 = vst [vmem:[#allocation98_spill] sm:$0xff] %v4259_v48  ;;  %5462 = vst [vmem:[#allocation99_spill] sm:$0xff] %v4262_v53  ;;  %v4265_v49 = vld [vmem:[#allocation7 + $0x3e8] sm:$0xff]  ;;  %v4268_v60 = vld [vmem:[#allocation7 + $0x3f8] sm:$0xff] }
 0x2ac   :  { %1413 = vmatprep.subr.mxu0 %v4253_v57  ;;  %1484 = vmatprep.subr.mxu1 %v4256_v59  ;;  %5463 = vst [vmem:[#allocation100_spill] sm:$0xff] %v4265_v49  ;;  %5464 = vst [vmem:[#allocation101_spill] sm:$0xff] %v4268_v60  ;;  %v4271_v57 = vld [vmem:[#allocation7 + $0x3e0] sm:$0xff]  ;;  %v4274_v59 = vld [vmem:[#allocation7 + $0x3f0] sm:$0xff] }
 0x2ad   :  { %1414 = vmatpush1.msra.mxu0 %v4259_v48  ;;  %1485 = vmatpush1.msra.mxu1 %v4262_v53  ;;  %5465 = vst [vmem:[#allocation102_spill] sm:$0xff] %v4271_v57  ;;  %5466 = vst [vmem:[#allocation103_spill] sm:$0xff] %v4274_v59  ;;  %v4277_v48 = vld [vmem:[#allocation7 + $0x3c8] sm:$0xff]  ;;  %v4280_v53 = vld [vmem:[#allocation7 + $0x3d8] sm:$0xff] }
 0x2ae   :  { %1415 = vmatprep.subr.mxu0 %v4265_v49  ;;  %1486 = vmatprep.subr.mxu1 %v4268_v60  ;;  %5467 = vst [vmem:[#allocation104_spill] sm:$0xff] %v4277_v48  ;;  %5468 = vst [vmem:[#allocation105_spill] sm:$0xff] %v4280_v53  ;;  %v4283_v49 = vld [vmem:[#allocation7 + $0x3c0] sm:$0xff]  ;;  %v4286_v60 = vld [vmem:[#allocation7 + $0x3d0] sm:$0xff] }
 0x2af   :  { %1416 = vmatpush2.msra.mxu0 %v4271_v57  ;;  %1487 = vmatpush2.msra.mxu1 %v4274_v59  ;;  %5469 = vst [vmem:[#allocation106_spill] sm:$0xff] %v4283_v49  ;;  %5470 = vst [vmem:[#allocation107_spill] sm:$0xff] %v4286_v60  ;;  %v4289_v57 = vld [vmem:[#allocation7 + $0x3a8] sm:$0xff]  ;;  %v4292_v59 = vld [vmem:[#allocation7 + $0x3b8] sm:$0xff] }
 0x2b0   :  { %1417 = vmatprep.subr.mxu0 %v4277_v48  ;;  %1488 = vmatprep.subr.mxu1 %v4280_v53  ;;  %5471 = vst [vmem:[#allocation108_spill] sm:$0xff] %v4289_v57  ;;  %5472 = vst [vmem:[#allocation109_spill] sm:$0xff] %v4292_v59  ;;  %v4295_v48 = vld [vmem:[#allocation7 + $0x3a0] sm:$0xff]  ;;  %v4298_v53 = vld [vmem:[#allocation7 + $0x3b0] sm:$0xff] }
 0x2b1   :  { %1418 = vmatpush2.msra.mxu0 %v4283_v49  ;;  %1489 = vmatpush2.msra.mxu1 %v4286_v60  ;;  %5473 = vst [vmem:[#allocation110_spill] sm:$0xff] %v4295_v48  ;;  %5474 = vst [vmem:[#allocation111_spill] sm:$0xff] %v4298_v53  ;;  %v4301_v49 = vld [vmem:[#allocation7 + $0x388] sm:$0xff]  ;;  %v4304_v60 = vld [vmem:[#allocation7 + $0x398] sm:$0xff] }
 0x2b2   :  { %1419 = vmatprep.subr.mxu0 %v4289_v57  ;;  %1490 = vmatprep.subr.mxu1 %v4292_v59  ;;  %5475 = vst [vmem:[#allocation112_spill] sm:$0xff] %v4301_v49  ;;  %5476 = vst [vmem:[#allocation113_spill] sm:$0xff] %v4304_v60  ;;  %v4307_v57 = vld [vmem:[#allocation7 + $0x380] sm:$0xff]  ;;  %v4310_v59 = vld [vmem:[#allocation7 + $0x390] sm:$0xff] }
 0x2b3   :  { %1420 = vmatpush2.msra.mxu0 %v4295_v48  ;;  %1491 = vmatpush2.msra.mxu1 %v4298_v53  ;;  %5477 = vst [vmem:[#allocation114_spill] sm:$0xff] %v4307_v57  ;;  %5478 = vst [vmem:[#allocation115_spill] sm:$0xff] %v4310_v59  ;;  %v4313_v48 = vld [vmem:[#allocation7 + $0x368] sm:$0xff]  ;;  %v4316_v53 = vld [vmem:[#allocation7 + $0x378] sm:$0xff] }
 0x2b4   :  { %1421 = vmatprep.subr.mxu0 %v4301_v49  ;;  %1492 = vmatprep.subr.mxu1 %v4304_v60  ;;  %5479 = vst [vmem:[#allocation116_spill] sm:$0xff] %v4313_v48  ;;  %5480 = vst [vmem:[#allocation117_spill] sm:$0xff] %v4316_v53  ;;  %v4319_v49 = vld [vmem:[#allocation7 + $0x360] sm:$0xff]  ;;  %v4322_v60 = vld [vmem:[#allocation7 + $0x370] sm:$0xff] }
 0x2b5   :  { %1422 = vmatpush2.msra.mxu0 %v4307_v57  ;;  %1493 = vmatpush2.msra.mxu1 %v4310_v59  ;;  %5481 = vst [vmem:[#allocation118_spill] sm:$0xff] %v4319_v49  ;;  %5482 = vst [vmem:[#allocation119_spill] sm:$0xff] %v4322_v60  ;;  %v4325_v57 = vld [vmem:[#allocation7 + $0x348] sm:$0xff]  ;;  %v4328_v59 = vld [vmem:[#allocation7 + $0x358] sm:$0xff] }
 0x2b6   :  { %1423 = vmatprep.subr.mxu0 %v4313_v48  ;;  %1494 = vmatprep.subr.mxu1 %v4316_v53  ;;  %5483 = vst [vmem:[#allocation120_spill] sm:$0xff] %v4325_v57  ;;  %5484 = vst [vmem:[#allocation121_spill] sm:$0xff] %v4328_v59  ;;  %v4331_v48 = vld [vmem:[#allocation7 + $0x340] sm:$0xff]  ;;  %v4334_v53 = vld [vmem:[#allocation7 + $0x350] sm:$0xff] }
 0x2b7   :  { %1424 = vmatpush2.msra.mxu0 %v4319_v49  ;;  %1495 = vmatpush2.msra.mxu1 %v4322_v60  ;;  %5485 = vst [vmem:[#allocation122_spill] sm:$0xff] %v4331_v48  ;;  %5486 = vst [vmem:[#allocation123_spill] sm:$0xff] %v4334_v53  ;;  %v4337_v49 = vld [vmem:[#allocation7 + $0x328] sm:$0xff]  ;;  %v4340_v60 = vld [vmem:[#allocation7 + $0x338] sm:$0xff] }
 0x2b8   :  { %1425 = vmatprep.subr.mxu0 %v4325_v57  ;;  %1496 = vmatprep.subr.mxu1 %v4328_v59  ;;  %5487 = vst [vmem:[#allocation124_spill] sm:$0xff] %v4337_v49  ;;  %5488 = vst [vmem:[#allocation125_spill] sm:$0xff] %v4340_v60  ;;  %v4343_v57 = vld [vmem:[#allocation7 + $0x320] sm:$0xff]  ;;  %v4346_v59 = vld [vmem:[#allocation7 + $0x330] sm:$0xff] }
 0x2b9   :  { %1426 = vmatpush2.msra.mxu0 %v4331_v48  ;;  %1497 = vmatpush2.msra.mxu1 %v4334_v53  ;;  %5489 = vst [vmem:[#allocation126_spill] sm:$0xff] %v4343_v57  ;;  %5490 = vst [vmem:[#allocation127_spill] sm:$0xff] %v4346_v59  ;;  %v4349_v48 = vld [vmem:[#allocation7 + $0x308] sm:$0xff]  ;;  %v4352_v53 = vld [vmem:[#allocation7 + $0x318] sm:$0xff] }
 0x2ba   :  { %1427 = vmatprep.subr.mxu0 %v4337_v49  ;;  %1498 = vmatprep.subr.mxu1 %v4340_v60  ;;  %5491 = vst [vmem:[#allocation128_spill] sm:$0xff] %v4349_v48  ;;  %5492 = vst [vmem:[#allocation129_spill] sm:$0xff] %v4352_v53  ;;  %v4355_v49 = vld [vmem:[#allocation7 + $0x300] sm:$0xff]  ;;  %v4358_v60 = vld [vmem:[#allocation7 + $0x310] sm:$0xff] }
 0x2bb   :  { %1428 = vmatpush2.msra.mxu0 %v4343_v57  ;;  %1499 = vmatpush2.msra.mxu1 %v4346_v59  ;;  %5493 = vst [vmem:[#allocation130_spill] sm:$0xff] %v4355_v49  ;;  %5494 = vst [vmem:[#allocation131_spill] sm:$0xff] %v4358_v60  ;;  %v4361_v57 = vld [vmem:[#allocation7 + $0x2e8] sm:$0xff]  ;;  %v4364_v59 = vld [vmem:[#allocation7 + $0x2f8] sm:$0xff] }
 0x2bc   :  { %1429 = vmatprep.subr.mxu0 %v4349_v48  ;;  %1500 = vmatprep.subr.mxu1 %v4352_v53  ;;  %5495 = vst [vmem:[#allocation132_spill] sm:$0xff] %v4361_v57  ;;  %5496 = vst [vmem:[#allocation133_spill] sm:$0xff] %v4364_v59  ;;  %v4367_v48 = vld [vmem:[#allocation7 + $0x2e0] sm:$0xff]  ;;  %v4370_v53 = vld [vmem:[#allocation7 + $0x2f0] sm:$0xff] }
 0x2bd   :  { %1430 = vmatpush2.msra.mxu0 %v4355_v49  ;;  %1501 = vmatpush2.msra.mxu1 %v4358_v60  ;;  %5497 = vst [vmem:[#allocation134_spill] sm:$0xff] %v4367_v48  ;;  %5498 = vst [vmem:[#allocation135_spill] sm:$0xff] %v4370_v53  ;;  %v4373_v49 = vld [vmem:[#allocation7 + $0x2c8] sm:$0xff]  ;;  %v4376_v60 = vld [vmem:[#allocation7 + $0x2d8] sm:$0xff] }
 0x2be   :  { %1431 = vmatprep.subr.mxu0 %v4361_v57  ;;  %1502 = vmatprep.subr.mxu1 %v4364_v59  ;;  %5499 = vst [vmem:[#allocation136_spill] sm:$0xff] %v4373_v49  ;;  %5500 = vst [vmem:[#allocation137_spill] sm:$0xff] %v4376_v60  ;;  %v4379_v57 = vld [vmem:[#allocation7 + $0x2c0] sm:$0xff]  ;;  %v4382_v59 = vld [vmem:[#allocation7 + $0x2d0] sm:$0xff] }
 0x2bf   :  { %1432 = vmatpush2.msra.mxu0 %v4367_v48  ;;  %1503 = vmatpush2.msra.mxu1 %v4370_v53  ;;  %5501 = vst [vmem:[#allocation138_spill] sm:$0xff] %v4379_v57  ;;  %5502 = vst [vmem:[#allocation139_spill] sm:$0xff] %v4382_v59  ;;  %v4385_v48 = vld [vmem:[#allocation7 + $0x2a8] sm:$0xff]  ;;  %v4388_v53 = vld [vmem:[#allocation7 + $0x2b8] sm:$0xff] }
 0x2c0   :  { %1433 = vmatprep.subr.mxu0 %v4373_v49  ;;  %1504 = vmatprep.subr.mxu1 %v4376_v60  ;;  %5503 = vst [vmem:[#allocation140_spill] sm:$0xff] %v4385_v48  ;;  %5504 = vst [vmem:[#allocation141_spill] sm:$0xff] %v4388_v53  ;;  %v4391_v49 = vld [vmem:[#allocation7 + $0x2a0] sm:$0xff]  ;;  %v4394_v60 = vld [vmem:[#allocation7 + $0x2b0] sm:$0xff] }
 0x2c1   :  { %1434 = vmatpush2.msra.mxu0 %v4379_v57  ;;  %1505 = vmatpush2.msra.mxu1 %v4382_v59  ;;  %5505 = vst [vmem:[#allocation142_spill] sm:$0xff] %v4391_v49  ;;  %5506 = vst [vmem:[#allocation143_spill] sm:$0xff] %v4394_v60  ;;  %v4397_v57 = vld [vmem:[#allocation7 + $0x288] sm:$0xff]  ;;  %v4400_v59 = vld [vmem:[#allocation7 + $0x298] sm:$0xff] }
 0x2c2   :  { %1435 = vmatprep.subr.mxu0 %v4385_v48  ;;  %1506 = vmatprep.subr.mxu1 %v4388_v53  ;;  %5507 = vst [vmem:[#allocation144_spill] sm:$0xff] %v4397_v57  ;;  %5508 = vst [vmem:[#allocation145_spill] sm:$0xff] %v4400_v59  ;;  %v4403_v48 = vld [vmem:[#allocation7 + $0x280] sm:$0xff]  ;;  %v4406_v53 = vld [vmem:[#allocation7 + $0x290] sm:$0xff] }
 0x2c3   :  { %1436 = vmatpush2.msra.mxu0 %v4391_v49  ;;  %1507 = vmatpush2.msra.mxu1 %v4394_v60  ;;  %5509 = vst [vmem:[#allocation146_spill] sm:$0xff] %v4403_v48  ;;  %5510 = vst [vmem:[#allocation147_spill] sm:$0xff] %v4406_v53  ;;  %v4409_v49 = vld [vmem:[#allocation7 + $0x268] sm:$0xff]  ;;  %v4412_v60 = vld [vmem:[#allocation7 + $0x278] sm:$0xff] }
 0x2c4   :  { %1437 = vmatprep.subr.mxu0 %v4397_v57  ;;  %1508 = vmatprep.subr.mxu1 %v4400_v59  ;;  %5511 = vst [vmem:[#allocation148_spill] sm:$0xff] %v4409_v49  ;;  %5512 = vst [vmem:[#allocation149_spill] sm:$0xff] %v4412_v60  ;;  %v4415_v57 = vld [vmem:[#allocation7 + $0x260] sm:$0xff]  ;;  %v4418_v59 = vld [vmem:[#allocation7 + $0x270] sm:$0xff] }
 0x2c5   :  { %1438 = vmatpush2.msra.mxu0 %v4403_v48  ;;  %1509 = vmatpush2.msra.mxu1 %v4406_v53  ;;  %5513 = vst [vmem:[#allocation150_spill] sm:$0xff] %v4415_v57  ;;  %5514 = vst [vmem:[#allocation151_spill] sm:$0xff] %v4418_v59  ;;  %v4421_v48 = vld [vmem:[#allocation7 + $0x248] sm:$0xff]  ;;  %v4424_v53 = vld [vmem:[#allocation7 + $0x258] sm:$0xff] }
 0x2c6   :  { %1439 = vmatprep.subr.mxu0 %v4409_v49  ;;  %1510 = vmatprep.subr.mxu1 %v4412_v60  ;;  %5515 = vst [vmem:[#allocation152_spill] sm:$0xff] %v4421_v48  ;;  %5516 = vst [vmem:[#allocation153_spill] sm:$0xff] %v4424_v53  ;;  %v4427_v49 = vld [vmem:[#allocation7 + $0x240] sm:$0xff]  ;;  %v4430_v60 = vld [vmem:[#allocation7 + $0x250] sm:$0xff] }
 0x2c7   :  { %1440 = vmatpush2.msra.mxu0 %v4415_v57  ;;  %1511 = vmatpush2.msra.mxu1 %v4418_v59  ;;  %5517 = vst [vmem:[#allocation154_spill] sm:$0xff] %v4427_v49  ;;  %5518 = vst [vmem:[#allocation155_spill] sm:$0xff] %v4430_v60  ;;  %v4433_v57 = vld [vmem:[#allocation7 + $0x228] sm:$0xff]  ;;  %v4436_v59 = vld [vmem:[#allocation7 + $0x238] sm:$0xff] }
 0x2c8   :  { %1441 = vmatprep.subr.mxu0 %v4421_v48  ;;  %1512 = vmatprep.subr.mxu1 %v4424_v53  ;;  %5519 = vst [vmem:[#allocation156_spill] sm:$0xff] %v4433_v57  ;;  %5520 = vst [vmem:[#allocation157_spill] sm:$0xff] %v4436_v59  ;;  %v4439_v48 = vld [vmem:[#allocation7 + $0x220] sm:$0xff]  ;;  %v4442_v53 = vld [vmem:[#allocation7 + $0x230] sm:$0xff] }
 0x2c9   :  { %1442 = vmatpush2.msra.mxu0 %v4427_v49  ;;  %1513 = vmatpush2.msra.mxu1 %v4430_v60  ;;  %5521 = vst [vmem:[#allocation158_spill] sm:$0xff] %v4439_v48  ;;  %5522 = vst [vmem:[#allocation159_spill] sm:$0xff] %v4442_v53  ;;  %v4445_v49 = vld [vmem:[#allocation7 + $0x208] sm:$0xff]  ;;  %v4448_v60 = vld [vmem:[#allocation7 + $0x218] sm:$0xff] }
 0x2ca   :  { %1443 = vmatprep.subr.mxu0 %v4433_v57  ;;  %1514 = vmatprep.subr.mxu1 %v4436_v59  ;;  %5523 = vst [vmem:[#allocation160_spill] sm:$0xff] %v4445_v49  ;;  %5524 = vst [vmem:[#allocation161_spill] sm:$0xff] %v4448_v60  ;;  %v4451_v57 = vld [vmem:[#allocation7 + $0x200] sm:$0xff]  ;;  %v4454_v59 = vld [vmem:[#allocation7 + $0x210] sm:$0xff] }
 0x2cb   :  { %1444 = vmatpush2.msra.mxu0 %v4439_v48  ;;  %1515 = vmatpush2.msra.mxu1 %v4442_v53  ;;  %5525 = vst [vmem:[#allocation162_spill] sm:$0xff] %v4451_v57  ;;  %5526 = vst [vmem:[#allocation163_spill] sm:$0xff] %v4454_v59 }
 0x2cc   :  { %1445 = vmatprep.subr.mxu0 %v4445_v49  ;;  %1516 = vmatprep.subr.mxu1 %v4448_v60 }
 0x2cd   :  { %1446 = vmatpush2.msra.mxu0 %v4451_v57  ;;  %1517 = vmatpush2.msra.mxu1 %v4454_v59 }
 0x2ce   :  { %1549 = vmatprep.subr.mxu0 %v3839_v50  ;;  %1620 = vmatprep.subr.mxu1 %v3842_v51 }
 0x32c   :  { %v1113_v53 = vpop.f32.mrf.mxu0  ;;  %v1184_v60 = vpop.f32.mrf.mxu1 }
 0x32d   :  { %v1114_v48 = vadd.f32 %v1113_v53, %v3850_v56  ;;  %v1185_v50 = vadd.f32 %v1184_v60, %v3865_v63 }
 0x32e   :  { %v1115_v49 = vpop.f32.mrf.mxu0  ;;  %v1186_v57 = vpop.f32.mrf.mxu1 }
 0x32f   :  { %v2261_v43 = vmul.f32 -1.442695, %v1114_v48  ;;  %v1116_v52 = vadd.f32 %v1115_v49, %v3854_v58  ;;  %v1187_v45 = vadd.f32 %v1186_v57, %v3860_v6  ;;  %v5527_v58 = vld [vmem:[#allocation168_spill] sm:$0xff] }
 0x331   :  { %2337 = vpow2.f32 %v2261_v43  ;;  %v2262_v47 = vmul.f32 -1.442695, %v1116_v52  ;;  %v2263_v44 = vmul.f32 -1.442695, %v1187_v45  ;;  %v5528_v45 = vld [vmem:[#allocation170_spill] sm:$0xff] }
 0x333   :  { %2339 = vpow2.f32 %v2262_v47 }
 0x334   :  { %2341 = vpow2.f32 %v2263_v44 }
 0x33e   :  { %v2338_v59 = vpop.eup %2337 }
 0x33f   :  { %v1192_v42 = vadd.f32 1.0, %v2338_v59 }
 0x340   :  { %v2340_v51 = vpop.eup %2339 }
 0x341   :  { %2343 = vrcp.f32 %v1192_v42  ;;  %v1198_v53 = vadd.f32 1.0, %v2340_v51  ;;  %v2342_v48 = vpop.eup %2341 }
 0x342   :  { %2345 = vtanh.f32 %v1185_v50  ;;  %v1205_v60 = vadd.f32 1.0, %v2342_v48 }
 0x343   :  { %2347 = vrcp.f32 %v1198_v53 }
 0x34d   :  { %v1279_v49 = vpop.f32.mrf.mxu0  ;;  %v1350_v42 = vpop.f32.mrf.mxu1 }
 0x34e   :  { %v2344_v43 = vpop.eup %2343  ;;  %v1355_v52 = vadd.f32 %v1279_v49, %v5527_v58  ;;  %v5529_v58 = vld [vmem:[#allocation173_spill] sm:$0xff]  ;;  %v5530_v49 = vld [vmem:[#allocation171_spill] sm:$0xff] }
 0x34f   :  { %v2346_v47 = vpop.eup %2345  ;;  %v1281_v56 = vpop.f32.mrf.mxu0 }
 0x350   :  { %v2348_v41 = vpop.eup %2347  ;;  %v2264_v57 = vmul.f32 -1.442695, %v1355_v52  ;;  %v1356_v6 = vadd.f32 %v1281_v56, %v5528_v45  ;;  %v1209_v40 = vmul.f32 %v2346_v47, %v2344_v43  ;;  %v1352_v51 = vpop.f32.mrf.mxu1  ;;  %v1357_v52 = vadd.f32 %v1350_v42, %v5530_v49  ;;  %v5574_v49 = vld [vmem:[#allocation58_spill] sm:$0xff] }
 0x351   :  { %v1208_v59 = vmul.f32 %v2348_v41, %v3870_v29  ;;  %v1358_v53 = vadd.f32 %v1352_v51, %v5529_v58 }
 0x352   :  { %2349 = vpow2.f32 %v2264_v57  ;;  %v2265_v44 = vmul.f32 -1.442695, %v1356_v6 }
 0x353   :  { %v4466_v50 = vadd.f32 %v1209_v40, %v1208_v59  ;;  %v2266_v63 = vmul.f32 -1.442695, %v1358_v53 }
 0x354   :  { %2351 = vpow2.f32 %v2265_v44 }
 0x355   :  { %2353 = vrcp.f32 %v1205_v60 }
 0x356   :  { %2355 = vtanh.f32 %v4466_v50 }
 0x357   :  { %2357 = vtanh.f32 %v1357_v52  ;;  %v5575_v52 = vld [vmem:[#allocation59_spill] sm:$0xff] }
 0x358   :  { %2359 = vpow2.f32 %v2266_v63 }
 0x35f   :  { %v2350_v56 = vpop.eup %2349 }
 0x360   :  { %v1362_v43 = vadd.f32 1.0, %v2350_v56  ;;  %v5576_v56 = vld [vmem:[#allocation60_spill] sm:$0xff] }
 0x361   :  { %v2352_v29 = vpop.eup %2351 }
 0x362   :  { %v2354_v41 = vpop.eup %2353  ;;  %2361 = vrcp.f32 %v1362_v43  ;;  %v1368_v6 = vadd.f32 1.0, %v2352_v29  ;;  %v5577_v43 = vld [vmem:[#allocation61_spill] sm:$0xff]  ;;  %v5578_v29 = vld [vmem:[#allocation62_spill] sm:$0xff] }
 0x363   :  { %v2356_v40 = vpop.eup %2355 }
 0x364   :  { %2363 = vrcp.f32 %v1368_v6  ;;  %v1212_v48 = vmul.f32 %v2356_v40, %v2354_v41  ;;  %v2358_v47 = vpop.eup %2357  ;;  %v5579_v41 = vld [vmem:[#allocation63_spill] sm:$0xff]  ;;  %v5580_v6 = vld [vmem:[#allocation64_spill] sm:$0xff]  ;;  %v5581_v40 = vld [vmem:[#allocation65_spill] sm:$0xff] }
 0x365   :  { %v2360_v57 = vpop.eup %2359 }
 0x366   :  { %1447 = vmatprep.mubr.f32.mxu0 %v1212_v48  ;;  %1518 = vmatprep.mubr.f32.mxu1 %v1212_v48  ;;  %v1375_v42 = vadd.f32 1.0, %v2360_v57  ;;  %v5582_v48 = vld [vmem:[#allocation66_spill] sm:$0xff]  ;;  %v5584_v57 = vld [vmem:[#allocation68_spill] sm:$0xff] }
 0x368   :  { %2365 = vrcp.f32 %v1375_v42  ;;  %v5588_v42 = vld [vmem:[#allocation72_spill] sm:$0xff] }
 0x36f   :  { %v2362_v45 = vpop.eup %2361 }
 0x370   :  { %v1379_v59 = vmul.f32 %v2362_v45, %v2358_v47  ;;  %v5583_v47 = vld [vmem:[#allocation67_spill] sm:$0xff]  ;;  %v5585_v45 = vld [vmem:[#allocation69_spill] sm:$0xff] }
 0x371   :  { %v2364_v60 = vpop.eup %2363 }
 0x372   :  { %v1378_v44 = vmul.f32 %v2364_v60, %v3876_v54  ;;  %v5531_v54 = vld [vmem:[#allocation16_spill] sm:$0xff]  ;;  %v5587_v60 = vld [vmem:[#allocation71_spill] sm:$0xff] }
 0x374   :  { %v4472_v51 = vadd.f32 %v1379_v59, %v1378_v44  ;;  %v5586_v59 = vld [vmem:[#allocation70_spill] sm:$0xff]  ;;  %v5589_v44 = vld [vmem:[#allocation73_spill] sm:$0xff] }
 0x375   :  { %v2366_v63 = vpop.eup %2365 }
 0x376   :  { %2367 = vtanh.f32 %v4472_v51 }
 0x383   :  { %v2368_v58 = vpop.eup %2367 }
 0x384   :  { %v4475_v53 = vmul.f32 %v2368_v58, %v2366_v63  ;;  %v5590_v63 = vld [vmem:[#allocation74_spill] sm:$0xff]  ;;  %v5591_v58 = vld [vmem:[#allocation75_spill] sm:$0xff] }
 0x386   :  { %1448 = vmatmul.mubr.f32.vlgmr.msra.gmra.mxu0 %v4475_v53  ;;  %1519 = vmatmul.mubr.f32.vlgmr.msra.gmra.mxu1 %v4475_v53 }
 0x387   :  { %1550 = vmatpush1.msra.mxu0 %v3883_v7  ;;  %1621 = vmatpush1.msra.mxu1 %v3886_v1  ;;  %v5532_v7 = vld [vmem:[#allocation17_spill] sm:$0xff]  ;;  %v5533_v1 = vld [vmem:[#allocation18_spill] sm:$0xff] }
 0x388   :  { %1551 = vmatprep.subr.mxu0 %v3889_v55  ;;  %1622 = vmatprep.subr.mxu1 %v3892_v10  ;;  %v5534_v55 = vld [vmem:[#allocation19_spill] sm:$0xff]  ;;  %v5535_v10 = vld [vmem:[#allocation20_spill] sm:$0xff] }
 0x389   :  { %1552 = vmatpush1.msra.mxu0 %v3895_v4  ;;  %1623 = vmatpush1.msra.mxu1 %v3898_v13  ;;  %v5536_v4 = vld [vmem:[#allocation21_spill] sm:$0xff]  ;;  %v5537_v13 = vld [vmem:[#allocation22_spill] sm:$0xff] }
 0x38a   :  { %1553 = vmatprep.subr.mxu0 %v3901_v9  ;;  %1624 = vmatprep.subr.mxu1 %v3904_v11  ;;  %v5538_v9 = vld [vmem:[#allocation23_spill] sm:$0xff]  ;;  %v5539_v11 = vld [vmem:[#allocation24_spill] sm:$0xff] }
 0x38b   :  { %1554 = vmatpush1.msra.mxu0 %v3907_v3  ;;  %1625 = vmatpush1.msra.mxu1 %v3910_v2  ;;  %v5540_v3 = vld [vmem:[#allocation25_spill] sm:$0xff]  ;;  %v5541_v2 = vld [vmem:[#allocation26_spill] sm:$0xff] }
 0x38c   :  { %1555 = vmatprep.subr.mxu0 %v3913_v16  ;;  %1626 = vmatprep.subr.mxu1 %v3916_v18  ;;  %v5542_v16 = vld [vmem:[#allocation27_spill] sm:$0xff]  ;;  %v5543_v18 = vld [vmem:[#allocation28_spill] sm:$0xff] }
 0x38d   :  { %1556 = vmatpush1.msra.mxu0 %v3919_v15  ;;  %1627 = vmatpush1.msra.mxu1 %v3922_v17  ;;  %v5544_v15 = vld [vmem:[#allocation29_spill] sm:$0xff]  ;;  %v5545_v17 = vld [vmem:[#allocation30_spill] sm:$0xff] }
 0x38e   :  { %1557 = vmatprep.subr.mxu0 %v3925_v14  ;;  %1628 = vmatprep.subr.mxu1 %v3928_v46  ;;  %v5546_v14 = vld [vmem:[#allocation31_spill] sm:$0xff]  ;;  %v5547_v46 = vld [vmem:[#allocation32_spill] sm:$0xff] }
 0x38f   :  { %1558 = vmatpush1.msra.mxu0 %v3931_v0  ;;  %1629 = vmatpush1.msra.mxu1 %v3934_v61  ;;  %v5548_v0 = vld [vmem:[#allocation33_spill] sm:$0xff]  ;;  %v5549_v61 = vld [vmem:[#allocation34_spill] sm:$0xff] }
 0x390   :  { %1559 = vmatprep.subr.mxu0 %v3937_v19  ;;  %1630 = vmatprep.subr.mxu1 %v3940_v12  ;;  %v5550_v19 = vmov 0.0   ;;  %v5551_v12 = vld [vmem:[#allocation35_spill] sm:$0xff] }
 0x391   :  { %1560 = vmatpush1.msra.mxu0 %v3943_v62  ;;  %1631 = vmatpush1.msra.mxu1 %v3946_v5  ;;  %v5552_v62 = vld [vmem:[#allocation36_spill] sm:$0xff]  ;;  %v5553_v5 = vld [vmem:[#allocation37_spill] sm:$0xff] }
 0x392   :  { %1561 = vmatprep.subr.mxu0 %v3949_v8  ;;  %1632 = vmatprep.subr.mxu1 %v3952_v20  ;;  %v5554_v8 = vld [vmem:[#allocation38_spill] sm:$0xff]  ;;  %v5555_v20 = vld [vmem:[#allocation39_spill] sm:$0xff] }
 0x393   :  { %1562 = vmatpush1.msra.mxu0 %v3955_v21  ;;  %1633 = vmatpush1.msra.mxu1 %v3958_v22  ;;  %v5556_v21 = vld [vmem:[#allocation40_spill] sm:$0xff]  ;;  %v5557_v22 = vld [vmem:[#allocation41_spill] sm:$0xff] }
 0x394   :  { %1563 = vmatprep.subr.mxu0 %v3961_v23  ;;  %1634 = vmatprep.subr.mxu1 %v3964_v24  ;;  %v5558_v23 = vld [vmem:[#allocation42_spill] sm:$0xff]  ;;  %v5559_v24 = vld [vmem:[#allocation43_spill] sm:$0xff] }
 0x395   :  { %1564 = vmatpush1.msra.mxu0 %v3967_v25  ;;  %1635 = vmatpush1.msra.mxu1 %v3970_v26  ;;  %v5560_v25 = vld [vmem:[#allocation44_spill] sm:$0xff]  ;;  %v5561_v26 = vld [vmem:[#allocation45_spill] sm:$0xff] }
 0x396   :  { %1565 = vmatprep.subr.mxu0 %v3973_v27  ;;  %1636 = vmatprep.subr.mxu1 %v3976_v28  ;;  %v5562_v27 = vld [vmem:[#allocation46_spill] sm:$0xff]  ;;  %v5563_v28 = vld [vmem:[#allocation47_spill] sm:$0xff] }
 0x397   :  { %1566 = vmatpush1.msra.mxu0 %v3979_v30  ;;  %1637 = vmatpush1.msra.mxu1 %v3982_v31  ;;  %v5564_v30 = vld [vmem:[#allocation48_spill] sm:$0xff]  ;;  %v5565_v31 = vld [vmem:[#allocation49_spill] sm:$0xff] }
 0x398   :  { %1567 = vmatprep.subr.mxu0 %v3985_v32  ;;  %1638 = vmatprep.subr.mxu1 %v3988_v33  ;;  %v5566_v32 = vld [vmem:[#allocation50_spill] sm:$0xff]  ;;  %v5567_v33 = vld [vmem:[#allocation51_spill] sm:$0xff] }
 0x399   :  { %1568 = vmatpush1.msra.mxu0 %v3991_v34  ;;  %1639 = vmatpush1.msra.mxu1 %v3994_v35  ;;  %v5568_v34 = vld [vmem:[#allocation52_spill] sm:$0xff]  ;;  %v5569_v35 = vld [vmem:[#allocation53_spill] sm:$0xff] }
 0x39a   :  { %1569 = vmatprep.subr.mxu0 %v3997_v36  ;;  %1640 = vmatprep.subr.mxu1 %v4000_v37  ;;  %v5570_v36 = vld [vmem:[#allocation54_spill] sm:$0xff]  ;;  %v5571_v37 = vld [vmem:[#allocation55_spill] sm:$0xff] }
 0x39b   :  { %1570 = vmatpush1.msra.mxu0 %v4003_v38  ;;  %1641 = vmatpush1.msra.mxu1 %v4006_v39  ;;  %v5572_v38 = vld [vmem:[#allocation56_spill] sm:$0xff]  ;;  %v5573_v39 = vld [vmem:[#allocation57_spill] sm:$0xff] }
 0x39c   :  { %1571 = vmatprep.subr.mxu0 %v5531_v54  ;;  %1642 = vmatprep.subr.mxu1 %v5532_v7  ;;  %v5593_v54 = vld [vmem:[#allocation77_spill] sm:$0xff]  ;;  %v5594_v7 = vld [vmem:[#allocation78_spill] sm:$0xff] }
 0x39d   :  { %1572 = vmatpush1.msra.mxu0 %v5533_v1  ;;  %1643 = vmatpush1.msra.mxu1 %v5534_v55  ;;  %v5595_v1 = vld [vmem:[#allocation79_spill] sm:$0xff]  ;;  %v5596_v55 = vld [vmem:[#allocation80_spill] sm:$0xff] }
 0x39e   :  { %1573 = vmatprep.subr.mxu0 %v5535_v10  ;;  %1644 = vmatprep.subr.mxu1 %v5536_v4  ;;  %v5597_v10 = vld [vmem:[#allocation81_spill] sm:$0xff]  ;;  %v5598_v4 = vld [vmem:[#allocation82_spill] sm:$0xff] }
 0x39f   :  { %1574 = vmatpush1.msra.mxu0 %v5537_v13  ;;  %1645 = vmatpush1.msra.mxu1 %v5538_v9  ;;  %v5599_v13 = vld [vmem:[#allocation83_spill] sm:$0xff]  ;;  %v5600_v9 = vld [vmem:[#allocation84_spill] sm:$0xff] }
 0x3a0   :  { %1575 = vmatprep.subr.mxu0 %v5539_v11  ;;  %1646 = vmatprep.subr.mxu1 %v5540_v3  ;;  %v5601_v11 = vld [vmem:[#allocation85_spill] sm:$0xff]  ;;  %v5602_v3 = vld [vmem:[#allocation86_spill] sm:$0xff] }
 0x3a1   :  { %1576 = vmatpush1.msra.mxu0 %v5541_v2  ;;  %1647 = vmatpush1.msra.mxu1 %v5542_v16  ;;  %v5603_v2 = vld [vmem:[#allocation87_spill] sm:$0xff]  ;;  %v5604_v16 = vld [vmem:[#allocation88_spill] sm:$0xff] }
 0x3a2   :  { %1577 = vmatprep.subr.mxu0 %v5543_v18  ;;  %1648 = vmatprep.subr.mxu1 %v5544_v15  ;;  %v5605_v18 = vld [vmem:[#allocation89_spill] sm:$0xff]  ;;  %v5606_v15 = vld [vmem:[#allocation90_spill] sm:$0xff] }
 0x3a3   :  { %1578 = vmatpush1.msra.mxu0 %v5545_v17  ;;  %1649 = vmatpush1.msra.mxu1 %v5546_v14  ;;  %v5607_v17 = vld [vmem:[#allocation91_spill] sm:$0xff]  ;;  %v5608_v14 = vld [vmem:[#allocation92_spill] sm:$0xff] }
 0x3a4   :  { %1579 = vmatprep.subr.mxu0 %v5547_v46  ;;  %1650 = vmatprep.subr.mxu1 %v5548_v0  ;;  %v5609_v46 = vld [vmem:[#allocation93_spill] sm:$0xff]  ;;  %v5610_v0 = vld [vmem:[#allocation94_spill] sm:$0xff] }
 0x3a5   :  { %1580 = vmatpush1.msra.mxu0 %v5549_v61  ;;  %1613 = vmatprep.mubr.f32.mxu0 %v5550_v19  ;;  %v5611_v61 = vld [vmem:[#allocation95_spill] sm:$0xff] }
 0x3a6   :  { %1651 = vmatpush1.msra.mxu1 %v5551_v12  ;;  %1684 = vmatprep.mubr.f32.mxu1 %v5550_v19  ;;  %v5612_v12 = vld [vmem:[#allocation96_spill] sm:$0xff] }
 0x3a7   :  { %1614 = vmatmul.mubr.f32.vlgmr.msra.gmra.mxu0 %v4475_v53  ;;  %1685 = vmatmul.mubr.f32.vlgmr.msra.gmra.mxu1 %v4475_v53  ;;  %v5592_v53 = vld [vmem:[#allocation76_spill] sm:$0xff] }
 0x3a8   :  { %1719 = vmatprep.subr.mxu0 %v5552_v62  ;;  %1790 = vmatprep.subr.mxu1 %v5553_v5  ;;  %v5613_v62 = vld [vmem:[#allocation97_spill] sm:$0xff]  ;;  %v5614_v5 = vld [vmem:[#allocation98_spill] sm:$0xff] }
 0x3a9   :  { %1720 = vmatpush1.msra.mxu0 %v5554_v8  ;;  %1791 = vmatpush1.msra.mxu1 %v5555_v20  ;;  %v5615_v8 = vld [vmem:[#allocation99_spill] sm:$0xff]  ;;  %v5616_v20 = vld [vmem:[#allocation100_spill] sm:$0xff] }
 0x3aa   :  { %1721 = vmatprep.subr.mxu0 %v5556_v21  ;;  %1792 = vmatprep.subr.mxu1 %v5557_v22  ;;  %v5617_v21 = vld [vmem:[#allocation101_spill] sm:$0xff]  ;;  %v5618_v22 = vld [vmem:[#allocation102_spill] sm:$0xff] }
 0x3ab   :  { %1722 = vmatpush1.msra.mxu0 %v5558_v23  ;;  %1793 = vmatpush1.msra.mxu1 %v5559_v24  ;;  %v5619_v23 = vld [vmem:[#allocation103_spill] sm:$0xff]  ;;  %v5620_v24 = vld [vmem:[#allocation104_spill] sm:$0xff] }
 0x3ac   :  { %1723 = vmatprep.subr.mxu0 %v5560_v25  ;;  %1794 = vmatprep.subr.mxu1 %v5561_v26  ;;  %v5621_v25 = vld [vmem:[#allocation105_spill] sm:$0xff]  ;;  %v5622_v26 = vld [vmem:[#allocation106_spill] sm:$0xff] }
 0x3ad   :  { %1724 = vmatpush1.msra.mxu0 %v5562_v27  ;;  %1795 = vmatpush1.msra.mxu1 %v5563_v28  ;;  %v5623_v27 = vld [vmem:[#allocation107_spill] sm:$0xff]  ;;  %v5624_v28 = vld [vmem:[#allocation108_spill] sm:$0xff] }
 0x3ae   :  { %1725 = vmatprep.subr.mxu0 %v5564_v30  ;;  %1796 = vmatprep.subr.mxu1 %v5565_v31  ;;  %v5625_v30 = vld [vmem:[#allocation109_spill] sm:$0xff]  ;;  %v5626_v31 = vld [vmem:[#allocation110_spill] sm:$0xff] }
 0x3af   :  { %1726 = vmatpush1.msra.mxu0 %v5566_v32  ;;  %1797 = vmatpush1.msra.mxu1 %v5567_v33  ;;  %v5627_v32 = vld [vmem:[#allocation111_spill] sm:$0xff]  ;;  %v5628_v33 = vld [vmem:[#allocation112_spill] sm:$0xff] }
 0x3b0   :  { %1727 = vmatprep.subr.mxu0 %v5568_v34  ;;  %1798 = vmatprep.subr.mxu1 %v5569_v35  ;;  %v5629_v34 = vld [vmem:[#allocation113_spill] sm:$0xff]  ;;  %v5630_v35 = vld [vmem:[#allocation114_spill] sm:$0xff] }
 0x3b1   :  { %1728 = vmatpush1.msra.mxu0 %v5570_v36  ;;  %1799 = vmatpush1.msra.mxu1 %v5571_v37  ;;  %v5631_v36 = vld [vmem:[#allocation115_spill] sm:$0xff]  ;;  %v5632_v37 = vld [vmem:[#allocation116_spill] sm:$0xff] }
 0x3b2   :  { %1729 = vmatprep.subr.mxu0 %v5572_v38  ;;  %1800 = vmatprep.subr.mxu1 %v5573_v39  ;;  %v5633_v38 = vld [vmem:[#allocation117_spill] sm:$0xff]  ;;  %v5634_v39 = vld [vmem:[#allocation118_spill] sm:$0xff] }
 0x3b3   :  { %1730 = vmatpush1.msra.mxu0 %v5574_v49  ;;  %1801 = vmatpush1.msra.mxu1 %v5575_v52  ;;  %v5635_v49 = vld [vmem:[#allocation119_spill] sm:$0xff]  ;;  %v5636_v52 = vld [vmem:[#allocation120_spill] sm:$0xff] }
 0x3b4   :  { %1731 = vmatprep.subr.mxu0 %v5576_v56  ;;  %1802 = vmatprep.subr.mxu1 %v5577_v43  ;;  %v5637_v56 = vld [vmem:[#allocation121_spill] sm:$0xff]  ;;  %v5638_v43 = vld [vmem:[#allocation122_spill] sm:$0xff] }
 0x3b5   :  { %1732 = vmatpush1.msra.mxu0 %v5578_v29  ;;  %1803 = vmatpush1.msra.mxu1 %v5579_v41  ;;  %v5639_v29 = vld [vmem:[#allocation123_spill] sm:$0xff]  ;;  %v5640_v41 = vld [vmem:[#allocation124_spill] sm:$0xff] }
 0x3b6   :  { %1733 = vmatprep.subr.mxu0 %v5580_v6  ;;  %1804 = vmatprep.subr.mxu1 %v5581_v40  ;;  %v5641_v6 = vld [vmem:[#allocation125_spill] sm:$0xff]  ;;  %v5642_v40 = vld [vmem:[#allocation126_spill] sm:$0xff] }
 0x3b7   :  { %1734 = vmatpush1.msra.mxu0 %v5582_v48  ;;  %1805 = vmatpush1.msra.mxu1 %v5583_v47  ;;  %v5643_v48 = vld [vmem:[#allocation127_spill] sm:$0xff]  ;;  %v5644_v47 = vld [vmem:[#allocation128_spill] sm:$0xff] }
 0x3b8   :  { %1735 = vmatprep.subr.mxu0 %v5584_v57  ;;  %1806 = vmatprep.subr.mxu1 %v5585_v45  ;;  %v5645_v57 = vld [vmem:[#allocation129_spill] sm:$0xff]  ;;  %v5646_v45 = vld [vmem:[#allocation130_spill] sm:$0xff] }
 0x3b9   :  { %1736 = vmatpush1.msra.mxu0 %v5586_v59  ;;  %1807 = vmatpush1.msra.mxu1 %v5587_v60  ;;  %v5647_v59 = vld [vmem:[#allocation131_spill] sm:$0xff]  ;;  %v5648_v60 = vld [vmem:[#allocation132_spill] sm:$0xff] }
 0x3ba   :  { %1737 = vmatprep.subr.mxu0 %v5588_v42  ;;  %1808 = vmatprep.subr.mxu1 %v5589_v44  ;;  %v5649_v42 = vld [vmem:[#allocation133_spill] sm:$0xff]  ;;  %v5650_v44 = vld [vmem:[#allocation134_spill] sm:$0xff] }
 0x3bb   :  { %1738 = vmatpush1.msra.mxu0 %v5590_v63  ;;  %1809 = vmatpush1.msra.mxu1 %v5591_v58  ;;  %v5651_v63 = vld [vmem:[#allocation135_spill] sm:$0xff]  ;;  %v5652_v58 = vld [vmem:[#allocation136_spill] sm:$0xff] }
 0x3bc   :  { %1739 = vmatprep.subr.mxu0 %v5592_v53  ;;  %1810 = vmatprep.subr.mxu1 %v5593_v54  ;;  %v5653_v53 = vld [vmem:[#allocation137_spill] sm:$0xff]  ;;  %v5654_v54 = vld [vmem:[#allocation138_spill] sm:$0xff] }
 0x3bd   :  { %1740 = vmatpush1.msra.mxu0 %v5594_v7  ;;  %1811 = vmatpush1.msra.mxu1 %v5595_v1  ;;  %v5655_v7 = vld [vmem:[#allocation139_spill] sm:$0xff]  ;;  %v5656_v1 = vld [vmem:[#allocation140_spill] sm:$0xff] }
 0x3be   :  { %1741 = vmatprep.subr.mxu0 %v5596_v55  ;;  %1812 = vmatprep.subr.mxu1 %v5597_v10  ;;  %v5657_v55 = vld [vmem:[#allocation141_spill] sm:$0xff]  ;;  %v5658_v10 = vld [vmem:[#allocation142_spill] sm:$0xff] }
 0x3bf   :  { %1742 = vmatpush1.msra.mxu0 %v5598_v4  ;;  %1813 = vmatpush1.msra.mxu1 %v5599_v13  ;;  %v5659_v4 = vld [vmem:[#allocation143_spill] sm:$0xff]  ;;  %v5660_v13 = vld [vmem:[#allocation144_spill] sm:$0xff] }
 0x3c0   :  { %1743 = vmatprep.subr.mxu0 %v5600_v9  ;;  %1814 = vmatprep.subr.mxu1 %v5601_v11  ;;  %v5661_v9 = vld [vmem:[#allocation145_spill] sm:$0xff]  ;;  %v5662_v11 = vld [vmem:[#allocation146_spill] sm:$0xff] }
 0x3c1   :  { %1744 = vmatpush1.msra.mxu0 %v5602_v3  ;;  %1815 = vmatpush1.msra.mxu1 %v5603_v2  ;;  %v5663_v3 = vld [vmem:[#allocation147_spill] sm:$0xff]  ;;  %v5664_v2 = vld [vmem:[#allocation148_spill] sm:$0xff] }
 0x3c2   :  { %1745 = vmatprep.subr.mxu0 %v5604_v16  ;;  %1816 = vmatprep.subr.mxu1 %v5605_v18  ;;  %v5665_v16 = vld [vmem:[#allocation149_spill] sm:$0xff]  ;;  %v5666_v18 = vld [vmem:[#allocation150_spill] sm:$0xff] }
 0x3c3   :  { %1746 = vmatpush1.msra.mxu0 %v5606_v15  ;;  %1817 = vmatpush1.msra.mxu1 %v5607_v17  ;;  %v5667_v15 = vld [vmem:[#allocation151_spill] sm:$0xff]  ;;  %v5668_v17 = vld [vmem:[#allocation152_spill] sm:$0xff] }
 0x3c4   :  { %1747 = vmatprep.subr.mxu0 %v5608_v14  ;;  %1818 = vmatprep.subr.mxu1 %v5609_v46  ;;  %v5669_v14 = vld [vmem:[#allocation153_spill] sm:$0xff]  ;;  %v5670_v46 = vld [vmem:[#allocation154_spill] sm:$0xff] }
 0x3c5   :  { %1748 = vmatpush1.msra.mxu0 %v5610_v0  ;;  %1819 = vmatpush1.msra.mxu1 %v5611_v61  ;;  %v5671_v0 = vld [vmem:[#allocation155_spill] sm:$0xff]  ;;  %v5672_v61 = vld [vmem:[#allocation156_spill] sm:$0xff] }
 0x3c6   :  { %1749 = vmatprep.subr.mxu0 %v5612_v12  ;;  %1820 = vmatprep.subr.mxu1 %v5613_v62  ;;  %v5673_v12 = vld [vmem:[#allocation157_spill] sm:$0xff]  ;;  %v5674_v62 = vld [vmem:[#allocation158_spill] sm:$0xff] }
 0x3c7   :  { %1750 = vmatpush1.msra.mxu0 %v5614_v5  ;;  %1821 = vmatpush1.msra.mxu1 %v5615_v8  ;;  %v5675_v5 = vld [vmem:[#allocation159_spill] sm:$0xff]  ;;  %v5676_v8 = vld [vmem:[#allocation160_spill] sm:$0xff] }
 0x3c8   :  { %1751 = vmatprep.subr.mxu0 %v5616_v20  ;;  %1822 = vmatprep.subr.mxu1 %v5617_v21  ;;  %v5677_v20 = vld [vmem:[#allocation161_spill] sm:$0xff]  ;;  %v5678_v21 = vld [vmem:[#allocation162_spill] sm:$0xff] }
 0x3c9   :  { %1752 = vmatpush2.msra.mxu0 %v5618_v22  ;;  %1823 = vmatpush2.msra.mxu1 %v5619_v23  ;;  %v5679_v22 = vld [vmem:[#allocation163_spill] sm:$0xff]  ;;  %v2641_v23 = vld [vmem:[#allocation5 + $0x1e8] sm:$0xff] }
 0x3ca   :  { %1753 = vmatprep.subr.mxu0 %v5620_v24  ;;  %1824 = vmatprep.subr.mxu1 %v5621_v25  ;;  %v2642_v24 = vld [vmem:[#allocation5 + $0x1f8] sm:$0xff] }
 0x3cb   :  { %1754 = vmatpush2.msra.mxu0 %v5622_v26  ;;  %1825 = vmatpush2.msra.mxu1 %v5623_v27  ;;  %v5680_v26 = vld [vmem:[#allocation12_spill] sm:$0xff] }
 0x3cc   :  { %1755 = vmatprep.subr.mxu0 %v5624_v28  ;;  %1826 = vmatprep.subr.mxu1 %v5625_v30 }
 0x3cd   :  { %1756 = vmatpush2.msra.mxu0 %v5626_v31  ;;  %1827 = vmatpush2.msra.mxu1 %v5627_v32  ;;  %v5681_v31 = vld [vmem:[#allocation13_spill] sm:$0xff] }
 0x3ce   :  { %1757 = vmatprep.subr.mxu0 %v5628_v33  ;;  %1828 = vmatprep.subr.mxu1 %v5629_v34 }
 0x3cf   :  { %1758 = vmatpush2.msra.mxu0 %v5630_v35  ;;  %1829 = vmatpush2.msra.mxu1 %v5631_v36  ;;  %v5682_v36 = vld [vmem:[#allocation14_spill] sm:$0xff] }
 0x3d0   :  { %1759 = vmatprep.subr.mxu0 %v5632_v37  ;;  %1830 = vmatprep.subr.mxu1 %v5633_v38 }
 0x3d1   :  { %1760 = vmatpush2.msra.mxu0 %v5634_v39  ;;  %1831 = vmatpush2.msra.mxu1 %v5635_v49  ;;  %v5683_v49 = vld [vmem:[#allocation15_spill] sm:$0xff] }
 0x3d2   :  { %1761 = vmatprep.subr.mxu0 %v5636_v52  ;;  %1832 = vmatprep.subr.mxu1 %v5637_v56 }
 0x3d3   :  { %1762 = vmatpush2.msra.mxu0 %v5638_v43  ;;  %1833 = vmatpush2.msra.mxu1 %v5639_v29 }
 0x3d4   :  { %1763 = vmatprep.subr.mxu0 %v5640_v41  ;;  %1834 = vmatprep.subr.mxu1 %v5641_v6 }
 0x3d5   :  { %1764 = vmatpush2.msra.mxu0 %v5642_v40  ;;  %1835 = vmatpush2.msra.mxu1 %v5643_v48  ;;  %v5684_v48 = vld [vmem:[#allocation172_spill] sm:$0xff] }
 0x3d6   :  { %1765 = vmatprep.subr.mxu0 %v5644_v47  ;;  %1836 = vmatprep.subr.mxu1 %v5645_v57 }
 0x3d7   :  { %1766 = vmatpush2.msra.mxu0 %v5646_v45  ;;  %1837 = vmatpush2.msra.mxu1 %v5647_v59 }
 0x3d8   :  { %1767 = vmatprep.subr.mxu0 %v5648_v60  ;;  %1838 = vmatprep.subr.mxu1 %v5649_v42  ;;  %v5685_v42 = vld [vmem:[#allocation174_spill] sm:$0xff] }
 0x3d9   :  { %1768 = vmatpush2.msra.mxu0 %v5650_v44  ;;  %1839 = vmatpush2.msra.mxu1 %v5651_v63 }
 0x3da   :  { %1769 = vmatprep.subr.mxu0 %v5652_v58  ;;  %1840 = vmatprep.subr.mxu1 %v5653_v53 }
 0x3db   :  { %1770 = vmatpush2.msra.mxu0 %v5654_v54  ;;  %1841 = vmatpush2.msra.mxu1 %v5655_v7 }
 0x3dc   :  { %1771 = vmatprep.subr.mxu0 %v5656_v1  ;;  %1842 = vmatprep.subr.mxu1 %v5657_v55 }
 0x3dd   :  { %1772 = vmatpush2.msra.mxu0 %v5658_v10  ;;  %1843 = vmatpush2.msra.mxu1 %v5659_v4  ;;  %v5686_v10 = vld [vmem:[#allocation177_spill] sm:$0xff] }
 0x3de   :  { %1773 = vmatprep.subr.mxu0 %v5660_v13  ;;  %1844 = vmatprep.subr.mxu1 %v5661_v9  ;;  %v5687_v13 = vld [vmem:[#allocation175_spill] sm:$0xff] }
 0x3df   :  { %1774 = vmatpush2.msra.mxu0 %v5662_v11  ;;  %1845 = vmatpush2.msra.mxu1 %v5663_v3 }
 0x3e0   :  { %1775 = vmatprep.subr.mxu0 %v5664_v2  ;;  %1846 = vmatprep.subr.mxu1 %v5665_v16 }
 0x3e1   :  { %1776 = vmatpush2.msra.mxu0 %v5666_v18  ;;  %1847 = vmatpush2.msra.mxu1 %v5667_v15 }
 0x3e2   :  { %1777 = vmatprep.subr.mxu0 %v5668_v17  ;;  %1848 = vmatprep.subr.mxu1 %v5669_v14 }
 0x3e3   :  { %1778 = vmatpush2.msra.mxu0 %v5670_v46  ;;  %1849 = vmatpush2.msra.mxu1 %v5671_v0 }
 0x3e4   :  { %1779 = vmatprep.subr.mxu0 %v5672_v61  ;;  %1850 = vmatprep.subr.mxu1 %v5673_v12 }
 0x3e5   :  { %1780 = vmatpush2.msra.mxu0 %v5674_v62  ;;  %1851 = vmatpush2.msra.mxu1 %v5675_v5 }
 0x3e6   :  { %1781 = vmatprep.subr.mxu0 %v5676_v8  ;;  %1852 = vmatprep.subr.mxu1 %v5677_v20 }
 0x3e7   :  { %1782 = vmatpush2.msra.mxu0 %v5678_v21  ;;  %1853 = vmatpush2.msra.mxu1 %v5679_v22 }
 0x3e8   :  { %1885 = vmatprep.subr.mxu0 %v2641_v23  ;;  %1956 = vmatprep.subr.mxu1 %v2642_v24  ;;  %v2643_v23 = vld [vmem:[#allocation5 + $0x1e0] sm:$0xff]  ;;  %v2644_v24 = vld [vmem:[#allocation5 + $0x1f0] sm:$0xff] }
 0x446   :  { %v1449_v25 = vpop.f32.mrf.mxu0  ;;  %v1520_v33 = vpop.f32.mrf.mxu1 }
 0x447   :  { %v1450_v27 = vadd.f32 %v1449_v25, %v5680_v26  ;;  %v1521_v52 = vadd.f32 %v1520_v33, %v5683_v49  ;;  %v2645_v25 = vld [vmem:[#allocation5 + $0x1c8] sm:$0xff]  ;;  %v2651_v33 = vld [vmem:[#allocation5 + $0x1a0] sm:$0xff] }
 0x448   :  { %v1451_v28 = vpop.f32.mrf.mxu0  ;;  %v1522_v35 = vpop.f32.mrf.mxu1 }
 0x449   :  { %v2267_v30 = vmul.f32 -1.442695, %v1450_v27  ;;  %v1452_v32 = vadd.f32 %v1451_v28, %v5681_v31  ;;  %v1523_v37 = vadd.f32 %v1522_v35, %v5682_v36  ;;  %v2647_v27 = vld [vmem:[#allocation5 + $0x1c0] sm:$0xff]  ;;  %v2648_v28 = vld [vmem:[#allocation5 + $0x1d0] sm:$0xff]  ;;  %v2653_v35 = vld [vmem:[#allocation5 + $0x188] sm:$0xff] }
 0x44b   :  { %2369 = vpow2.f32 %v2267_v30  ;;  %v2268_v34 = vmul.f32 -1.442695, %v1452_v32  ;;  %v2269_v38 = vmul.f32 -1.442695, %v1523_v37  ;;  %v2649_v30 = vld [vmem:[#allocation5 + $0x1a8] sm:$0xff]  ;;  %v2650_v32 = vld [vmem:[#allocation5 + $0x1b8] sm:$0xff] }
 0x44c   :  { %v2654_v37 = vld [vmem:[#allocation5 + $0x198] sm:$0xff] }
 0x44d   :  { %2371 = vpow2.f32 %v2268_v34  ;;  %v2652_v34 = vld [vmem:[#allocation5 + $0x1b0] sm:$0xff] }
 0x44e   :  { %2373 = vpow2.f32 %v2269_v38  ;;  %v2655_v38 = vld [vmem:[#allocation5 + $0x180] sm:$0xff] }
 0x458   :  { %v2370_v39 = vpop.eup %2369 }
 0x459   :  { %v1528_v56 = vadd.f32 1.0, %v2370_v39  ;;  %v2656_v39 = vld [vmem:[#allocation5 + $0x190] sm:$0xff] }
 0x45a   :  { %v2372_v43 = vpop.eup %2371 }
 0x45b   :  { %2375 = vrcp.f32 %v1528_v56  ;;  %v1534_v29 = vadd.f32 1.0, %v2372_v43  ;;  %v2374_v41 = vpop.eup %2373  ;;  %v2658_v56 = vld [vmem:[#allocation5 + $0x178] sm:$0xff]  ;;  %v2659_v43 = vld [vmem:[#allocation5 + $0x160] sm:$0xff] }
 0x45c   :  { %2377 = vtanh.f32 %v1521_v52  ;;  %v1541_v53 = vadd.f32 1.0, %v2374_v41  ;;  %v2657_v52 = vld [vmem:[#allocation5 + $0x168] sm:$0xff] }
 0x45d   :  { %2379 = vrcp.f32 %v1534_v29  ;;  %v2660_v29 = vld [vmem:[#allocation5 + $0x170] sm:$0xff]  ;;  %v2661_v41 = vld [vmem:[#allocation5 + $0x148] sm:$0xff] }
 0x467   :  { %v1615_v6 = vpop.f32.mrf.mxu0  ;;  %v1686_v54 = vpop.f32.mrf.mxu1 }
 0x468   :  { %v2376_v40 = vpop.eup %2375  ;;  %v1691_v47 = vadd.f32 %v1615_v6, %v5684_v48  ;;  %v1693_v9 = vadd.f32 %v1686_v54, %v5687_v13  ;;  %v2662_v6 = vld [vmem:[#allocation5 + $0x158] sm:$0xff]  ;;  %v2664_v48 = vld [vmem:[#allocation5 + $0x150] sm:$0xff]  ;;  %v2675_v54 = vld [vmem:[#allocation5 + $0xe0] sm:$0xff] }
 0x469   :  { %v2378_v57 = vpop.eup %2377  ;;  %v1617_v45 = vpop.f32.mrf.mxu0  ;;  %v2680_v13 = vld [vmem:[#allocation5 + $0xd0] sm:$0xff] }
 0x46a   :  { %v2380_v59 = vpop.eup %2379  ;;  %v2270_v60 = vmul.f32 -1.442695, %v1691_v47  ;;  %v1692_v44 = vadd.f32 %v1617_v45, %v5685_v42  ;;  %v1545_v63 = vmul.f32 %v2378_v57, %v2376_v40  ;;  %v1688_v55 = vpop.f32.mrf.mxu1  ;;  %v2663_v40 = vld [vmem:[#allocation5 + $0x140] sm:$0xff]  ;;  %v2665_v47 = vld [vmem:[#allocation5 + $0x128] sm:$0xff]  ;;  %v2666_v57 = vld [vmem:[#allocation5 + $0x138] sm:$0xff] }
 0x46b   :  { %v1544_v58 = vmul.f32 %v2380_v59, %v4466_v50  ;;  %v1694_v4 = vadd.f32 %v1688_v55, %v5686_v10  ;;  %v2667_v45 = vld [vmem:[#allocation5 + $0x120] sm:$0xff]  ;;  %v2668_v59 = vld [vmem:[#allocation5 + $0x130] sm:$0xff]  ;;  %v2670_v42 = vld [vmem:[#allocation5 + $0x118] sm:$0xff] }
 0x46c   :  { %2381 = vpow2.f32 %v2270_v60  ;;  %v2271_v7 = vmul.f32 -1.442695, %v1692_v44  ;;  %v2669_v60 = vld [vmem:[#allocation5 + $0x108] sm:$0xff]  ;;  %v2671_v44 = vld [vmem:[#allocation5 + $0x100] sm:$0xff]  ;;  %v2678_v10 = vld [vmem:[#allocation5 + $0xd8] sm:$0xff] }
 0x46d   :  { %v4680_v1 = vadd.f32 %v1545_v63, %v1544_v58  ;;  %v2272_v11 = vmul.f32 -1.442695, %v1694_v4  ;;  %v2672_v63 = vld [vmem:[#allocation5 + $0x110] sm:$0xff]  ;;  %v2673_v58 = vld [vmem:[#allocation5 + $0xe8] sm:$0xff]  ;;  %v2679_v4 = vld [vmem:[#allocation5 + $0xc0] sm:$0xff] }
 0x46e   :  { %2383 = vpow2.f32 %v2271_v7  ;;  %v2676_v7 = vld [vmem:[#allocation5 + $0xf0] sm:$0xff]  ;;  %v2677_v55 = vld [vmem:[#allocation5 + $0xc8] sm:$0xff] }
 0x46f   :  { %2385 = vrcp.f32 %v1541_v53  ;;  %v2674_v53 = vld [vmem:[#allocation5 + $0xf8] sm:$0xff] }
 0x470   :  { %2387 = vtanh.f32 %v4680_v1 }
 0x471   :  { %2389 = vtanh.f32 %v1693_v9  ;;  %v2681_v9 = vld [vmem:[#allocation5 + $0xa8] sm:$0xff] }
 0x472   :  { %2391 = vpow2.f32 %v2272_v11  ;;  %v2682_v11 = vld [vmem:[#allocation5 + $0xb8] sm:$0xff] }
 0x479   :  { %v2382_v3 = vpop.eup %2381 }
 0x47a   :  { %v1698_v2 = vadd.f32 1.0, %v2382_v3  ;;  %v2683_v3 = vld [vmem:[#allocation5 + $0xa0] sm:$0xff] }
 0x47b   :  { %v2384_v50 = vpop.eup %2383 }
 0x47c   :  { %v2386_v16 = vpop.eup %2385  ;;  %2393 = vrcp.f32 %v1698_v2  ;;  %v1704_v18 = vadd.f32 1.0, %v2384_v50  ;;  %v2684_v2 = vld [vmem:[#allocation5 + $0xb0] sm:$0xff]  ;;  %v2685_v50 = vld [vmem:[#allocation5 + $0x88] sm:$0xff] }
 0x47d   :  { %v2388_v15 = vpop.eup %2387 }
 0x47e   :  { %2395 = vrcp.f32 %v1704_v18  ;;  %v1548_v17 = vmul.f32 %v2388_v15, %v2386_v16  ;;  %v2390_v14 = vpop.eup %2389  ;;  %v2686_v16 = vld [vmem:[#allocation5 + $0x98] sm:$0xff]  ;;  %v2687_v18 = vld [vmem:[#allocation5 + $0x80] sm:$0xff]  ;;  %v2688_v15 = vld [vmem:[#allocation5 + $0x90] sm:$0xff] }
 0x47f   :  { %v2392_v46 = vpop.eup %2391 }
 0x480   :  { %1783 = vmatprep.mubr.f32.mxu0 %v1548_v17  ;;  %1854 = vmatprep.mubr.f32.mxu1 %v1548_v17  ;;  %v1711_v62 = vadd.f32 1.0, %v2392_v46  ;;  %v2689_v17 = vld [vmem:[#allocation5 + $0x68] sm:$0xff]  ;;  %v2691_v46 = vld [vmem:[#allocation5 + $0x60] sm:$0xff] }
 0x482   :  { %2397 = vrcp.f32 %v1711_v62  ;;  %v2695_v62 = vld [vmem:[#allocation5 + $0x40] sm:$0xff] }
 0x489   :  { %v2394_v0 = vpop.eup %2393 }
 0x48a   :  { %v1715_v61 = vmul.f32 %v2394_v0, %v2390_v14  ;;  %v2690_v14 = vld [vmem:[#allocation5 + $0x78] sm:$0xff]  ;;  %v2692_v0 = vld [vmem:[#allocation5 + $0x70] sm:$0xff] }
 0x48b   :  { %v2396_v12 = vpop.eup %2395 }
 0x48c   :  { %v1714_v5 = vmul.f32 %v2396_v12, %v4472_v51  ;;  %v2646_v51 = vld [vmem:[#allocation5 + $0x1d8] sm:$0xff] }
 0x48d   :  { %v2694_v12 = vld [vmem:[#allocation5 + $0x58] sm:$0xff] }
 0x48e   :  { %v4686_v8 = vadd.f32 %v1715_v61, %v1714_v5  ;;  %v2693_v61 = vld [vmem:[#allocation5 + $0x48] sm:$0xff]  ;;  %v2696_v5 = vld [vmem:[#allocation5 + $0x50] sm:$0xff] }
 0x48f   :  { %v2398_v20 = vpop.eup %2397 }
 0x490   :  { %2399 = vtanh.f32 %v4686_v8 }
 0x49d   :  { %v2400_v21 = vpop.eup %2399 }
 0x49e   :  { %v4689_v22 = vmul.f32 %v2400_v21, %v2398_v20  ;;  %v2697_v20 = vld [vmem:[#allocation5 + $0x28] sm:$0xff]  ;;  %v2698_v21 = vld [vmem:[#allocation5 + $0x38] sm:$0xff] }
 0x4a0   :  { %1784 = vmatmul.mubr.f32.vlgmr.msra.gmra.mxu0 %v4689_v22  ;;  %1855 = vmatmul.mubr.f32.vlgmr.msra.gmra.mxu1 %v4689_v22 }
 0x4a1   :  { %1886 = vmatpush1.msra.mxu0 %v2643_v23  ;;  %1957 = vmatpush1.msra.mxu1 %v2644_v24  ;;  %v2699_v23 = vld [vmem:[#allocation5 + $0x20] sm:$0xff]  ;;  %v2700_v24 = vld [vmem:[#allocation5 + $0x30] sm:$0xff] }
 0x4a2   :  { %1887 = vmatprep.subr.mxu0 %v2645_v25  ;;  %1958 = vmatprep.subr.mxu1 %v2646_v51  ;;  %v2701_v25 = vld [vmem:[#allocation5 + $0x8] sm:$0xff]  ;;  %v2702_v51 = vld [vmem:[#allocation5 + $0x18] sm:$0xff] }
 0x4a3   :  { %1888 = vmatpush1.msra.mxu0 %v2647_v27  ;;  %1959 = vmatpush1.msra.mxu1 %v2648_v28  ;;  %v2703_v27 = vld [vmem:[#allocation5] sm:$0xff]  ;;  %v2704_v28 = vld [vmem:[#allocation5 + $0x10] sm:$0xff] }
 0x4a4   :  { %1889 = vmatprep.subr.mxu0 %v2649_v30  ;;  %1960 = vmatprep.subr.mxu1 %v2650_v32  ;;  %v2705_v30 = vld [vmem:[#allocation7 + $0x1e8] sm:$0xff]  ;;  %v2706_v32 = vld [vmem:[#allocation7 + $0x1f8] sm:$0xff] }
 0x4a5   :  { %1890 = vmatpush1.msra.mxu0 %v2651_v33  ;;  %1961 = vmatpush1.msra.mxu1 %v2652_v34  ;;  %v2707_v33 = vld [vmem:[#allocation7 + $0x1e0] sm:$0xff]  ;;  %v2708_v34 = vld [vmem:[#allocation7 + $0x1f0] sm:$0xff] }
 0x4a6   :  { %1891 = vmatprep.subr.mxu0 %v2653_v35  ;;  %1962 = vmatprep.subr.mxu1 %v2654_v37  ;;  %v2709_v35 = vld [vmem:[#allocation7 + $0x1c8] sm:$0xff]  ;;  %v2710_v37 = vld [vmem:[#allocation7 + $0x1d8] sm:$0xff] }
 0x4a7   :  { %1892 = vmatpush1.msra.mxu0 %v2655_v38  ;;  %1963 = vmatpush1.msra.mxu1 %v2656_v39  ;;  %v2711_v38 = vld [vmem:[#allocation7 + $0x1c0] sm:$0xff]  ;;  %v2712_v39 = vld [vmem:[#allocation7 + $0x1d0] sm:$0xff] }
 0x4a8   :  { %1893 = vmatprep.subr.mxu0 %v2657_v52  ;;  %1964 = vmatprep.subr.mxu1 %v2658_v56  ;;  %v2714_v52 = vld [vmem:[#allocation7 + $0x1b8] sm:$0xff]  ;;  %v2716_v56 = vld [vmem:[#allocation7 + $0x1b0] sm:$0xff] }
 0x4a9   :  { %1894 = vmatpush1.msra.mxu0 %v2659_v43  ;;  %1965 = vmatpush1.msra.mxu1 %v2660_v29  ;;  %v2717_v43 = vld [vmem:[#allocation7 + $0x188] sm:$0xff]  ;;  %v2718_v29 = vld [vmem:[#allocation7 + $0x198] sm:$0xff] }
 0x4aa   :  { %1895 = vmatprep.subr.mxu0 %v2661_v41  ;;  %1966 = vmatprep.subr.mxu1 %v2662_v6  ;;  %v2719_v41 = vld [vmem:[#allocation7 + $0x180] sm:$0xff]  ;;  %v2720_v6 = vld [vmem:[#allocation7 + $0x190] sm:$0xff] }
 0x4ab   :  { %1896 = vmatpush1.msra.mxu0 %v2663_v40  ;;  %1967 = vmatpush1.msra.mxu1 %v2664_v48  ;;  %v2721_v40 = vld [vmem:[#allocation7 + $0x168] sm:$0xff]  ;;  %v2722_v48 = vld [vmem:[#allocation7 + $0x178] sm:$0xff] }
 0x4ac   :  { %1897 = vmatprep.subr.mxu0 %v2665_v47  ;;  %1968 = vmatprep.subr.mxu1 %v2666_v57  ;;  %v2723_v47 = vld [vmem:[#allocation7 + $0x160] sm:$0xff]  ;;  %v2724_v57 = vld [vmem:[#allocation7 + $0x170] sm:$0xff] }
 0x4ad   :  { %1898 = vmatpush1.msra.mxu0 %v2667_v45  ;;  %1969 = vmatpush1.msra.mxu1 %v2668_v59  ;;  %v2725_v45 = vld [vmem:[#allocation7 + $0x148] sm:$0xff]  ;;  %v2726_v59 = vld [vmem:[#allocation7 + $0x158] sm:$0xff] }
 0x4ae   :  { %1899 = vmatprep.subr.mxu0 %v2669_v60  ;;  %1970 = vmatprep.subr.mxu1 %v2670_v42  ;;  %v2727_v60 = vld [vmem:[#allocation7 + $0x140] sm:$0xff]  ;;  %v2728_v42 = vld [vmem:[#allocation7 + $0x150] sm:$0xff] }
 0x4af   :  { %1900 = vmatpush1.msra.mxu0 %v2671_v44  ;;  %1971 = vmatpush1.msra.mxu1 %v2672_v63  ;;  %v2729_v44 = vld [vmem:[#allocation7 + $0x128] sm:$0xff]  ;;  %v2730_v63 = vld [vmem:[#allocation7 + $0x138] sm:$0xff] }
 0x4b0   :  { %1901 = vmatprep.subr.mxu0 %v2673_v58  ;;  %1972 = vmatprep.subr.mxu1 %v2674_v53  ;;  %v2731_v58 = vld [vmem:[#allocation7 + $0x120] sm:$0xff]  ;;  %v2732_v53 = vld [vmem:[#allocation7 + $0x130] sm:$0xff] }
 0x4b1   :  { %1902 = vmatpush1.msra.mxu0 %v2675_v54  ;;  %1973 = vmatpush1.msra.mxu1 %v2676_v7  ;;  %v2733_v54 = vld [vmem:[#allocation7 + $0x108] sm:$0xff]  ;;  %v2734_v7 = vld [vmem:[#allocation7 + $0x118] sm:$0xff] }
 0x4b2   :  { %1903 = vmatprep.subr.mxu0 %v2677_v55  ;;  %1974 = vmatprep.subr.mxu1 %v2678_v10  ;;  %v2735_v55 = vld [vmem:[#allocation7 + $0x100] sm:$0xff]  ;;  %v2736_v10 = vld [vmem:[#allocation7 + $0x110] sm:$0xff] }
 0x4b3   :  { %1904 = vmatpush1.msra.mxu0 %v2679_v4  ;;  %1975 = vmatpush1.msra.mxu1 %v2680_v13  ;;  %v2737_v4 = vld [vmem:[#allocation7 + $0xe8] sm:$0xff]  ;;  %v2738_v13 = vld [vmem:[#allocation7 + $0xf8] sm:$0xff] }
 0x4b4   :  { %1905 = vmatprep.subr.mxu0 %v2681_v9  ;;  %1976 = vmatprep.subr.mxu1 %v2682_v11  ;;  %v2739_v9 = vld [vmem:[#allocation7 + $0xe0] sm:$0xff]  ;;  %v2740_v11 = vld [vmem:[#allocation7 + $0xf0] sm:$0xff] }
 0x4b5   :  { %1906 = vmatpush1.msra.mxu0 %v2683_v3  ;;  %1977 = vmatpush1.msra.mxu1 %v2684_v2  ;;  %v2741_v3 = vld [vmem:[#allocation7 + $0xc8] sm:$0xff]  ;;  %v2742_v2 = vld [vmem:[#allocation7 + $0xd8] sm:$0xff] }
 0x4b6   :  { %1907 = vmatprep.subr.mxu0 %v2685_v50  ;;  %1978 = vmatprep.subr.mxu1 %v2686_v16  ;;  %v2743_v50 = vld [vmem:[#allocation7 + $0xc0] sm:$0xff]  ;;  %v2744_v16 = vld [vmem:[#allocation7 + $0xd0] sm:$0xff] }
 0x4b7   :  { %1908 = vmatpush1.msra.mxu0 %v2687_v18  ;;  %1979 = vmatpush1.msra.mxu1 %v2688_v15  ;;  %v2745_v18 = vld [vmem:[#allocation7 + $0xa8] sm:$0xff]  ;;  %v2746_v15 = vld [vmem:[#allocation7 + $0xb8] sm:$0xff] }
 0x4b8   :  { %1909 = vmatprep.subr.mxu0 %v2689_v17  ;;  %1980 = vmatprep.subr.mxu1 %v2690_v14  ;;  %v2747_v17 = vld [vmem:[#allocation7 + $0xa0] sm:$0xff]  ;;  %v2748_v14 = vld [vmem:[#allocation7 + $0xb0] sm:$0xff] }
 0x4b9   :  { %1910 = vmatpush1.msra.mxu0 %v2691_v46  ;;  %1981 = vmatpush1.msra.mxu1 %v2692_v0  ;;  %v2749_v46 = vld [vmem:[#allocation7 + $0x88] sm:$0xff]  ;;  %v2750_v0 = vld [vmem:[#allocation7 + $0x98] sm:$0xff] }
 0x4ba   :  { %1911 = vmatprep.subr.mxu0 %v2693_v61  ;;  %1982 = vmatprep.subr.mxu1 %v2694_v12  ;;  %v2751_v61 = vld [vmem:[#allocation7 + $0x80] sm:$0xff]  ;;  %v2752_v12 = vld [vmem:[#allocation7 + $0x90] sm:$0xff] }
 0x4bb   :  { %1912 = vmatpush1.msra.mxu0 %v2695_v62  ;;  %1983 = vmatpush1.msra.mxu1 %v2696_v5  ;;  %v2753_v62 = vld [vmem:[#allocation7 + $0x68] sm:$0xff]  ;;  %v2754_v5 = vld [vmem:[#allocation7 + $0x78] sm:$0xff] }
 0x4bc   :  { %1913 = vmatprep.subr.mxu0 %v2697_v20  ;;  %1984 = vmatprep.subr.mxu1 %v2698_v21  ;;  %v2755_v20 = vld [vmem:[#allocation7 + $0x60] sm:$0xff]  ;;  %v2756_v21 = vld [vmem:[#allocation7 + $0x70] sm:$0xff] }
 0x4bd   :  { %1914 = vmatpush1.msra.mxu0 %v2699_v23  ;;  %1985 = vmatpush1.msra.mxu1 %v2700_v24  ;;  %v2757_v23 = vld [vmem:[#allocation7 + $0x48] sm:$0xff]  ;;  %v2758_v24 = vld [vmem:[#allocation7 + $0x58] sm:$0xff] }
 0x4be   :  { %1915 = vmatprep.subr.mxu0 %v2701_v25  ;;  %1986 = vmatprep.subr.mxu1 %v2702_v51  ;;  %v2759_v25 = vld [vmem:[#allocation7 + $0x40] sm:$0xff]  ;;  %v2760_v51 = vld [vmem:[#allocation7 + $0x50] sm:$0xff] }
 0x4bf   :  { %1916 = vmatpush1.msra.mxu0 %v2703_v27  ;;  %1949 = vmatprep.mubr.f32.mxu0 %v5550_v19  ;;  %v2761_v27 = vld [vmem:[#allocation7 + $0x28] sm:$0xff] }
 0x4c0   :  { %1987 = vmatpush1.msra.mxu1 %v2704_v28  ;;  %2020 = vmatprep.mubr.f32.mxu1 %v5550_v19  ;;  %v2713_v19 = vld [vmem:[#allocation7 + $0x1a8] sm:$0xff]  ;;  %v2762_v28 = vld [vmem:[#allocation7 + $0x38] sm:$0xff] }
 0x4c1   :  { %1950 = vmatmul.mubr.f32.vlgmr.msra.gmra.mxu0 %v4689_v22  ;;  %2021 = vmatmul.mubr.f32.vlgmr.msra.gmra.mxu1 %v4689_v22  ;;  %v2715_v22 = vld [vmem:[#allocation7 + $0x1a0] sm:$0xff] }
 0x4c2   :  { %2055 = vmatprep.subr.mxu0 %v2705_v30  ;;  %2126 = vmatprep.subr.mxu1 %v2706_v32  ;;  %v2763_v30 = vld [vmem:[#allocation7 + $0x20] sm:$0xff]  ;;  %v2764_v32 = vld [vmem:[#allocation7 + $0x30] sm:$0xff] }
 0x4c3   :  { %2056 = vmatpush1.msra.mxu0 %v2707_v33  ;;  %2127 = vmatpush1.msra.mxu1 %v2708_v34  ;;  %v2765_v33 = vld [vmem:[#allocation7 + $0x8] sm:$0xff]  ;;  %v2766_v34 = vld [vmem:[#allocation7 + $0x18] sm:$0xff] }
 0x4c4   :  { %2057 = vmatprep.subr.mxu0 %v2709_v35  ;;  %2128 = vmatprep.subr.mxu1 %v2710_v37  ;;  %v2767_v35 = vld [vmem:[#allocation7] sm:$0xff]  ;;  %v2768_v37 = vld [vmem:[#allocation7 + $0x10] sm:$0xff] }
 0x4c5   :  { %2058 = vmatpush1.msra.mxu0 %v2711_v38  ;;  %2129 = vmatpush1.msra.mxu1 %v2712_v39  ;;  %v2769_v38 = vld [vmem:[#allocation7 + $0x3e8] sm:$0xff]  ;;  %v2770_v39 = vld [vmem:[#allocation7 + $0x3f8] sm:$0xff] }
 0x4c6   :  { %2059 = vmatprep.subr.mxu0 %v2713_v19  ;;  %2130 = vmatprep.subr.mxu1 %v2714_v52  ;;  %v2771_v19 = vld [vmem:[#allocation7 + $0x3e0] sm:$0xff]  ;;  %v2772_v52 = vld [vmem:[#allocation7 + $0x3f0] sm:$0xff] }
 0x4c7   :  { %2060 = vmatpush1.msra.mxu0 %v2715_v22  ;;  %2131 = vmatpush1.msra.mxu1 %v2716_v56  ;;  %v2773_v22 = vld [vmem:[#allocation7 + $0x3c8] sm:$0xff]  ;;  %v2774_v56 = vld [vmem:[#allocation7 + $0x3d8] sm:$0xff] }
 0x4c8   :  { %2061 = vmatprep.subr.mxu0 %v2717_v43  ;;  %2132 = vmatprep.subr.mxu1 %v2718_v29  ;;  %v2775_v43 = vld [vmem:[#allocation7 + $0x3c0] sm:$0xff]  ;;  %v2776_v29 = vld [vmem:[#allocation7 + $0x3d0] sm:$0xff] }
 0x4c9   :  { %2062 = vmatpush1.msra.mxu0 %v2719_v41  ;;  %2133 = vmatpush1.msra.mxu1 %v2720_v6  ;;  %v2777_v41 = vld [vmem:[#allocation7 + $0x3a8] sm:$0xff]  ;;  %v2778_v6 = vld [vmem:[#allocation7 + $0x3b8] sm:$0xff] }
 0x4ca   :  { %2063 = vmatprep.subr.mxu0 %v2721_v40  ;;  %2134 = vmatprep.subr.mxu1 %v2722_v48  ;;  %v2779_v40 = vld [vmem:[#allocation7 + $0x3a0] sm:$0xff]  ;;  %v2780_v48 = vld [vmem:[#allocation7 + $0x3b0] sm:$0xff] }
 0x4cb   :  { %2064 = vmatpush1.msra.mxu0 %v2723_v47  ;;  %2135 = vmatpush1.msra.mxu1 %v2724_v57  ;;  %v2781_v47 = vld [vmem:[#allocation7 + $0x388] sm:$0xff]  ;;  %v2782_v57 = vld [vmem:[#allocation7 + $0x398] sm:$0xff] }
 0x4cc   :  { %2065 = vmatprep.subr.mxu0 %v2725_v45  ;;  %2136 = vmatprep.subr.mxu1 %v2726_v59  ;;  %v2783_v45 = vld [vmem:[#allocation7 + $0x380] sm:$0xff]  ;;  %v2784_v59 = vld [vmem:[#allocation7 + $0x390] sm:$0xff] }
 0x4cd   :  { %2066 = vmatpush1.msra.mxu0 %v2727_v60  ;;  %2137 = vmatpush1.msra.mxu1 %v2728_v42  ;;  %v2785_v60 = vld [vmem:[#allocation7 + $0x368] sm:$0xff]  ;;  %v2786_v42 = vld [vmem:[#allocation7 + $0x378] sm:$0xff] }
 0x4ce   :  { %2067 = vmatprep.subr.mxu0 %v2729_v44  ;;  %2138 = vmatprep.subr.mxu1 %v2730_v63  ;;  %v2787_v44 = vld [vmem:[#allocation7 + $0x360] sm:$0xff]  ;;  %v2788_v63 = vld [vmem:[#allocation7 + $0x370] sm:$0xff] }
 0x4cf   :  { %2068 = vmatpush1.msra.mxu0 %v2731_v58  ;;  %2139 = vmatpush1.msra.mxu1 %v2732_v53  ;;  %v2789_v58 = vld [vmem:[#allocation7 + $0x348] sm:$0xff]  ;;  %v2790_v53 = vld [vmem:[#allocation7 + $0x358] sm:$0xff] }
 0x4d0   :  { %2069 = vmatprep.subr.mxu0 %v2733_v54  ;;  %2140 = vmatprep.subr.mxu1 %v2734_v7  ;;  %v2791_v54 = vld [vmem:[#allocation7 + $0x340] sm:$0xff]  ;;  %v2792_v7 = vld [vmem:[#allocation7 + $0x350] sm:$0xff] }
 0x4d1   :  { %2070 = vmatpush1.msra.mxu0 %v2735_v55  ;;  %2141 = vmatpush1.msra.mxu1 %v2736_v10  ;;  %v2793_v55 = vld [vmem:[#allocation7 + $0x328] sm:$0xff]  ;;  %v2794_v10 = vld [vmem:[#allocation7 + $0x338] sm:$0xff] }
 0x4d2   :  { %2071 = vmatprep.subr.mxu0 %v2737_v4  ;;  %2142 = vmatprep.subr.mxu1 %v2738_v13  ;;  %v2795_v4 = vld [vmem:[#allocation7 + $0x320] sm:$0xff]  ;;  %v2796_v13 = vld [vmem:[#allocation7 + $0x330] sm:$0xff] }
 0x4d3   :  { %2072 = vmatpush1.msra.mxu0 %v2739_v9  ;;  %2143 = vmatpush1.msra.mxu1 %v2740_v11  ;;  %v2797_v9 = vld [vmem:[#allocation7 + $0x308] sm:$0xff]  ;;  %v2798_v11 = vld [vmem:[#allocation7 + $0x318] sm:$0xff] }
 0x4d4   :  { %2073 = vmatprep.subr.mxu0 %v2741_v3  ;;  %2144 = vmatprep.subr.mxu1 %v2742_v2  ;;  %v2799_v3 = vld [vmem:[#allocation7 + $0x300] sm:$0xff]  ;;  %v2800_v2 = vld [vmem:[#allocation7 + $0x310] sm:$0xff] }
 0x4d5   :  { %2074 = vmatpush1.msra.mxu0 %v2743_v50  ;;  %2145 = vmatpush1.msra.mxu1 %v2744_v16  ;;  %v2801_v50 = vld [vmem:[#allocation7 + $0x2e8] sm:$0xff]  ;;  %v2802_v16 = vld [vmem:[#allocation7 + $0x2f8] sm:$0xff] }
 0x4d6   :  { %2075 = vmatprep.subr.mxu0 %v2745_v18  ;;  %2146 = vmatprep.subr.mxu1 %v2746_v15  ;;  %v2803_v18 = vld [vmem:[#allocation7 + $0x2e0] sm:$0xff]  ;;  %v2804_v15 = vld [vmem:[#allocation7 + $0x2f0] sm:$0xff] }
 0x4d7   :  { %2076 = vmatpush1.msra.mxu0 %v2747_v17  ;;  %2147 = vmatpush1.msra.mxu1 %v2748_v14  ;;  %v2805_v17 = vld [vmem:[#allocation7 + $0x2c8] sm:$0xff]  ;;  %v2806_v14 = vld [vmem:[#allocation7 + $0x2d8] sm:$0xff] }
 0x4d8   :  { %2077 = vmatprep.subr.mxu0 %v2749_v46  ;;  %2148 = vmatprep.subr.mxu1 %v2750_v0  ;;  %v2807_v46 = vld [vmem:[#allocation7 + $0x2c0] sm:$0xff]  ;;  %v2808_v0 = vld [vmem:[#allocation7 + $0x2d0] sm:$0xff] }
 0x4d9   :  { %2078 = vmatpush1.msra.mxu0 %v2751_v61  ;;  %2149 = vmatpush1.msra.mxu1 %v2752_v12  ;;  %v2809_v61 = vld [vmem:[#allocation7 + $0x2a8] sm:$0xff]  ;;  %v2810_v12 = vld [vmem:[#allocation7 + $0x2b8] sm:$0xff] }
 0x4da   :  { %2079 = vmatprep.subr.mxu0 %v2753_v62  ;;  %2150 = vmatprep.subr.mxu1 %v2754_v5  ;;  %v2811_v62 = vld [vmem:[#allocation7 + $0x2a0] sm:$0xff]  ;;  %v2812_v5 = vld [vmem:[#allocation7 + $0x2b0] sm:$0xff] }
 0x4db   :  { %2080 = vmatpush1.msra.mxu0 %v2755_v20  ;;  %2151 = vmatpush1.msra.mxu1 %v2756_v21  ;;  %v2813_v20 = vld [vmem:[#allocation7 + $0x288] sm:$0xff]  ;;  %v2814_v21 = vld [vmem:[#allocation7 + $0x298] sm:$0xff] }
 0x4dc   :  { %2081 = vmatprep.subr.mxu0 %v2757_v23  ;;  %2152 = vmatprep.subr.mxu1 %v2758_v24  ;;  %v2815_v23 = vld [vmem:[#allocation7 + $0x280] sm:$0xff]  ;;  %v2816_v24 = vld [vmem:[#allocation7 + $0x290] sm:$0xff] }
 0x4dd   :  { %2082 = vmatpush1.msra.mxu0 %v2759_v25  ;;  %2153 = vmatpush1.msra.mxu1 %v2760_v51  ;;  %v2817_v25 = vld [vmem:[#allocation7 + $0x268] sm:$0xff]  ;;  %v2818_v51 = vld [vmem:[#allocation7 + $0x278] sm:$0xff] }
 0x4de   :  { %2083 = vmatprep.subr.mxu0 %v2761_v27  ;;  %2154 = vmatprep.subr.mxu1 %v2762_v28  ;;  %v2819_v27 = vld [vmem:[#allocation7 + $0x260] sm:$0xff]  ;;  %v2820_v28 = vld [vmem:[#allocation7 + $0x270] sm:$0xff] }
 0x4df   :  { %2084 = vmatpush1.msra.mxu0 %v2763_v30  ;;  %2155 = vmatpush1.msra.mxu1 %v2764_v32  ;;  %v2821_v30 = vld [vmem:[#allocation7 + $0x248] sm:$0xff]  ;;  %v2822_v32 = vld [vmem:[#allocation7 + $0x258] sm:$0xff] }
 0x4e0   :  { %2085 = vmatprep.subr.mxu0 %v2765_v33  ;;  %2156 = vmatprep.subr.mxu1 %v2766_v34  ;;  %v2823_v33 = vld [vmem:[#allocation7 + $0x240] sm:$0xff]  ;;  %v2824_v34 = vld [vmem:[#allocation7 + $0x250] sm:$0xff] }
 0x4e1   :  { %2086 = vmatpush1.msra.mxu0 %v2767_v35  ;;  %2157 = vmatpush1.msra.mxu1 %v2768_v37  ;;  %v2825_v35 = vld [vmem:[#allocation7 + $0x228] sm:$0xff]  ;;  %v2826_v37 = vld [vmem:[#allocation7 + $0x238] sm:$0xff] }
 0x4e2   :  { %2087 = vmatprep.subr.mxu0 %v2769_v38  ;;  %2158 = vmatprep.subr.mxu1 %v2770_v39  ;;  %v2827_v38 = vld [vmem:[#allocation7 + $0x220] sm:$0xff]  ;;  %v2828_v39 = vld [vmem:[#allocation7 + $0x230] sm:$0xff] }
 0x4e3   :  { %2088 = vmatpush2.msra.mxu0 %v2771_v19  ;;  %2159 = vmatpush2.msra.mxu1 %v2772_v52  ;;  %v2829_v19 = vld [vmem:[#allocation7 + $0x208] sm:$0xff]  ;;  %v2830_v52 = vld [vmem:[#allocation7 + $0x218] sm:$0xff] }
 0x4e4   :  { %2089 = vmatprep.subr.mxu0 %v2773_v22  ;;  %2160 = vmatprep.subr.mxu1 %v2774_v56  ;;  %v2831_v22 = vld [vmem:[#allocation7 + $0x200] sm:$0xff]  ;;  %v2832_v56 = vld [vmem:[#allocation7 + $0x210] sm:$0xff] }
 0x4e5   :  { %2090 = vmatpush2.msra.mxu0 %v2775_v43  ;;  %2161 = vmatpush2.msra.mxu1 %v2776_v29 }
 0x4e6   :  { %2091 = vmatprep.subr.mxu0 %v2777_v41  ;;  %2162 = vmatprep.subr.mxu1 %v2778_v6 }
 0x4e7   :  { %2092 = vmatpush2.msra.mxu0 %v2779_v40  ;;  %2163 = vmatpush2.msra.mxu1 %v2780_v48 }
 0x4e8   :  { %2093 = vmatprep.subr.mxu0 %v2781_v47  ;;  %2164 = vmatprep.subr.mxu1 %v2782_v57 }
 0x4e9   :  { %2094 = vmatpush2.msra.mxu0 %v2783_v45  ;;  %2165 = vmatpush2.msra.mxu1 %v2784_v59 }
 0x4ea   :  { %2095 = vmatprep.subr.mxu0 %v2785_v60  ;;  %2166 = vmatprep.subr.mxu1 %v2786_v42 }
 0x4eb   :  { %2096 = vmatpush2.msra.mxu0 %v2787_v44  ;;  %2167 = vmatpush2.msra.mxu1 %v2788_v63 }
 0x4ec   :  { %2097 = vmatprep.subr.mxu0 %v2789_v58  ;;  %2168 = vmatprep.subr.mxu1 %v2790_v53 }
 0x4ed   :  { %2098 = vmatpush2.msra.mxu0 %v2791_v54  ;;  %2169 = vmatpush2.msra.mxu1 %v2792_v7 }
 0x4ee   :  { %2099 = vmatprep.subr.mxu0 %v2793_v55  ;;  %2170 = vmatprep.subr.mxu1 %v2794_v10  ;;  %v5688_v55 = vld [vmem:[#allocation176_spill] sm:$0xff] }
 0x4ef   :  { %2100 = vmatpush2.msra.mxu0 %v2795_v4  ;;  %2171 = vmatpush2.msra.mxu1 %v2796_v13 }
 0x4f0   :  { %2101 = vmatprep.subr.mxu0 %v2797_v9  ;;  %2172 = vmatprep.subr.mxu1 %v2798_v11 }
 0x4f1   :  { %2102 = vmatpush2.msra.mxu0 %v2799_v3  ;;  %2173 = vmatpush2.msra.mxu1 %v2800_v2  ;;  %v5689_v3 = vld [vmem:[#allocation178_spill] sm:$0xff] }
 0x4f2   :  { %2103 = vmatprep.subr.mxu0 %v2801_v50  ;;  %2174 = vmatprep.subr.mxu1 %v2802_v16 }
 0x4f3   :  { %2104 = vmatpush2.msra.mxu0 %v2803_v18  ;;  %2175 = vmatpush2.msra.mxu1 %v2804_v15 }
 0x4f4   :  { %2105 = vmatprep.subr.mxu0 %v2805_v17  ;;  %2176 = vmatprep.subr.mxu1 %v2806_v14 }
 0x4f5   :  { %2106 = vmatpush2.msra.mxu0 %v2807_v46  ;;  %2177 = vmatpush2.msra.mxu1 %v2808_v0  ;;  %v5690_v0 = vld [vmem:[#allocation180_spill] sm:$0xff] }
 0x4f6   :  { %2107 = vmatprep.subr.mxu0 %v2809_v61  ;;  %2178 = vmatprep.subr.mxu1 %v2810_v12  ;;  %v5691_v12 = vld [vmem:[#allocation179_spill] sm:$0xff] }
 0x4f7   :  { %2108 = vmatpush2.msra.mxu0 %v2811_v62  ;;  %2179 = vmatpush2.msra.mxu1 %v2812_v5 }
 0x4f8   :  { %2109 = vmatprep.subr.mxu0 %v2813_v20  ;;  %2180 = vmatprep.subr.mxu1 %v2814_v21 }
 0x4f9   :  { %2110 = vmatpush2.msra.mxu0 %v2815_v23  ;;  %2181 = vmatpush2.msra.mxu1 %v2816_v24 }
 0x4fa   :  { %2111 = vmatprep.subr.mxu0 %v2817_v25  ;;  %2182 = vmatprep.subr.mxu1 %v2818_v51 }
 0x4fb   :  { %2112 = vmatpush2.msra.mxu0 %v2819_v27  ;;  %2183 = vmatpush2.msra.mxu1 %v2820_v28 }
 0x4fc   :  { %2113 = vmatprep.subr.mxu0 %v2821_v30  ;;  %2184 = vmatprep.subr.mxu1 %v2822_v32 }
 0x4fd   :  { %2114 = vmatpush2.msra.mxu0 %v2823_v33  ;;  %2185 = vmatpush2.msra.mxu1 %v2824_v34 }
 0x4fe   :  { %2115 = vmatprep.subr.mxu0 %v2825_v35  ;;  %2186 = vmatprep.subr.mxu1 %v2826_v37 }
 0x4ff   :  { %2116 = vmatpush2.msra.mxu0 %v2827_v38  ;;  %2187 = vmatpush2.msra.mxu1 %v2828_v39 }
 0x500   :  { %2117 = vmatprep.subr.mxu0 %v2829_v19  ;;  %2188 = vmatprep.subr.mxu1 %v2830_v52 }
 0x501   :  { %2118 = vmatpush2.msra.mxu0 %v2831_v22  ;;  %2189 = vmatpush2.msra.mxu1 %v2832_v56 }
 0x560   :  { %v1785_v43 = vpop.f32.mrf.mxu0  ;;  %v1856_v48 = vpop.f32.mrf.mxu1 }
 0x561   :  { %v1786_v29 = vadd.f32 %v1785_v43, %v5680_v26  ;;  %v1857_v42 = vadd.f32 %v1856_v48, %v5683_v49 }
 0x562   :  { %v1787_v41 = vpop.f32.mrf.mxu0  ;;  %v1858_v57 = vpop.f32.mrf.mxu1 }
 0x563   :  { %v2273_v6 = vmul.f32 -1.442695, %v1786_v29  ;;  %v1788_v40 = vadd.f32 %v1787_v41, %v5681_v31  ;;  %v1859_v45 = vadd.f32 %v1858_v57, %v5682_v36 }
 0x565   :  { %2401 = vpow2.f32 %v2273_v6  ;;  %v2274_v47 = vmul.f32 -1.442695, %v1788_v40  ;;  %v2275_v59 = vmul.f32 -1.442695, %v1859_v45 }
 0x567   :  { %2403 = vpow2.f32 %v2274_v47 }
 0x568   :  { %2405 = vpow2.f32 %v2275_v59 }
 0x572   :  { %v2402_v60 = vpop.eup %2401 }
 0x573   :  { %v1864_v44 = vadd.f32 1.0, %v2402_v60 }
 0x574   :  { %v2404_v63 = vpop.eup %2403 }
 0x575   :  { %2407 = vrcp.f32 %v1864_v44  ;;  %v1870_v58 = vadd.f32 1.0, %v2404_v63  ;;  %v2406_v53 = vpop.eup %2405 }
 0x576   :  { %2409 = vtanh.f32 %v1857_v42  ;;  %v1877_v18 = vadd.f32 1.0, %v2406_v53 }
 0x577   :  { %2411 = vrcp.f32 %v1870_v58 }
 0x581   :  { %v1951_v54 = vpop.f32.mrf.mxu0  ;;  %v2022_v15 = vpop.f32.mrf.mxu1 }
 0x582   :  { %v2408_v7 = vpop.eup %2407  ;;  %v2027_v10 = vadd.f32 %v1951_v54, %v5688_v55  ;;  %v2029_v62 = vadd.f32 %v2022_v15, %v5691_v12 }
 0x583   :  { %v2410_v4 = vpop.eup %2409  ;;  %v1953_v13 = vpop.f32.mrf.mxu0 }
 0x584   :  { %v2412_v9 = vpop.eup %2411  ;;  %v2276_v11 = vmul.f32 -1.442695, %v2027_v10  ;;  %v2028_v2 = vadd.f32 %v1953_v13, %v5689_v3  ;;  %v1881_v50 = vmul.f32 %v2410_v4, %v2408_v7  ;;  %v2024_v46 = vpop.f32.mrf.mxu1 }
 0x585   :  { %v1880_v16 = vmul.f32 %v2412_v9, %v4680_v1  ;;  %v2030_v61 = vadd.f32 %v2024_v46, %v5690_v0 }
 0x586   :  { %2413 = vpow2.f32 %v2276_v11  ;;  %v2277_v17 = vmul.f32 -1.442695, %v2028_v2 }
 0x587   :  { %v4704_v14 = vadd.f32 %v1881_v50, %v1880_v16  ;;  %v2278_v5 = vmul.f32 -1.442695, %v2030_v61 }
 0x588   :  { %2415 = vpow2.f32 %v2277_v17 }
 0x589   :  { %2417 = vrcp.f32 %v1877_v18 }
 0x58a   :  { %2419 = vtanh.f32 %v4704_v14 }
 0x58b   :  { %2421 = vtanh.f32 %v2029_v62 }
 0x58c   :  { %2423 = vpow2.f32 %v2278_v5 }
 0x593   :  { %v2414_v20 = vpop.eup %2413 }
 0x594   :  { %v2034_v21 = vadd.f32 1.0, %v2414_v20 }
 0x595   :  { %v2416_v1 = vpop.eup %2415 }
 0x596   :  { %v2418_v23 = vpop.eup %2417  ;;  %2425 = vrcp.f32 %v2034_v21  ;;  %v2040_v24 = vadd.f32 1.0, %v2416_v1 }
 0x597   :  { %v2420_v25 = vpop.eup %2419 }
 0x598   :  { %2427 = vrcp.f32 %v2040_v24  ;;  %v1884_v51 = vmul.f32 %v2420_v25, %v2418_v23  ;;  %v2422_v27 = vpop.eup %2421 }
 0x599   :  { %v2424_v28 = vpop.eup %2423 }
 0x59a   :  { %2119 = vmatprep.mubr.f32.mxu0 %v1884_v51  ;;  %2190 = vmatprep.mubr.f32.mxu1 %v1884_v51  ;;  %v2047_v34 = vadd.f32 1.0, %v2424_v28 }
 0x59c   :  { %2429 = vrcp.f32 %v2047_v34 }
 0x5a3   :  { %v2426_v30 = vpop.eup %2425 }
 0x5a4   :  { %v2051_v32 = vmul.f32 %v2426_v30, %v2422_v27 }
 0x5a5   :  { %v2428_v33 = vpop.eup %2427 }
 0x5a6   :  { %v2050_v35 = vmul.f32 %v2428_v33, %v4686_v8 }
 0x5a8   :  { %v2052_v37 = vadd.f32 %v2051_v32, %v2050_v35 }
 0x5a9   :  { %v2430_v38 = vpop.eup %2429 }
 0x5aa   :  { %2431 = vtanh.f32 %v2052_v37 }
 0x5b7   :  { %v2432_v39 = vpop.eup %2431 }
 0x5b8   :  { %v2054_v19 = vmul.f32 %v2432_v39, %v2430_v38 }
 0x5ba   :  { %2120 = vmatmul.mubr.f32.vlgmr.msra.gmra.mxu0 %v2054_v19  ;;  %2191 = vmatmul.mubr.f32.vlgmr.msra.gmra.mxu1 %v2054_v19 }
 0x67a   :  { %v2121_v52 = vpop.f32.mrf.mxu0  ;;  %v2192_v41 = vpop.f32.mrf.mxu1 }
 0x67b   :  { %v2122_v22 = vadd.f32 %v2121_v52, %v5680_v26  ;;  %v2193_v57 = vadd.f32 %v2192_v41, %v5683_v49 }
 0x67c   :  { %v2123_v56 = vpop.f32.mrf.mxu0  ;;  %v2194_v8 = vpop.f32.mrf.mxu1 }
 0x67d   :  { %v2279_v43 = vmul.f32 -1.442695, %v2122_v22  ;;  %v2124_v29 = vadd.f32 %v2123_v56, %v5681_v31  ;;  %v2195_v40 = vadd.f32 %v2194_v8, %v5682_v36 }
 0x67f   :  { %2433 = vpow2.f32 %v2279_v43  ;;  %v2280_v6 = vmul.f32 -1.442695, %v2124_v29  ;;  %v2281_v48 = vmul.f32 -1.442695, %v2195_v40 }
 0x681   :  { %2435 = vpow2.f32 %v2280_v6 }
 0x682   :  { %2437 = vpow2.f32 %v2281_v48 }
 0x68c   :  { %v2434_v47 = vpop.eup %2433 }
 0x68d   :  { %v2200_v45 = vadd.f32 1.0, %v2434_v47 }
 0x68e   :  { %v2436_v59 = vpop.eup %2435 }
 0x68f   :  { %2439 = vrcp.f32 %v2200_v45  ;;  %v2206_v26 = vadd.f32 1.0, %v2436_v59  ;;  %v2438_v60 = vpop.eup %2437 }
 0x690   :  { %2441 = vtanh.f32 %v2193_v57  ;;  %v2213_v63 = vadd.f32 1.0, %v2438_v60 }
 0x691   :  { %2443 = vrcp.f32 %v2206_v26 }
 0x692   :  { %2445 = vrcp.f32 %v2213_v63 }
 0x69c   :  { %v2440_v31 = vpop.eup %2439 }
 0x69d   :  { %v2442_v42 = vpop.eup %2441 }
 0x69e   :  { %v2444_v44 = vpop.eup %2443  ;;  %v2217_v58 = vmul.f32 %v2442_v42, %v2440_v31 }
 0x69f   :  { %v2216_v53 = vmul.f32 %v2444_v44, %v4704_v14  ;;  %v2446_v49 = vpop.eup %2445 }
 0x6a1   :  { %v2218_v36 = vadd.f32 %v2217_v58, %v2216_v53 }
 0x6a3   :  { %2447 = vtanh.f32 %v2218_v36 }
 0x6b0   :  { %v2448_v54 = vpop.eup %2447 }
 0x6b1   :  { %v2220_v7 = vmul.f32 %v2448_v54, %v2446_v49 }
 0x6b3   :  { %2221 = vst [vmem:[#allocation8] sm:$0xff] %v2220_v7 }
 0x6b4   :  { %2904 = shalt.err (!%p2901_p5)
}
 0x6b5   :  { %2231 = dma.vmem_to_hbm [thread:$0]  %s2229_s23, 128, %s4724_s6, [#allocation4]  }
 0x6b6   :  { %2917 = dma.done.wait [#allocation4], 128  }
 0x6b7   :  { %2918 = vsyncadd [#allocation4], 4294967168 }
 0x6b8   :  { %2235 = vsyncpa [#allocation3], 1 }
 0x6b9   :  { %2236 = vsyncpa [#allocation6], 1 }
 0x6ba   :  { %2237 = vsyncpa [#allocation4], 1 }

</bundles_post_ra>
